<compile_context>
chip_gen: v6e
topology: v6e:2x2x1
jax: 0.10.0
libtpu: 0.0.40
codegen_flags: <defaults>
</compile_context>

<pallas_src>
import functools

import jax
import jax.numpy as jnp
from jax import lax
from jax.experimental import pallas as pl
from jax.experimental.pallas import tpu as pltpu


# ---------------------------------------------------------------------------
# Kernel
# ---------------------------------------------------------------------------
def _conv_bn_act_kernel(x_ref, w_ref, scale_ref, bias_ref, *rest,
                        apply_relu, add_residual):
    """One (batch, D-tile) step: 3x3x3 conv + folded BN (+ residual) (+ ReLU).

    x_ref    : [td+2, H+2, (W+2)*Cin]  bf16  padded input slab (D halo included)
    w_ref    : [9, (W+2)*Cin, W*Cout]  bf16  per-(kd,kh) tap-Toeplitz weights
    scale_ref: [1, W*Cout]             f32   folded BN scale, tiled over W
    bias_ref : [1, W*Cout]             f32   folded BN bias,  tiled over W
    res_ref  : [td*H, W*Cout]          f32   residual slab (only if add_residual)
    out_ref  : [td*H, W*Cout]
    """
    if add_residual:
        res_ref, out_ref = rest
    else:
        (out_ref,) = rest

    tdp2, hp2, _ = x_ref.shape
    td, h = tdp2 - 2, hp2 - 2
    k = w_ref.shape[1]        # (W+2)*Cin
    n_out = w_ref.shape[2]    # W*Cout

    # 9 wide matmuls accumulated in f32. The accumulator is only
    # [td*H, W*Cout] f32 (a handful of vregs at this tile size), so no VMEM
    # scratch accumulator is needed.
    acc = jnp.zeros((td * h, n_out), dtype=jnp.float32)
    for kd in range(3):                       # static -> unrolled
        for kh in range(3):
            lhs = x_ref[kd:kd + td, kh:kh + h, :].reshape(td * h, k)
            acc = acc + jnp.dot(lhs, w_ref[3 * kd + kh],
                                preferred_element_type=jnp.float32)

    out = acc * scale_ref[...] + bias_ref[...]       # folded BN (f32, dense lanes)
    if add_residual:
        out = out + res_ref[...]
    if apply_relu:
        out = jnp.maximum(out, 0.0)
    out_ref[...] = out.astype(out_ref.dtype)


# ---------------------------------------------------------------------------
# pallas_call wrapper for one conv+BN(+residual)(+ReLU) layer
# ---------------------------------------------------------------------------
def conv3x3x3_bn_act(x_win, w_toep, scale_d, bias_d, residual=None, *,
                     relu=True, out_dtype=jnp.float32,
                     vmem_limit_bytes=32 * 1024 * 1024):
    """x_win: [N, nDT, td+2, H+2, (W+2)*Cin] bf16 overlapping-D windows.
    Returns [N, nDT*td*H, W*Cout] (lane-dense layout) in `out_dtype`."""
    n, ndt, tdp2, hp2, wcin = x_win.shape
    td, h = tdp2 - 2, hp2 - 2
    wcout = w_toep.shape[-1]
    add_res = residual is not None

    in_specs = [
        pl.BlockSpec((None, None, tdp2, hp2, wcin),
                     lambda b, j: (b, j, 0, 0, 0)),
        pl.BlockSpec(w_toep.shape, lambda b, j: (0, 0, 0)),
        pl.BlockSpec(scale_d.shape, lambda b, j: (0, 0)),
        pl.BlockSpec(bias_d.shape, lambda b, j: (0, 0)),
    ]
    operands = [x_win, w_toep, scale_d, bias_d]
    if add_res:
        in_specs.append(pl.BlockSpec((None, td * h, wcout),
                                     lambda b, j: (b, j, 0)))
        operands.append(residual)

    kernel = functools.partial(_conv_bn_act_kernel,
                               apply_relu=relu, add_residual=add_res)
    return pl.pallas_call(
        kernel,
        grid=(n, ndt),
        in_specs=in_specs,
        out_specs=pl.BlockSpec((None, td * h, wcout), lambda b, j: (b, j, 0)),
        out_shape=jax.ShapeDtypeStruct((n, ndt * td * h, wcout), out_dtype),
        compiler_params=pltpu.CompilerParams(
            dimension_semantics=("parallel", "parallel"),
            vmem_limit_bytes=vmem_limit_bytes),
    )(*operands)


# ---------------------------------------------------------------------------
# Wrapper-side data preparation (all plain XLA ops)
# ---------------------------------------------------------------------------
def _make_windows(x_ndhwc, td):
    """[N, D, H, W, C] -> [N, D//td, td+2, H+2, (W+2)*C] overlapping-D windows."""
    n, d, h, w, c = x_ndhwc.shape
    assert d % td == 0
    ndt = d // td
    xpad = jnp.pad(x_ndhwc, ((0, 0), (1, 1), (1, 1), (1, 1), (0, 0)))
    wins = jnp.stack([xpad[:, j * td:j * td + td + 2] for j in range(ndt)],
                     axis=1)
    return wins.reshape(n, ndt, td + 2, h + 2, (w + 2) * c)


def _toeplitz_weights(w_oidhw, width):
    """PyTorch conv weight (Cout, Cin, 3, 3, 3) ->
    per-(kd,kh) Toeplitz matrices [9, (W+2)*Cin, W*Cout] so that the W-taps and
    the input channels both fold into the matmul contraction dimension."""
    cout, cin = w_oidhw.shape[0], w_oidhw.shape[1]
    wt = jnp.transpose(w_oidhw, (2, 3, 4, 1, 0))            # [3,3,3,Cin,Cout]
    p = jnp.arange(width + 2)[:, None]                      # padded input col
    q = jnp.arange(width)[None, :]                          # output col
    sel = jnp.stack([(p - q) == kw for kw in range(3)],
                    axis=0).astype(w_oidhw.dtype)           # [3, W+2, W]
    toep = jnp.einsum('kpw,dhkio->dhpiwo', sel, wt)         # [3,3,W+2,Cin,W,Cout]
    return toep.reshape(9, (width + 2) * cin, width * cout)


# ---------------------------------------------------------------------------
# BasicBlock
# ---------------------------------------------------------------------------
class BasicBlockPallas:
    """Deterministically-initialized BasicBlock (stride=1, downsample=None)."""

    def __init__(self, inplanes, planes, key, eps=1e-5, td=8):
        assert inplanes == planes, "stride=1 / downsample=None needs inplanes == planes"
        self.eps = eps
        self.td = td
        k = jax.random.split(key, 10)
        std1 = (inplanes * 27) ** -0.5
        std2 = (planes * 27) ** -0.5
        # PyTorch-layout conv weights: (Cout, Cin, kD, kH, kW)
        self.w1 = jax.random.normal(k[0], (planes, inplanes, 3, 3, 3), jnp.float32) * std1
        self.w2 = jax.random.normal(k[1], (planes, planes, 3, 3, 3), jnp.float32) * std2
        # BatchNorm3d params + running stats (eval mode)
        self.g1 = 0.5 + jax.random.uniform(k[2], (planes,), jnp.float32)
        self.be1 = 0.1 * jax.random.normal(k[3], (planes,), jnp.float32)
        self.m1 = 0.1 * jax.random.normal(k[4], (planes,), jnp.float32)
        self.v1 = 0.5 + jax.random.uniform(k[5], (planes,), jnp.float32)
        self.g2 = 0.5 + jax.random.uniform(k[6], (planes,), jnp.float32)
        self.be2 = 0.1 * jax.random.normal(k[7], (planes,), jnp.float32)
        self.m2 = 0.1 * jax.random.normal(k[8], (planes,), jnp.float32)
        self.v2 = 0.5 + jax.random.uniform(k[9], (planes,), jnp.float32)
        # Fold BN: y = x*scale + bias
        self.s1 = self.g1 / jnp.sqrt(self.v1 + eps)
        self.b1 = self.be1 - self.m1 * self.s1
        self.s2 = self.g2 / jnp.sqrt(self.v2 + eps)
        self.b2 = self.be2 - self.m2 * self.s2
        self._fwd = jax.jit(self._forward)

    def _forward(self, x_ncdhw):
        x = jnp.transpose(x_ncdhw, (0, 2, 3, 4, 1)).astype(jnp.float32)  # NDHWC
        n, d, h, w, c = x.shape
        td = min(self.td, d)
        assert d % td == 0 and (td * h) % 8 == 0

        # Weight / BN prep (tiny; constant-folded under jit)
        w1t = _toeplitz_weights(self.w1, w).astype(jnp.bfloat16)
        w2t = _toeplitz_weights(self.w2, w).astype(jnp.bfloat16)
        s1d = jnp.tile(self.s1, w).reshape(1, w * c)
        b1d = jnp.tile(self.b1, w).reshape(1, w * c)
        s2d = jnp.tile(self.s2, w).reshape(1, w * c)
        b2d = jnp.tile(self.b2, w).reshape(1, w * c)

        # conv1 + bn1 + relu  (bf16 MXU inputs, bf16 intermediate in HBM)
        xw = _make_windows(x.astype(jnp.bfloat16), td)
        h1 = conv3x3x3_bn_act(xw, w1t, s1d, b1d, relu=True,
                              out_dtype=jnp.bfloat16)

        # conv2 + bn2 + residual + relu (residual kept in f32)
        h1w = _make_windows(h1.reshape(n, d, h, w, c), td)
        res = x.reshape(n, d * h, w * c)
        out = conv3x3x3_bn_act(h1w, w2t, s2d, b2d, residual=res, relu=True,
                               out_dtype=jnp.float32)

        out = out.reshape(n, d, h, w, c)
        return jnp.transpose(out, (0, 4, 1, 2, 3))           # back to NCDHW

    def __call__(self, x_ncdhw):
        return self._fwd(x_ncdhw)


# ---------------------------------------------------------------------------
# References
# ---------------------------------------------------------------------------
def reference_forward(x_ncdhw, blk, conv_dtype=jnp.float32):
    """Pure-JAX reference matching the PyTorch forward (eval-mode BN).
    With conv_dtype=bfloat16 it mirrors the kernel's bf16-MXU-input /
    f32-accumulate numerics (for a tight comparison)."""
    def conv(x, w):
        return lax.conv_general_dilated(
            x.astype(conv_dtype), w.astype(conv_dtype),
            window_strides=(1, 1, 1), padding=((1, 1), (1, 1), (1, 1)),
            dimension_numbers=("NCDHW", "OIDHW", "NCDHW"),
            preferred_element_type=jnp.float32)

    def bn(x, g, b, m, v):
        s = g / jnp.sqrt(v + blk.eps)
        return (x * s[None, :, None, None, None]
                + (b - m * s)[None, :, None, None, None])

    x32 = x_ncdhw.astype(jnp.float32)
    hid = jax.nn.relu(bn(conv(x32, blk.w1), blk.g1, blk.be1, blk.m1, blk.v1))
    if conv_dtype != jnp.float32:
        hid = hid.astype(conv_dtype).astype(jnp.float32)  # mirror bf16 intermediate
    out = bn(conv(hid, blk.w2), blk.g2, blk.be2, blk.m2, blk.v2)
    return jax.nn.relu(out + x32)


if __name__ == "__main__":
    key = jax.random.PRNGKey(0)
    kx, kp = jax.random.split(key)
    N, C, D, H, W = 2, 4, 16, 16, 16          # inplanes == planes == 4
    x = jax.random.normal(kx, (N, C, D, H, W), jnp.float32)

    block = BasicBlockPallas(C, C, kp, td=8)
    out = block(x)
    jax.block_until_ready(out)
    assert out.shape == (N, C, D, H, W)

    # Tight check vs a reference that mirrors the kernel's bf16-input /
    # f32-accumulate numerics (tolerance covers bf16-ulp flips of the
    # intermediate propagated through conv2).
    ref_bf16 = reference_forward(x, block, conv_dtype=jnp.bfloat16)
    if not jnp.allclose(out, ref_bf16, atol=5e-2, rtol=5e-2):
        err = float(jnp.max(jnp.abs(out - ref_bf16)))
        raise SystemExit(f"mismatch vs bf16-matched reference, max abs err = {err:e}")

    # Loose sanity check vs the pure-f32 PyTorch-semantics reference
    # (bf16 MXU inputs introduce ~1e-2-level deviations).
    ref_f32 = reference_forward(x, block, conv_dtype=jnp.float32)
    if float(jnp.max(jnp.abs(out - ref_f32))) > 0.35:
        raise SystemExit("mismatch vs f32 reference beyond bf16 tolerance")

    print("KERNEL_OK")
</pallas_src>

<mosaic_0001>
module attributes {stable_mosaic.version = 11 : i64} {
  func.func @_conv_bn_act_kernel(%arg0: i32, %arg1: i32, %arg2: memref<1x1x10x18x72xbf16, #tpu.memory_space<vmem>>, %arg3: memref<9x72x64xbf16, #tpu.memory_space<vmem>>, %arg4: memref<1x64xf32, #tpu.memory_space<vmem>>, %arg5: memref<1x64xf32, #tpu.memory_space<vmem>>, %arg6: memref<1x128x64xbf16, #tpu.memory_space<vmem>>) attributes {dimension_semantics = [#tpu.dimension_semantics<parallel>, #tpu.dimension_semantics<parallel>], iteration_bounds = array<i64: 2, 2>, scalar_prefetch = 0 : i64, scratch_operands = 0 : i64, tpu.core_type = #tpu.core_type<tc>, window_params = [{transform_indices = @transform_0, window_bounds = array<i64: 1, 1, 10, 18, 72>}, {pipeline_mode = #tpu.pipeline_mode<synchronous>, transform_indices = @transform_1, window_bounds = array<i64: 9, 72, 64>}, {pipeline_mode = #tpu.pipeline_mode<synchronous>, transform_indices = @transform_2, window_bounds = array<i64: 1, 64>}, {pipeline_mode = #tpu.pipeline_mode<synchronous>, transform_indices = @transform_3, window_bounds = array<i64: 1, 64>}, {transform_indices = @transform_4, window_bounds = array<i64: 1, 128, 64>}]} {
    %cst = arith.constant 0.000000e+00 : f32
    %0 = vector.broadcast %cst : f32 to vector<128x64xf32>
    %c0 = arith.constant 0 : index
    %c0_0 = arith.constant 0 : index
    %c0_1 = arith.constant 0 : index
    %c0_2 = arith.constant 0 : index
    %c0_3 = arith.constant 0 : index
    %1 = vector.load %arg2[%c0, %c0_0, %c0_1, %c0_2, %c0_3] : memref<1x1x10x18x72xbf16, #tpu.memory_space<vmem>>, vector<1x1x8x16x72xbf16>
    %2 = vector.shape_cast %1 : vector<1x1x8x16x72xbf16> to vector<8x16x72xbf16>
    %3 = vector.shape_cast %2 : vector<8x16x72xbf16> to vector<128x72xbf16>
    %c0_4 = arith.constant 0 : index
    %c0_5 = arith.constant 0 : index
    %c0_6 = arith.constant 0 : index
    %4 = vector.load %arg3[%c0_4, %c0_5, %c0_6] : memref<9x72x64xbf16, #tpu.memory_space<vmem>>, vector<1x72x64xbf16>
    %5 = vector.shape_cast %4 : vector<1x72x64xbf16> to vector<72x64xbf16>
    %cst_7 = arith.constant dense<0.000000e+00> : vector<128x64xf32>
    %6 = tpu.matmul %3, %5, %cst_7 {dimension_numbers = #tpu.dot_dimension_numbers<[1], [0], [0], [1], [0, 0, 1, 1], [], []>} : vector<128x72xbf16>, vector<72x64xbf16>, vector<128x64xf32> -> vector<128x64xf32>
    %7 = arith.addf %0, %6 : vector<128x64xf32>
    %c0_8 = arith.constant 0 : index
    %c0_9 = arith.constant 0 : index
    %c0_10 = arith.constant 0 : index
    %c1 = arith.constant 1 : index
    %c0_11 = arith.constant 0 : index
    %8 = vector.load %arg2[%c0_8, %c0_9, %c0_10, %c1, %c0_11] : memref<1x1x10x18x72xbf16, #tpu.memory_space<vmem>>, vector<1x1x8x16x72xbf16>
    %9 = vector.shape_cast %8 : vector<1x1x8x16x72xbf16> to vector<8x16x72xbf16>
    %10 = vector.shape_cast %9 : vector<8x16x72xbf16> to vector<128x72xbf16>
    %c1_12 = arith.constant 1 : index
    %c0_13 = arith.constant 0 : index
    %c0_14 = arith.constant 0 : index
    %11 = vector.load %arg3[%c1_12, %c0_13, %c0_14] : memref<9x72x64xbf16, #tpu.memory_space<vmem>>, vector<1x72x64xbf16>
    %12 = vector.shape_cast %11 : vector<1x72x64xbf16> to vector<72x64xbf16>
    %cst_15 = arith.constant dense<0.000000e+00> : vector<128x64xf32>
    %13 = tpu.matmul %10, %12, %cst_15 {dimension_numbers = #tpu.dot_dimension_numbers<[1], [0], [0], [1], [0, 0, 1, 1], [], []>} : vector<128x72xbf16>, vector<72x64xbf16>, vector<128x64xf32> -> vector<128x64xf32>
    %14 = arith.addf %7, %13 : vector<128x64xf32>
    %c0_16 = arith.constant 0 : index
    %c0_17 = arith.constant 0 : index
    %c0_18 = arith.constant 0 : index
    %c2 = arith.constant 2 : index
    %c0_19 = arith.constant 0 : index
    %15 = vector.load %arg2[%c0_16, %c0_17, %c0_18, %c2, %c0_19] : memref<1x1x10x18x72xbf16, #tpu.memory_space<vmem>>, vector<1x1x8x16x72xbf16>
    %16 = vector.shape_cast %15 : vector<1x1x8x16x72xbf16> to vector<8x16x72xbf16>
    %17 = vector.shape_cast %16 : vector<8x16x72xbf16> to vector<128x72xbf16>
    %c2_20 = arith.constant 2 : index
    %c0_21 = arith.constant 0 : index
    %c0_22 = arith.constant 0 : index
    %18 = vector.load %arg3[%c2_20, %c0_21, %c0_22] : memref<9x72x64xbf16, #tpu.memory_space<vmem>>, vector<1x72x64xbf16>
    %19 = vector.shape_cast %18 : vector<1x72x64xbf16> to vector<72x64xbf16>
    %cst_23 = arith.constant dense<0.000000e+00> : vector<128x64xf32>
    %20 = tpu.matmul %17, %19, %cst_23 {dimension_numbers = #tpu.dot_dimension_numbers<[1], [0], [0], [1], [0, 0, 1, 1], [], []>} : vector<128x72xbf16>, vector<72x64xbf16>, vector<128x64xf32> -> vector<128x64xf32>
    %21 = arith.addf %14, %20 : vector<128x64xf32>
    %c0_24 = arith.constant 0 : index
    %c0_25 = arith.constant 0 : index
    %c1_26 = arith.constant 1 : index
    %c0_27 = arith.constant 0 : index
    %c0_28 = arith.constant 0 : index
    %22 = vector.load %arg2[%c0_24, %c0_25, %c1_26, %c0_27, %c0_28] : memref<1x1x10x18x72xbf16, #tpu.memory_space<vmem>>, vector<1x1x8x16x72xbf16>
    %23 = vector.shape_cast %22 : vector<1x1x8x16x72xbf16> to vector<8x16x72xbf16>
    %24 = vector.shape_cast %23 : vector<8x16x72xbf16> to vector<128x72xbf16>
    %c3 = arith.constant 3 : index
    %c0_29 = arith.constant 0 : index
    %c0_30 = arith.constant 0 : index
    %25 = vector.load %arg3[%c3, %c0_29, %c0_30] : memref<9x72x64xbf16, #tpu.memory_space<vmem>>, vector<1x72x64xbf16>
    %26 = vector.shape_cast %25 : vector<1x72x64xbf16> to vector<72x64xbf16>
    %cst_31 = arith.constant dense<0.000000e+00> : vector<128x64xf32>
    %27 = tpu.matmul %24, %26, %cst_31 {dimension_numbers = #tpu.dot_dimension_numbers<[1], [0], [0], [1], [0, 0, 1, 1], [], []>} : vector<128x72xbf16>, vector<72x64xbf16>, vector<128x64xf32> -> vector<128x64xf32>
    %28 = arith.addf %21, %27 : vector<128x64xf32>
    %c0_32 = arith.constant 0 : index
    %c0_33 = arith.constant 0 : index
    %c1_34 = arith.constant 1 : index
    %c1_35 = arith.constant 1 : index
    %c0_36 = arith.constant 0 : index
    %29 = vector.load %arg2[%c0_32, %c0_33, %c1_34, %c1_35, %c0_36] : memref<1x1x10x18x72xbf16, #tpu.memory_space<vmem>>, vector<1x1x8x16x72xbf16>
    %30 = vector.shape_cast %29 : vector<1x1x8x16x72xbf16> to vector<8x16x72xbf16>
    %31 = vector.shape_cast %30 : vector<8x16x72xbf16> to vector<128x72xbf16>
    %c4 = arith.constant 4 : index
    %c0_37 = arith.constant 0 : index
    %c0_38 = arith.constant 0 : index
    %32 = vector.load %arg3[%c4, %c0_37, %c0_38] : memref<9x72x64xbf16, #tpu.memory_space<vmem>>, vector<1x72x64xbf16>
    %33 = vector.shape_cast %32 : vector<1x72x64xbf16> to vector<72x64xbf16>
    %cst_39 = arith.constant dense<0.000000e+00> : vector<128x64xf32>
    %34 = tpu.matmul %31, %33, %cst_39 {dimension_numbers = #tpu.dot_dimension_numbers<[1], [0], [0], [1], [0, 0, 1, 1], [], []>} : vector<128x72xbf16>, vector<72x64xbf16>, vector<128x64xf32> -> vector<128x64xf32>
    %35 = arith.addf %28, %34 : vector<128x64xf32>
    %c0_40 = arith.constant 0 : index
    %c0_41 = arith.constant 0 : index
    %c1_42 = arith.constant 1 : index
    %c2_43 = arith.constant 2 : index
    %c0_44 = arith.constant 0 : index
    %36 = vector.load %arg2[%c0_40, %c0_41, %c1_42, %c2_43, %c0_44] : memref<1x1x10x18x72xbf16, #tpu.memory_space<vmem>>, vector<1x1x8x16x72xbf16>
    %37 = vector.shape_cast %36 : vector<1x1x8x16x72xbf16> to vector<8x16x72xbf16>
    %38 = vector.shape_cast %37 : vector<8x16x72xbf16> to vector<128x72xbf16>
    %c5 = arith.constant 5 : index
    %c0_45 = arith.constant 0 : index
    %c0_46 = arith.constant 0 : index
    %39 = vector.load %arg3[%c5, %c0_45, %c0_46] : memref<9x72x64xbf16, #tpu.memory_space<vmem>>, vector<1x72x64xbf16>
    %40 = vector.shape_cast %39 : vector<1x72x64xbf16> to vector<72x64xbf16>
    %cst_47 = arith.constant dense<0.000000e+00> : vector<128x64xf32>
    %41 = tpu.matmul %38, %40, %cst_47 {dimension_numbers = #tpu.dot_dimension_numbers<[1], [0], [0], [1], [0, 0, 1, 1], [], []>} : vector<128x72xbf16>, vector<72x64xbf16>, vector<128x64xf32> -> vector<128x64xf32>
    %42 = arith.addf %35, %41 : vector<128x64xf32>
    %c0_48 = arith.constant 0 : index
    %c0_49 = arith.constant 0 : index
    %c2_50 = arith.constant 2 : index
    %c0_51 = arith.constant 0 : index
    %c0_52 = arith.constant 0 : index
    %43 = vector.load %arg2[%c0_48, %c0_49, %c2_50, %c0_51, %c0_52] : memref<1x1x10x18x72xbf16, #tpu.memory_space<vmem>>, vector<1x1x8x16x72xbf16>
    %44 = vector.shape_cast %43 : vector<1x1x8x16x72xbf16> to vector<8x16x72xbf16>
    %45 = vector.shape_cast %44 : vector<8x16x72xbf16> to vector<128x72xbf16>
    %c6 = arith.constant 6 : index
    %c0_53 = arith.constant 0 : index
    %c0_54 = arith.constant 0 : index
    %46 = vector.load %arg3[%c6, %c0_53, %c0_54] : memref<9x72x64xbf16, #tpu.memory_space<vmem>>, vector<1x72x64xbf16>
    %47 = vector.shape_cast %46 : vector<1x72x64xbf16> to vector<72x64xbf16>
    %cst_55 = arith.constant dense<0.000000e+00> : vector<128x64xf32>
    %48 = tpu.matmul %45, %47, %cst_55 {dimension_numbers = #tpu.dot_dimension_numbers<[1], [0], [0], [1], [0, 0, 1, 1], [], []>} : vector<128x72xbf16>, vector<72x64xbf16>, vector<128x64xf32> -> vector<128x64xf32>
    %49 = arith.addf %42, %48 : vector<128x64xf32>
    %c0_56 = arith.constant 0 : index
    %c0_57 = arith.constant 0 : index
    %c2_58 = arith.constant 2 : index
    %c1_59 = arith.constant 1 : index
    %c0_60 = arith.constant 0 : index
    %50 = vector.load %arg2[%c0_56, %c0_57, %c2_58, %c1_59, %c0_60] : memref<1x1x10x18x72xbf16, #tpu.memory_space<vmem>>, vector<1x1x8x16x72xbf16>
    %51 = vector.shape_cast %50 : vector<1x1x8x16x72xbf16> to vector<8x16x72xbf16>
    %52 = vector.shape_cast %51 : vector<8x16x72xbf16> to vector<128x72xbf16>
    %c7 = arith.constant 7 : index
    %c0_61 = arith.constant 0 : index
    %c0_62 = arith.constant 0 : index
    %53 = vector.load %arg3[%c7, %c0_61, %c0_62] : memref<9x72x64xbf16, #tpu.memory_space<vmem>>, vector<1x72x64xbf16>
    %54 = vector.shape_cast %53 : vector<1x72x64xbf16> to vector<72x64xbf16>
    %cst_63 = arith.constant dense<0.000000e+00> : vector<128x64xf32>
    %55 = tpu.matmul %52, %54, %cst_63 {dimension_numbers = #tpu.dot_dimension_numbers<[1], [0], [0], [1], [0, 0, 1, 1], [], []>} : vector<128x72xbf16>, vector<72x64xbf16>, vector<128x64xf32> -> vector<128x64xf32>
    %56 = arith.addf %49, %55 : vector<128x64xf32>
    %c0_64 = arith.constant 0 : index
    %c0_65 = arith.constant 0 : index
    %c2_66 = arith.constant 2 : index
    %c2_67 = arith.constant 2 : index
    %c0_68 = arith.constant 0 : index
    %57 = vector.load %arg2[%c0_64, %c0_65, %c2_66, %c2_67, %c0_68] : memref<1x1x10x18x72xbf16, #tpu.memory_space<vmem>>, vector<1x1x8x16x72xbf16>
    %58 = vector.shape_cast %57 : vector<1x1x8x16x72xbf16> to vector<8x16x72xbf16>
    %59 = vector.shape_cast %58 : vector<8x16x72xbf16> to vector<128x72xbf16>
    %c8 = arith.constant 8 : index
    %c0_69 = arith.constant 0 : index
    %c0_70 = arith.constant 0 : index
    %60 = vector.load %arg3[%c8, %c0_69, %c0_70] : memref<9x72x64xbf16, #tpu.memory_space<vmem>>, vector<1x72x64xbf16>
    %61 = vector.shape_cast %60 : vector<1x72x64xbf16> to vector<72x64xbf16>
    %cst_71 = arith.constant dense<0.000000e+00> : vector<128x64xf32>
    %62 = tpu.matmul %59, %61, %cst_71 {dimension_numbers = #tpu.dot_dimension_numbers<[1], [0], [0], [1], [0, 0, 1, 1], [], []>} : vector<128x72xbf16>, vector<72x64xbf16>, vector<128x64xf32> -> vector<128x64xf32>
    %63 = arith.addf %56, %62 : vector<128x64xf32>
    %c0_72 = arith.constant 0 : index
    %c0_73 = arith.constant 0 : index
    %64 = vector.load %arg4[%c0_72, %c0_73] : memref<1x64xf32, #tpu.memory_space<vmem>>, vector<1x64xf32>
    %65 = vector.broadcast %64 : vector<1x64xf32> to vector<128x64xf32>
    %66 = arith.mulf %63, %65 : vector<128x64xf32>
    %c0_74 = arith.constant 0 : index
    %c0_75 = arith.constant 0 : index
    %67 = vector.load %arg5[%c0_74, %c0_75] : memref<1x64xf32, #tpu.memory_space<vmem>>, vector<1x64xf32>
    %68 = vector.broadcast %67 : vector<1x64xf32> to vector<128x64xf32>
    %69 = arith.addf %66, %68 : vector<128x64xf32>
    %cst_76 = arith.constant 0.000000e+00 : f32
    %70 = vector.broadcast %cst_76 : f32 to vector<128x64xf32>
    %71 = arith.maximumf %69, %70 : vector<128x64xf32>
    %72 = arith.truncf %71 : vector<128x64xf32> to vector<128x64xbf16>
    %c0_77 = arith.constant 0 : index
    %c0_78 = arith.constant 0 : index
    %c0_79 = arith.constant 0 : index
    %73 = vector.load %arg6[%c0_77, %c0_78, %c0_79] : memref<1x128x64xbf16, #tpu.memory_space<vmem>>, vector<1x128x64xbf16>
    %74 = vector.shape_cast %73 : vector<1x128x64xbf16> to vector<128x64xbf16>
    %75 = vector.shape_cast %72 : vector<128x64xbf16> to vector<1x128x64xbf16>
    tpu.vector_store %arg6[%c0_77, %c0_78, %c0_79], %75 {strides = array<i32>} : memref<1x128x64xbf16, #tpu.memory_space<vmem>>, vector<1x128x64xbf16>,
    return
  }
  func.func @transform_0(%arg0: i32, %arg1: i32) -> (i32, i32, i32, i32, i32) {
    %c0_i32 = arith.constant 0 : i32
    %c0_i32_0 = arith.constant 0 : i32
    %c0_i32_1 = arith.constant 0 : i32
    %c0_i32_2 = arith.constant 0 : i32
    return %arg0, %arg1, %c0_i32, %c0_i32_0, %c0_i32_1 : i32, i32, i32, i32, i32
  }
  func.func @transform_1(%arg0: i32, %arg1: i32) -> (i32, i32, i32) {
    %c0_i32 = arith.constant 0 : i32
    %c0_i32_0 = arith.constant 0 : i32
    %c0_i32_1 = arith.constant 0 : i32
    %c0_i32_2 = arith.constant 0 : i32
    return %c0_i32, %c0_i32_0, %c0_i32_1 : i32, i32, i32
  }
  func.func @transform_2(%arg0: i32, %arg1: i32) -> (i32, i32) {
    %c0_i32 = arith.constant 0 : i32
    %c0_i32_0 = arith.constant 0 : i32
    %c0_i32_1 = arith.constant 0 : i32
    return %c0_i32, %c0_i32_0 : i32, i32
  }
  func.func @transform_3(%arg0: i32, %arg1: i32) -> (i32, i32) {
    %c0_i32 = arith.constant 0 : i32
    %c0_i32_0 = arith.constant 0 : i32
    %c0_i32_1 = arith.constant 0 : i32
    return %c0_i32, %c0_i32_0 : i32, i32
  }
  func.func @transform_4(%arg0: i32, %arg1: i32) -> (i32, i32, i32) {
    %c0_i32 = arith.constant 0 : i32
    %c0_i32_0 = arith.constant 0 : i32
    return %arg0, %arg1, %c0_i32 : i32, i32, i32
  }
}

module attributes {stable_mosaic.version = 11 : i64} {
  func.func @_conv_bn_act_kernel(%arg0: i32, %arg1: i32, %arg2: memref<1x1x10x18x72xbf16, #tpu.memory_space<vmem>>, %arg3: memref<9x72x64xbf16, #tpu.memory_space<vmem>>, %arg4: memref<1x64xf32, #tpu.memory_space<vmem>>, %arg5: memref<1x64xf32, #tpu.memory_space<vmem>>, %arg6: memref<1x128x64xf32, #tpu.memory_space<vmem>>, %arg7: memref<1x128x64xf32, #tpu.memory_space<vmem>>) attributes {dimension_semantics = [#tpu.dimension_semantics<parallel>, #tpu.dimension_semantics<parallel>], iteration_bounds = array<i64: 2, 2>, scalar_prefetch = 0 : i64, scratch_operands = 0 : i64, tpu.core_type = #tpu.core_type<tc>, window_params = [{transform_indices = @transform_0, window_bounds = array<i64: 1, 1, 10, 18, 72>}, {pipeline_mode = #tpu.pipeline_mode<synchronous>, transform_indices = @transform_1, window_bounds = array<i64: 9, 72, 64>}, {pipeline_mode = #tpu.pipeline_mode<synchronous>, transform_indices = @transform_2, window_bounds = array<i64: 1, 64>}, {pipeline_mode = #tpu.pipeline_mode<synchronous>, transform_indices = @transform_3, window_bounds = array<i64: 1, 64>}, {transform_indices = @transform_4, window_bounds = array<i64: 1, 128, 64>}, {transform_indices = @transform_5, window_bounds = array<i64: 1, 128, 64>}]} {
    %cst = arith.constant 0.000000e+00 : f32
    %0 = vector.broadcast %cst : f32 to vector<128x64xf32>
    %c0 = arith.constant 0 : index
    %c0_0 = arith.constant 0 : index
    %c0_1 = arith.constant 0 : index
    %c0_2 = arith.constant 0 : index
    %c0_3 = arith.constant 0 : index
    %1 = vector.load %arg2[%c0, %c0_0, %c0_1, %c0_2, %c0_3] : memref<1x1x10x18x72xbf16, #tpu.memory_space<vmem>>, vector<1x1x8x16x72xbf16>
    %2 = vector.shape_cast %1 : vector<1x1x8x16x72xbf16> to vector<8x16x72xbf16>
    %3 = vector.shape_cast %2 : vector<8x16x72xbf16> to vector<128x72xbf16>
    %c0_4 = arith.constant 0 : index
    %c0_5 = arith.constant 0 : index
    %c0_6 = arith.constant 0 : index
    %4 = vector.load %arg3[%c0_4, %c0_5, %c0_6] : memref<9x72x64xbf16, #tpu.memory_space<vmem>>, vector<1x72x64xbf16>
    %5 = vector.shape_cast %4 : vector<1x72x64xbf16> to vector<72x64xbf16>
    %cst_7 = arith.constant dense<0.000000e+00> : vector<128x64xf32>
    %6 = tpu.matmul %3, %5, %cst_7 {dimension_numbers = #tpu.dot_dimension_numbers<[1], [0], [0], [1], [0, 0, 1, 1], [], []>} : vector<128x72xbf16>, vector<72x64xbf16>, vector<128x64xf32> -> vector<128x64xf32>
    %7 = arith.addf %0, %6 : vector<128x64xf32>
    %c0_8 = arith.constant 0 : index
    %c0_9 = arith.constant 0 : index
    %c0_10 = arith.constant 0 : index
    %c1 = arith.constant 1 : index
    %c0_11 = arith.constant 0 : index
    %8 = vector.load %arg2[%c0_8, %c0_9, %c0_10, %c1, %c0_11] : memref<1x1x10x18x72xbf16, #tpu.memory_space<vmem>>, vector<1x1x8x16x72xbf16>
    %9 = vector.shape_cast %8 : vector<1x1x8x16x72xbf16> to vector<8x16x72xbf16>
    %10 = vector.shape_cast %9 : vector<8x16x72xbf16> to vector<128x72xbf16>
    %c1_12 = arith.constant 1 : index
    %c0_13 = arith.constant 0 : index
    %c0_14 = arith.constant 0 : index
    %11 = vector.load %arg3[%c1_12, %c0_13, %c0_14] : memref<9x72x64xbf16, #tpu.memory_space<vmem>>, vector<1x72x64xbf16>
    %12 = vector.shape_cast %11 : vector<1x72x64xbf16> to vector<72x64xbf16>
    %cst_15 = arith.constant dense<0.000000e+00> : vector<128x64xf32>
    %13 = tpu.matmul %10, %12, %cst_15 {dimension_numbers = #tpu.dot_dimension_numbers<[1], [0], [0], [1], [0, 0, 1, 1], [], []>} : vector<128x72xbf16>, vector<72x64xbf16>, vector<128x64xf32> -> vector<128x64xf32>
    %14 = arith.addf %7, %13 : vector<128x64xf32>
    %c0_16 = arith.constant 0 : index
    %c0_17 = arith.constant 0 : index
    %c0_18 = arith.constant 0 : index
    %c2 = arith.constant 2 : index
    %c0_19 = arith.constant 0 : index
    %15 = vector.load %arg2[%c0_16, %c0_17, %c0_18, %c2, %c0_19] : memref<1x1x10x18x72xbf16, #tpu.memory_space<vmem>>, vector<1x1x8x16x72xbf16>
    %16 = vector.shape_cast %15 : vector<1x1x8x16x72xbf16> to vector<8x16x72xbf16>
    %17 = vector.shape_cast %16 : vector<8x16x72xbf16> to vector<128x72xbf16>
    %c2_20 = arith.constant 2 : index
    %c0_21 = arith.constant 0 : index
    %c0_22 = arith.constant 0 : index
    %18 = vector.load %arg3[%c2_20, %c0_21, %c0_22] : memref<9x72x64xbf16, #tpu.memory_space<vmem>>, vector<1x72x64xbf16>
    %19 = vector.shape_cast %18 : vector<1x72x64xbf16> to vector<72x64xbf16>
    %cst_23 = arith.constant dense<0.000000e+00> : vector<128x64xf32>
    %20 = tpu.matmul %17, %19, %cst_23 {dimension_numbers = #tpu.dot_dimension_numbers<[1], [0], [0], [1], [0, 0, 1, 1], [], []>} : vector<128x72xbf16>, vector<72x64xbf16>, vector<128x64xf32> -> vector<128x64xf32>
    %21 = arith.addf %14, %20 : vector<128x64xf32>
    %c0_24 = arith.constant 0 : index
    %c0_25 = arith.constant 0 : index
    %c1_26 = arith.constant 1 : index
    %c0_27 = arith.constant 0 : index
    %c0_28 = arith.constant 0 : index
    %22 = vector.load %arg2[%c0_24, %c0_25, %c1_26, %c0_27, %c0_28] : memref<1x1x10x18x72xbf16, #tpu.memory_space<vmem>>, vector<1x1x8x16x72xbf16>
    %23 = vector.shape_cast %22 : vector<1x1x8x16x72xbf16> to vector<8x16x72xbf16>
    %24 = vector.shape_cast %23 : vector<8x16x72xbf16> to vector<128x72xbf16>
    %c3 = arith.constant 3 : index
    %c0_29 = arith.constant 0 : index
    %c0_30 = arith.constant 0 : index
    %25 = vector.load %arg3[%c3, %c0_29, %c0_30] : memref<9x72x64xbf16, #tpu.memory_space<vmem>>, vector<1x72x64xbf16>
    %26 = vector.shape_cast %25 : vector<1x72x64xbf16> to vector<72x64xbf16>
    %cst_31 = arith.constant dense<0.000000e+00> : vector<128x64xf32>
    %27 = tpu.matmul %24, %26, %cst_31 {dimension_numbers = #tpu.dot_dimension_numbers<[1], [0], [0], [1], [0, 0, 1, 1], [], []>} : vector<128x72xbf16>, vector<72x64xbf16>, vector<128x64xf32> -> vector<128x64xf32>
    %28 = arith.addf %21, %27 : vector<128x64xf32>
    %c0_32 = arith.constant 0 : index
    %c0_33 = arith.constant 0 : index
    %c1_34 = arith.constant 1 : index
    %c1_35 = arith.constant 1 : index
    %c0_36 = arith.constant 0 : index
    %29 = vector.load %arg2[%c0_32, %c0_33, %c1_34, %c1_35, %c0_36] : memref<1x1x10x18x72xbf16, #tpu.memory_space<vmem>>, vector<1x1x8x16x72xbf16>
    %30 = vector.shape_cast %29 : vector<1x1x8x16x72xbf16> to vector<8x16x72xbf16>
    %31 = vector.shape_cast %30 : vector<8x16x72xbf16> to vector<128x72xbf16>
    %c4 = arith.constant 4 : index
    %c0_37 = arith.constant 0 : index
    %c0_38 = arith.constant 0 : index
    %32 = vector.load %arg3[%c4, %c0_37, %c0_38] : memref<9x72x64xbf16, #tpu.memory_space<vmem>>, vector<1x72x64xbf16>
    %33 = vector.shape_cast %32 : vector<1x72x64xbf16> to vector<72x64xbf16>
    %cst_39 = arith.constant dense<0.000000e+00> : vector<128x64xf32>
    %34 = tpu.matmul %31, %33, %cst_39 {dimension_numbers = #tpu.dot_dimension_numbers<[1], [0], [0], [1], [0, 0, 1, 1], [], []>} : vector<128x72xbf16>, vector<72x64xbf16>, vector<128x64xf32> -> vector<128x64xf32>
    %35 = arith.addf %28, %34 : vector<128x64xf32>
    %c0_40 = arith.constant 0 : index
    %c0_41 = arith.constant 0 : index
    %c1_42 = arith.constant 1 : index
    %c2_43 = arith.constant 2 : index
    %c0_44 = arith.constant 0 : index
    %36 = vector.load %arg2[%c0_40, %c0_41, %c1_42, %c2_43, %c0_44] : memref<1x1x10x18x72xbf16, #tpu.memory_space<vmem>>, vector<1x1x8x16x72xbf16>
    %37 = vector.shape_cast %36 : vector<1x1x8x16x72xbf16> to vector<8x16x72xbf16>
    %38 = vector.shape_cast %37 : vector<8x16x72xbf16> to vector<128x72xbf16>
    %c5 = arith.constant 5 : index
    %c0_45 = arith.constant 0 : index
    %c0_46 = arith.constant 0 : index
    %39 = vector.load %arg3[%c5, %c0_45, %c0_46] : memref<9x72x64xbf16, #tpu.memory_space<vmem>>, vector<1x72x64xbf16>
    %40 = vector.shape_cast %39 : vector<1x72x64xbf16> to vector<72x64xbf16>
    %cst_47 = arith.constant dense<0.000000e+00> : vector<128x64xf32>
    %41 = tpu.matmul %38, %40, %cst_47 {dimension_numbers = #tpu.dot_dimension_numbers<[1], [0], [0], [1], [0, 0, 1, 1], [], []>} : vector<128x72xbf16>, vector<72x64xbf16>, vector<128x64xf32> -> vector<128x64xf32>
    %42 = arith.addf %35, %41 : vector<128x64xf32>
    %c0_48 = arith.constant 0 : index
    %c0_49 = arith.constant 0 : index
    %c2_50 = arith.constant 2 : index
    %c0_51 = arith.constant 0 : index
    %c0_52 = arith.constant 0 : index
    %43 = vector.load %arg2[%c0_48, %c0_49, %c2_50, %c0_51, %c0_52] : memref<1x1x10x18x72xbf16, #tpu.memory_space<vmem>>, vector<1x1x8x16x72xbf16>
    %44 = vector.shape_cast %43 : vector<1x1x8x16x72xbf16> to vector<8x16x72xbf16>
    %45 = vector.shape_cast %44 : vector<8x16x72xbf16> to vector<128x72xbf16>
    %c6 = arith.constant 6 : index
    %c0_53 = arith.constant 0 : index
    %c0_54 = arith.constant 0 : index
    %46 = vector.load %arg3[%c6, %c0_53, %c0_54] : memref<9x72x64xbf16, #tpu.memory_space<vmem>>, vector<1x72x64xbf16>
    %47 = vector.shape_cast %46 : vector<1x72x64xbf16> to vector<72x64xbf16>
    %cst_55 = arith.constant dense<0.000000e+00> : vector<128x64xf32>
    %48 = tpu.matmul %45, %47, %cst_55 {dimension_numbers = #tpu.dot_dimension_numbers<[1], [0], [0], [1], [0, 0, 1, 1], [], []>} : vector<128x72xbf16>, vector<72x64xbf16>, vector<128x64xf32> -> vector<128x64xf32>
    %49 = arith.addf %42, %48 : vector<128x64xf32>
    %c0_56 = arith.constant 0 : index
    %c0_57 = arith.constant 0 : index
    %c2_58 = arith.constant 2 : index
    %c1_59 = arith.constant 1 : index
    %c0_60 = arith.constant 0 : index
    %50 = vector.load %arg2[%c0_56, %c0_57, %c2_58, %c1_59, %c0_60] : memref<1x1x10x18x72xbf16, #tpu.memory_space<vmem>>, vector<1x1x8x16x72xbf16>
    %51 = vector.shape_cast %50 : vector<1x1x8x16x72xbf16> to vector<8x16x72xbf16>
    %52 = vector.shape_cast %51 : vector<8x16x72xbf16> to vector<128x72xbf16>
    %c7 = arith.constant 7 : index
    %c0_61 = arith.constant 0 : index
    %c0_62 = arith.constant 0 : index
    %53 = vector.load %arg3[%c7, %c0_61, %c0_62] : memref<9x72x64xbf16, #tpu.memory_space<vmem>>, vector<1x72x64xbf16>
    %54 = vector.shape_cast %53 : vector<1x72x64xbf16> to vector<72x64xbf16>
    %cst_63 = arith.constant dense<0.000000e+00> : vector<128x64xf32>
    %55 = tpu.matmul %52, %54, %cst_63 {dimension_numbers = #tpu.dot_dimension_numbers<[1], [0], [0], [1], [0, 0, 1, 1], [], []>} : vector<128x72xbf16>, vector<72x64xbf16>, vector<128x64xf32> -> vector<128x64xf32>
    %56 = arith.addf %49, %55 : vector<128x64xf32>
    %c0_64 = arith.constant 0 : index
    %c0_65 = arith.constant 0 : index
    %c2_66 = arith.constant 2 : index
    %c2_67 = arith.constant 2 : index
    %c0_68 = arith.constant 0 : index
    %57 = vector.load %arg2[%c0_64, %c0_65, %c2_66, %c2_67, %c0_68] : memref<1x1x10x18x72xbf16, #tpu.memory_space<vmem>>, vector<1x1x8x16x72xbf16>
    %58 = vector.shape_cast %57 : vector<1x1x8x16x72xbf16> to vector<8x16x72xbf16>
    %59 = vector.shape_cast %58 : vector<8x16x72xbf16> to vector<128x72xbf16>
    %c8 = arith.constant 8 : index
    %c0_69 = arith.constant 0 : index
    %c0_70 = arith.constant 0 : index
    %60 = vector.load %arg3[%c8, %c0_69, %c0_70] : memref<9x72x64xbf16, #tpu.memory_space<vmem>>, vector<1x72x64xbf16>
    %61 = vector.shape_cast %60 : vector<1x72x64xbf16> to vector<72x64xbf16>
    %cst_71 = arith.constant dense<0.000000e+00> : vector<128x64xf32>
    %62 = tpu.matmul %59, %61, %cst_71 {dimension_numbers = #tpu.dot_dimension_numbers<[1], [0], [0], [1], [0, 0, 1, 1], [], []>} : vector<128x72xbf16>, vector<72x64xbf16>, vector<128x64xf32> -> vector<128x64xf32>
    %63 = arith.addf %56, %62 : vector<128x64xf32>
    %c0_72 = arith.constant 0 : index
    %c0_73 = arith.constant 0 : index
    %64 = vector.load %arg4[%c0_72, %c0_73] : memref<1x64xf32, #tpu.memory_space<vmem>>, vector<1x64xf32>
    %65 = vector.broadcast %64 : vector<1x64xf32> to vector<128x64xf32>
    %66 = arith.mulf %63, %65 : vector<128x64xf32>
    %c0_74 = arith.constant 0 : index
    %c0_75 = arith.constant 0 : index
    %67 = vector.load %arg5[%c0_74, %c0_75] : memref<1x64xf32, #tpu.memory_space<vmem>>, vector<1x64xf32>
    %68 = vector.broadcast %67 : vector<1x64xf32> to vector<128x64xf32>
    %69 = arith.addf %66, %68 : vector<128x64xf32>
    %c0_76 = arith.constant 0 : index
    %c0_77 = arith.constant 0 : index
    %c0_78 = arith.constant 0 : index
    %70 = vector.load %arg6[%c0_76, %c0_77, %c0_78] : memref<1x128x64xf32, #tpu.memory_space<vmem>>, vector<1x128x64xf32>
    %71 = vector.shape_cast %70 : vector<1x128x64xf32> to vector<128x64xf32>
    %72 = arith.addf %69, %71 : vector<128x64xf32>
    %cst_79 = arith.constant 0.000000e+00 : f32
    %73 = vector.broadcast %cst_79 : f32 to vector<128x64xf32>
    %74 = arith.maximumf %72, %73 : vector<128x64xf32>
    %c0_80 = arith.constant 0 : index
    %c0_81 = arith.constant 0 : index
    %c0_82 = arith.constant 0 : index
    %75 = vector.load %arg7[%c0_80, %c0_81, %c0_82] : memref<1x128x64xf32, #tpu.memory_space<vmem>>, vector<1x128x64xf32>
    %76 = vector.shape_cast %75 : vector<1x128x64xf32> to vector<128x64xf32>
    %77 = vector.shape_cast %74 : vector<128x64xf32> to vector<1x128x64xf32>
    tpu.vector_store %arg7[%c0_80, %c0_81, %c0_82], %77 {strides = array<i32>} : memref<1x128x64xf32, #tpu.memory_space<vmem>>, vector<1x128x64xf32>,
    return
  }
  func.func @transform_0(%arg0: i32, %arg1: i32) -> (i32, i32, i32, i32, i32) {
    %c0_i32 = arith.constant 0 : i32
    %c0_i32_0 = arith.constant 0 : i32
    %c0_i32_1 = arith.constant 0 : i32
    %c0_i32_2 = arith.constant 0 : i32
    return %arg0, %arg1, %c0_i32, %c0_i32_0, %c0_i32_1 : i32, i32, i32, i32, i32
  }
  func.func @transform_1(%arg0: i32, %arg1: i32) -> (i32, i32, i32) {
    %c0_i32 = arith.constant 0 : i32
    %c0_i32_0 = arith.constant 0 : i32
    %c0_i32_1 = arith.constant 0 : i32
    %c0_i32_2 = arith.constant 0 : i32
    return %c0_i32, %c0_i32_0, %c0_i32_1 : i32, i32, i32
  }
  func.func @transform_2(%arg0: i32, %arg1: i32) -> (i32, i32) {
    %c0_i32 = arith.constant 0 : i32
    %c0_i32_0 = arith.constant 0 : i32
    %c0_i32_1 = arith.constant 0 : i32
    return %c0_i32, %c0_i32_0 : i32, i32
  }
  func.func @transform_3(%arg0: i32, %arg1: i32) -> (i32, i32) {
    %c0_i32 = arith.constant 0 : i32
    %c0_i32_0 = arith.constant 0 : i32
    %c0_i32_1 = arith.constant 0 : i32
    return %c0_i32, %c0_i32_0 : i32, i32
  }
  func.func @transform_4(%arg0: i32, %arg1: i32) -> (i32, i32, i32) {
    %c0_i32 = arith.constant 0 : i32
    %c0_i32_0 = arith.constant 0 : i32
    return %arg0, %arg1, %c0_i32 : i32, i32, i32
  }
  func.func @transform_5(%arg0: i32, %arg1: i32) -> (i32, i32, i32) {
    %c0_i32 = arith.constant 0 : i32
    %c0_i32_0 = arith.constant 0 : i32
    return %arg0, %arg1, %c0_i32 : i32, i32, i32
  }
}

</mosaic_0001>

<bundles_post_ra>
// kernel: tile.18
= control target key start
LH: loop header
LB: loop body
LE: loop exit
PB: predicated region body
PF: predicated region fallthrough
CT: control target
= control target key end

     0   :  { %s28_s0 = inlined_call_operand.vmem [shape: f32[4], index: 0, kind: input, shape index: {}]   ;;  %s29_s1 = inlined_call_operand.vmem [shape: f32[16,4], index: 1, kind: output, shape index: {}]  }
   0x1   :  { %v4_v0 = vld [vmem:[%s28_s0] ss:$0 sm:$0xff] }
   0x2   :  { %5 = vst [vmem:[%s29_s1] sm:$0xff] %v4_v0  ;;  %8 = vst [vmem:[%s29_s1 + $0x8] sm:$0xff] %v4_v0 }

// kernel: tile.19
= control target key start
LH: loop header
LB: loop body
LE: loop exit
PB: predicated region body
PF: predicated region fallthrough
CT: control target
= control target key end

     0   :  { %s133_s10 = smov 60   ;;  %s134_s11 = smov 52   ;;  %vm3_vm0 = vcmask 31744   ;;  %vm9_vm1 = vcmask 523744   ;;  %vm15_vm2 = vcmask 490944   ;;  %vm21_vm3 = vcmask 458144   ;;  %s209_s0 = inlined_call_operand.vmem [shape: f32[16,4], index: 0, kind: input, shape index: {}]   ;;  %s210_s1 = inlined_call_operand.vmem [shape: f32[1,64], index: 1, kind: output, shape index: {}]  }
   0x1   :  { %v103_v0 = vld [vmem:[%s209_s0 + $0xf] sm:$0x1]   ;;  %v105_v1 = vld [vmem:[%s209_s0 + $0xd] sm:$0x1]   ;;  %v104_v2 = vld [vmem:[%s209_s0 + $0xe] sm:$0x1]  }
   0x2   :  { %7 = vrot.lane.b32.xlu0 %v103_v0, %s133_s10  ;;  %19 = vrot.lane.b32.xlu1 %v105_v1, %s134_s11  ;;  %v106_v3 = vld [vmem:[%s209_s0 + $0xc] sm:$0x1]   ;;  %s135_s16 = smov 56   ;;  %s136_s17 = smov 48   ;;  %v107_v4 = vld [vmem:[%s209_s0 + $0xb] sm:$0x1]  }
   0x3   :  { %v108_v5 = vld [vmem:[%s209_s0 + $0xa] sm:$0x1]   ;;  %v2_v6 = vld [vmem:[%s209_s0] sm:$0x1]   ;;  %s137_s24 = smov 44   ;;  %s138_s25 = smov 40  }
   0x4   :  { %4 = vst.msk [vmem:[#allocation0] sm:$0x1] %vm3_vm0, %v2_v6   ;;  %v109_v7 = vld [vmem:[%s209_s0 + $0x9] sm:$0x1]   ;;  %v110_v8 = vld [vmem:[%s209_s0 + $0x8] sm:$0x1]  }
   0x5   :  { %s139_s30 = smov 36   ;;  %s140_s2 = smov 32   ;;  %v111_v9 = vld [vmem:[%s209_s0 + $0x7] sm:$0x1]   ;;  %v112_v10 = vld [vmem:[%s209_s0 + $0x6] sm:$0x1]  }
   0x6   :  { %13 = vrot.lane.b32.xlu0 %v104_v2, %s135_s16  ;;  %25 = vrot.lane.b32.xlu1 %v106_v3, %s136_s17  ;;  %s141_s7 = smov 28   ;;  %s142_s8 = smov 24   ;;  %v113_v11 = vld [vmem:[%s209_s0 + $0x5] sm:$0x1]   ;;  %v114_v12 = vld [vmem:[%s209_s0 + $0x4] sm:$0x1]  }
   0x7   :  { %s143_s13 = smov 20   ;;  %s144_s14 = smov 16   ;;  %v115_v13 = vld [vmem:[%s209_s0 + $0x3] sm:$0x1]   ;;  %v116_v14 = vld [vmem:[%s209_s0 + $0x2] sm:$0x1]  }
   0x8   :  { %s145_s19 = smov 12   ;;  %s146_s20 = smov 8   ;;  %v117_v15 = vld [vmem:[%s209_s0 + $0x1] sm:$0x1]   ;;  %vm27_vm4 = vcmask 425344   ;;  %vm33_vm5 = vcmask 392544  }
   0x9   :  { %s147_s0 = smov 4   ;;  %vm39_vm6 = vcmask 359744   ;;  %vm45_vm7 = vcmask 326944   ;;  %vm51_vm8 = vcmask 294144   ;;  %vm57_vm9 = vcmask 261344  }
   0xa   :  { %31 = vrot.lane.b32.xlu0 %v107_v4, %s137_s24  ;;  %37 = vrot.lane.b32.xlu1 %v108_v5, %s138_s25  ;;  %vm63_vm10 = vcmask 228544   ;;  %vm69_vm11 = vcmask 195744   ;;  %vm75_vm12 = vcmask 162944   ;;  %vm81_vm13 = vcmask 130144  }
   0xb   :  { %vm87_vm14 = vcmask 97344   ;;  %vm93_vm15 = vcmask 64544  }
   0xe   :  { %43 = vrot.lane.b32.xlu0 %v109_v7, %s139_s30  ;;  %49 = vrot.lane.b32.xlu1 %v110_v8, %s140_s2 }
  0x12   :  { %55 = vrot.lane.b32.xlu0 %v111_v9, %s141_s7  ;;  %61 = vrot.lane.b32.xlu1 %v112_v10, %s142_s8 }
  0x16   :  { %67 = vrot.lane.b32.xlu0 %v113_v11, %s143_s13  ;;  %73 = vrot.lane.b32.xlu1 %v114_v12, %s144_s14 }
  0x1a   :  { %79 = vrot.lane.b32.xlu0 %v115_v13, %s145_s19  ;;  %85 = vrot.lane.b32.xlu1 %v116_v14, %s146_s20 }
  0x1e   :  { %91 = vrot.lane.b32.xlu0 %v117_v15, %s147_s0 }
  0x74   :  { %v8_v16 = vpop.permute.xlu0 %7   ;;  %v20_v17 = vpop.permute.xlu1 %19  }
  0x75   :  { %10 = vst.msk [vmem:[#allocation0] sm:$0x1] %vm9_vm1, %v8_v16  }
  0x78   :  { %v14_v18 = vpop.permute.xlu0 %13   ;;  %v26_v19 = vpop.permute.xlu1 %25  }
  0x79   :  { %16 = vst.msk [vmem:[#allocation0] sm:$0x1] %vm15_vm2, %v14_v18  }
  0x7a   :  { %22 = vst.msk [vmem:[#allocation0] sm:$0x1] %vm21_vm3, %v20_v17  }
  0x7b   :  { %28 = vst.msk [vmem:[#allocation0] sm:$0x1] %vm27_vm4, %v26_v19  }
  0x7c   :  { %v32_v20 = vpop.permute.xlu0 %31   ;;  %v38_v21 = vpop.permute.xlu1 %37  }
  0x7d   :  { %34 = vst.msk [vmem:[#allocation0] sm:$0x1] %vm33_vm5, %v32_v20  }
  0x7e   :  { %40 = vst.msk [vmem:[#allocation0] sm:$0x1] %vm39_vm6, %v38_v21  }
  0x80   :  { %v44_v22 = vpop.permute.xlu0 %43   ;;  %v50_v23 = vpop.permute.xlu1 %49  }
  0x81   :  { %46 = vst.msk [vmem:[#allocation0] sm:$0x1] %vm45_vm7, %v44_v22  }
  0x82   :  { %52 = vst.msk [vmem:[#allocation0] sm:$0x1] %vm51_vm8, %v50_v23  }
  0x84   :  { %v56_v24 = vpop.permute.xlu0 %55   ;;  %v62_v25 = vpop.permute.xlu1 %61  }
  0x85   :  { %58 = vst.msk [vmem:[#allocation0] sm:$0x1] %vm57_vm9, %v56_v24  }
  0x86   :  { %64 = vst.msk [vmem:[#allocation0] sm:$0x1] %vm63_vm10, %v62_v25  }
  0x88   :  { %v68_v26 = vpop.permute.xlu0 %67   ;;  %v74_v27 = vpop.permute.xlu1 %73  }
  0x89   :  { %70 = vst.msk [vmem:[#allocation0] sm:$0x1] %vm69_vm11, %v68_v26  }
  0x8a   :  { %76 = vst.msk [vmem:[#allocation0] sm:$0x1] %vm75_vm12, %v74_v27  }
  0x8c   :  { %v80_v28 = vpop.permute.xlu0 %79   ;;  %v86_v29 = vpop.permute.xlu1 %85  }
  0x8d   :  { %82 = vst.msk [vmem:[#allocation0] sm:$0x1] %vm81_vm13, %v80_v28  }
  0x8e   :  { %88 = vst.msk [vmem:[#allocation0] sm:$0x1] %vm87_vm14, %v86_v29  }
  0x90   :  { %v92_v30 = vpop.permute.xlu0 %91  }
  0x91   :  { %94 = vst.msk [vmem:[#allocation0] sm:$0x1] %vm93_vm15, %v92_v30  }
  0x98   :  { %v99_v31 = vld [vmem:[#allocation0] sm:$0x1] }
  0x99   :  { %102 = vst [vmem:[%s210_s1] sm:$0x1] %v99_v31 }

// kernel: _forward.2
= control target key start
LH: loop header
LB: loop body
LE: loop exit
PB: predicated region body
PF: predicated region fallthrough
CT: control target
= control target key end

     0   :  { %s4215_s15 = smov 0   ;;  %s4217_s16 = smov 0   ;;  %s5339_s0 = inlined_call_operand.vmem [shape: bf16[2,2,10,18,72], index: 0, kind: input, shape index: {}]   ;;  %s5340_s1 = inlined_call_operand.vmem [shape: bf16[9,72,64], index: 1, kind: input, shape index: {}]   ;;  %s5341_s2 = inlined_call_operand.vmem [shape: f32[1,64], index: 2, kind: input, shape index: {}]   ;;  %s5342_s3 = inlined_call_operand.vmem [shape: f32[1,64], index: 3, kind: input, shape index: {}]   ;;  %s5343_s4 = inlined_call_operand.vmem [shape: bf16[2,256,64], index: 4, kind: output, shape index: {}]  }
   0x1   :  { %s4219_s17 = smov 0   ;;  %s4221_s18 = smov 0  }
   0x2   :  { %s4223_s19 = smov 0  }
   0x3 LB: > { %s23_s20 = sadd.s32 1, %s4180_s17  ;;  %s26_s21 = sadd.s32 1, %s4184_s18  ;;  %s4188_s19 = sphi %s4223_s19, %s14_s19   ;;  %s4184_s18 = sphi %s4221_s18, %s5380_s18   ;;  %s4180_s17 = sphi %s4219_s17, %s5379_s17   ;;  %s4176_s16 = sphi %s4217_s16, %s5378_s16   ;;  %s4172_s15 = sphi %s4215_s15, %s5377_s15  }
   0x4   : > { %p24_p0 = scmp.ge.s32.totalorder %s23_s20, 2  ;;  %p3246_p1 = scmp.ge.s32.totalorder %s4188_s19, 1 }
   0x5   : > { %p182_p2 = scmp.lt.s32.totalorder %s4188_s19, 5 }
   0x6   : > { %s5382_s20 = smov (%p24_p0, %s23_s20), 0  ;;  %s5384_s21 = smov (!%p24_p0, %s26_s21), %s4184_s18 }
   0x7   : > { %p183_p3 = pnand %p3246_p1, %p182_p2  ;;  %p28_p4 = scmp.ge.s32.totalorder %s5384_s21, 2 }
   0x9   : > { %s5386_s21 = smov (%p28_p4, %s5384_s21), 0  ;;  %186 = sbr.rel (%p183_p3) target bundleno = 395 (0x18b), region = 36 }
   0xe   : > { %v4081_v0 = vld [vmem:[%s5340_s1 + $0x44] ss:$0 sps:$4 sm:$0xff]   ;;  %vm550_vm0 = vcmask 1043456   ;;  %v4083_v1 = vld [vmem:[%s5340_s1 + $0x3c] sm:$0xff]   ;;  %v4085_v6 = vld [vmem:[%s5340_s1 + $0x34] sm:$0xff]   ;;  %p216_p5 = scmp.lt.s32.totalorder %s4176_s16, 1 }
   0xf   : > { %v4082_v2 = vld [vmem:[%s5340_s1 + $0x20] ss:$0 sps:$4 sm:$0xff]   ;;  %4029 = vmatprep.subr.msk.bf16.mxu0 %vm550_vm0, %v4081_v0  ;;  %v552_v3 = vsel %vm550_vm0, %v4081_v0, 0  ;;  %v4084_v4 = vld [vmem:[%s5340_s1 + $0x18] sm:$0xff]   ;;  %v4086_v7 = vld [vmem:[%s5340_s1 + $0x10] sm:$0xff]   ;;  %p218_p6 = scmp.lt.s32.totalorder %s4172_s15, 1 }
  0x10   : > { %4030 = vmatprep.subr.msk.bf16.mxu1 %vm550_vm0, %v4082_v2  ;;  %3786 = vmatpush3.bf16.msra.mxu0 %v552_v3  ;;  %v743_v5 = vsel %vm550_vm0, %v4082_v2, 0  ;;  %s5388_s16 = smov (!%p216_p5, %s4176_s16), 1  ;;  %v4087_v8 = vld [vmem:[%s5340_s1 + $0x2c] sm:$0xff]   ;;  %v4089_v10 = vld [vmem:[%s5340_s1 + $0x24] sm:$0xff]   ;;  %vm269_vm1 = vsmask.f32 3328 }
  0x11   : > { %3812 = vmatpush3.bf16.msra.mxu1 %v743_v5  ;;  %3787 = vmatprep.subr.bf16.mxu0 %v4083_v1  ;;  %s219_s10 = scalar_select %p218_p6, %s4172_s15, 1  ;;  %v4088_v9 = vld [vmem:[%s5340_s1 + $0x8] sm:$0xff]   ;;  %v4090_v12 = vld [vmem:[%s5340_s1] sm:$0xff]   ;;  %vm270_vm2 = vsmask.f32 7440  ;;  %vm525_vm3 = vcmask 588800  }
  0x12   : > { %3813 = vmatprep.subr.bf16.mxu1 %v4084_v4  ;;  %s4040_s13 = smul.u32 60, %s5388_s16  ;;  %v4093_v11 = vld [vmem:[%s5340_s1 + $0x68] ss:$0 sps:$4 sm:$0xff]   ;;  %v4094_v13 = vld [vmem:[%s5340_s1 + $0x8c] ss:$0 sps:$4 sm:$0xff]   ;;  %vm4334_vm4 = vmor %vm269_vm1, %vm270_vm2  ;;  %vm866_vm5 = vcmask 1042432  }
  0x13   : > { %s4039_s23 = smul.u32 30, %s219_s10  ;;  %v4297_v14 = vsel %vm550_vm0, %v4093_v11, 0  ;;  %v4300_v15 = vsel %vm550_vm0, %v4094_v13, 0  ;;  %v4097_v47 = vld [vmem:[%s5340_s1 + $0x84] sm:$0xff]   ;;  %vm867_vm6 = vcmask 1046532   ;;  %s3249_s29 = sshll.u32 %s5388_s16, 5 }
  0x14   : > { %3788 = vmatpush3.bf16.msra.mxu0 %v4083_v1  ;;  %vm4500_vm7 = vmor %vm866_vm5, %vm867_vm6  ;;  %vm3132_vm8 = vcmask 519168  }
  0x15   : > { %3814 = vmatpush3.bf16.msra.mxu1 %v4084_v4  ;;  %3789 = vmatprep.subr.bf16.mxu0 %v4085_v6  ;;  %s222_s30 = sadd.s32 %s4040_s13, %s4039_s23 }
  0x16   : > { %3815 = vmatprep.subr.bf16.mxu1 %v4086_v7  ;;  %s3247_s5 = sshll.u32 %s222_s30, 2 }
  0x17   : > { %s4305_s8 = scalar_lea.vmem %s5339_s0, %s3247_s5 }
  0x18   : > { %3790 = vmatpush3.bf16.msra.mxu0 %v4085_v6  ;;  %v236_v16 = vld [vmem:[%s4305_s8] sm:$0xf]  ;;  %v4309_v17 = vld [vmem:[%s4305_s8 + $0x4] sm:$0xf]  ;;  %v4312_v18 = vld [vmem:[%s4305_s8 + $0x8] sm:$0x1] }
  0x19   : > { %3816 = vmatpush3.bf16.msra.mxu1 %v4086_v7  ;;  %3791 = vmatprep.subr.bf16.mxu0 %v4087_v8  ;;  %v273_v19 = vshrl.u32 %v236_v16, 16  ;;  %v276_v20 = vshll.u32 %v236_v16, 16  ;;  %v282_v21 = vshll.u32 %v4309_v17, 16  ;;  %v286_v22 = vshrl.u32 %v4309_v17, 16  ;;  %v238_v23 = vld [vmem:[%s4305_s8 + $0xc] sm:$0xf] }
  0x1a   : > { %3817 = vmatprep.subr.bf16.mxu1 %v4088_v9  ;;  %v292_v24 = vshll.u32 %v4312_v18, 16  ;;  %v874_v25 = vrot.slane %v4312_v18, 5  ;;  %v3281_v26 = vcombine.low %v236_v16, %v4309_v17  ;;  %v4321_v27 = vld [vmem:[%s4305_s8 + $0x10] sm:$0xf]  ;;  %v4324_v28 = vld [vmem:[%s4305_s8 + $0x14] sm:$0x1] }
  0x1b   : > { %v275_v29 = vrot.slane %v273_v19, 4  ;;  %v278_v30 = vrot.slane %v276_v20, 5  ;;  %v284_v31 = vrot.slane %v282_v21, 5  ;;  %v288_v32 = vrot.slane %v286_v22, 4  ;;  %v240_v41 = vld [vmem:[%s4305_s8 + $0x18] sm:$0xf] }
  0x1c   : > { %3792 = vmatpush3.bf16.msra.mxu0 %v4087_v8  ;;  %v294_v33 = vrot.slane %v292_v24, 5  ;;  %3821 = vmatprep.mubr.msk.bf16.mxu1 %vm525_vm3, %v3281_v26  ;;  %v297_v34 = vshrl.u32 %v238_v23, 16  ;;  %v300_v35 = vshll.u32 %v238_v23, 16  ;;  %v306_v36 = vshll.u32 %v4321_v27, 16  ;;  %v4344_v52 = vld [vmem:[%s4305_s8 + $0x1c] sm:$0xf] }
  0x1d   : > { %3818 = vmatpush3.bf16.msra.mxu1 %v4088_v9  ;;  %3793 = vmatprep.subr.bf16.mxu0 %v4089_v10  ;;  %v279_v37 = vor.u32 %v278_v30, %v275_v29  ;;  %v289_v38 = vor.u32 %v288_v32, %v284_v31  ;;  %v310_v39 = vshrl.u32 %v4321_v27, 16  ;;  %v316_v40 = vshll.u32 %v4324_v28, 16  ;;  %v4349_v56 = vld [vmem:[%s4305_s8 + $0x20] sm:$0x1]  ;;  %v242_v62 = vld [vmem:[%s4305_s8 + $0x24] sm:$0xf] }
  0x1e   : > { %3819 = vmatprep.subr.bf16.mxu1 %v4090_v12  ;;  %v299_v43 = vrot.slane %v297_v34, 4  ;;  %v302_v44 = vrot.slane %v300_v35, 5  ;;  %v308_v45 = vrot.slane %v306_v36, 5  ;;  %v878_v46 = vrot.slane %v4321_v27, 5  ;;  %v4359_v3 = vld [vmem:[%s4305_s8 + $0x28] sm:$0xf] }
  0x1f   : > { %v280_v48 = vrot.slane %v279_v37, 4  ;;  %v290_v49 = vrot.slane %v289_v38, 4  ;;  %v312_v50 = vrot.slane %v310_v39, 4  ;;  %v318_v51 = vrot.slane %v316_v40, 5  ;;  %v4365_v8 = vld [vmem:[%s4305_s8 + $0x2c] sm:$0x1] }
  0x20   : > { %3794 = vmatpush3.bf16.msra.mxu0 %v4089_v10  ;;  %v303_v53 = vor.u32 %v302_v44, %v299_v43  ;;  %v881_v54 = vrot.slane %v4324_v28, 5  ;;  %v3282_v55 = vcombine.low %v238_v23, %v4321_v27  ;;  %v321_v57 = vshrl.u32 %v240_v41, 16  ;;  %v4380_v22 = vld [vmem:[%s4305_s8 + $0x34] sm:$0xf]  ;;  %v4096_v24 = vld [vmem:[%s5340_s1 + $0x60] sm:$0xff]   ;;  %v4115_v28 = vld [vmem:[%s5340_s1 + $0xcc] sm:$0xff]  }
  0x21   : > { %3820 = vmatpush3.bf16.msra.mxu1 %v4090_v12  ;;  %4031 = vmatprep.subr.msk.bf16.mxu0 %vm550_vm0, %v4093_v11  ;;  %v285_v58 = vsel %vm4334_vm4, %v280_v48, %v284_v31  ;;  %v295_v59 = vsel %vm4334_vm4, %v290_v49, %v294_v33  ;;  %v313_v60 = vor.u32 %v312_v50, %v308_v45  ;;  %v324_v61 = vshll.u32 %v240_v41, 16  ;;  %v4392_v38 = vld [vmem:[%s4305_s8 + $0x38] sm:$0x1] }
  0x22   : > { %4032 = vmatprep.subr.msk.bf16.mxu1 %vm550_vm0, %v4094_v13  ;;  %v3260_v63 = vcombine.low %v285_v58, %v295_v59  ;;  %v304_v0 = vrot.slane %v303_v53, 4  ;;  %v323_v1 = vrot.slane %v321_v57, 4  ;;  %v330_v2 = vshll.u32 %v4344_v52, 16  ;;  %v4100_v13 = vld [vmem:[%s5340_s1 + $0x7c] sm:$0xff]   ;;  %v4104_v40 = vld [vmem:[%s5340_s1 + $0x74] sm:$0xff]  }
  0x23   : > { %v314_v4 = vrot.slane %v313_v60, 4  ;;  %v326_v5 = vrot.slane %v324_v61, 5  ;;  %v334_v6 = vshrl.u32 %v4344_v52, 16  ;;  %v340_v7 = vshll.u32 %v4349_v56, 16  ;;  %v4099_v48 = vld [vmem:[%s5340_s1 + $0x58] sm:$0xff]  }
  0x24   : > { %3822 = vmatmul.mubr.msk.bf16.vlgmr.msra.gmra.mxu1 %vm525_vm3, %v3282_v55  ;;  %3795 = vmatprep.mubr.msk.bf16.mxu0 %vm525_vm3, %v3260_v63  ;;  %v309_v9 = vsel %vm4334_vm4, %v304_v0, %v308_v45  ;;  %v332_v10 = vrot.slane %v330_v2, 5  ;;  %v3283_v11 = vcombine.low %v240_v41, %v4344_v52  ;;  %v345_v12 = vshrl.u32 %v242_v62, 16  ;;  %v246_v58 = vld [vmem:[%s4305_s8 + $0x3c] sm:$0xf]  ;;  %v4413_v59 = vld [vmem:[%s4305_s8 + $0x40] sm:$0xf] }
  0x25   : > { %3864 = vmatpush3.bf16.msra.mxu1 %v4300_v15  ;;  %v4375_v15 = vld [vmem:[%s4305_s8 + $0x30] sm:$0xf]  ;;  %v319_v16 = vsel %vm4334_vm4, %v314_v4, %v318_v51  ;;  %v327_v19 = vor.u32 %v326_v5, %v323_v1  ;;  %v336_v20 = vrot.slane %v334_v6, 4  ;;  %v342_v21 = vrot.slane %v340_v7, 5  ;;  %v4416_v0 = vld [vmem:[%s4305_s8 + $0x44] sm:$0x1] }
  0x26   : > { %3865 = vmatprep.subr.bf16.mxu1 %v4097_v47  ;;  %v3261_v23 = vcombine.low %v309_v9, %v319_v16  ;;  %3825 = vmatprep.mubr.msk.bf16.mxu1 %vm525_vm3, %v3283_v11  ;;  %v347_v26 = vrot.slane %v345_v12, 4  ;;  %v348_v29 = vshll.u32 %v242_v62, 16  ;;  %v354_v30 = vshll.u32 %v4359_v3, 16  ;;  %v4108_v1 = vld [vmem:[%s5340_s1 + $0x6c] sm:$0xff]   ;;  %v4427_v9 = vld [vmem:[%s4305_s8 + $0x48] sm:$0xf] }
  0x27   : > { %v328_v31 = vrot.slane %v327_v19, 4  ;;  %v337_v32 = vor.u32 %v336_v20, %v332_v10  ;;  %v358_v33 = vshrl.u32 %v4359_v3, 16  ;;  %v364_v34 = vshll.u32 %v4365_v8, 16  ;;  %v4103_v7 = vld [vmem:[%s5340_s1 + $0x50] sm:$0xff]  }
  0x28   : > { %3796 = vmatmul.mubr.msk.bf16.vlgmr.msra.gmra.mxu0 %vm525_vm3, %v3261_v23  ;;  %v350_v35 = vrot.slane %v348_v29, 5  ;;  %v356_v36 = vrot.slane %v354_v30, 5  ;;  %v3284_v37 = vcombine.low %v242_v62, %v4359_v3  ;;  %v369_v39 = vshrl.u32 %v4375_v15, 16  ;;  %v4441_v30 = vld [vmem:[%s4305_s8 + $0x50] sm:$0x1] }
  0x29   : > { %3866 = vmatpush3.bf16.msra.mxu1 %v4097_v47  ;;  %3838 = vmatpush3.bf16.msra.mxu0 %v4297_v14  ;;  %v333_v41 = vsel %vm4334_vm4, %v328_v31, %v332_v10  ;;  %v338_v43 = vrot.slane %v337_v32, 4  ;;  %v360_v44 = vrot.slane %v358_v33, 4  ;;  %v366_v45 = vrot.slane %v364_v34, 5 }
  0x2a   : > { %3867 = vmatprep.subr.bf16.mxu1 %v4100_v13  ;;  %3839 = vmatprep.subr.bf16.mxu0 %v4096_v24  ;;  %v351_v47 = vor.u32 %v350_v35, %v347_v26  ;;  %v371_v49 = vrot.slane %v369_v39, 4  ;;  %v372_v14 = vshll.u32 %v4375_v15, 16  ;;  %v378_v50 = vshll.u32 %v4380_v22, 16 }
  0x2b   : > { %v343_v51 = vsel %vm4334_vm4, %v338_v43, %v342_v21  ;;  %v361_v53 = vor.u32 %v360_v44, %v356_v36  ;;  %v382_v55 = vshrl.u32 %v4380_v22, 16  ;;  %v388_v57 = vshll.u32 %v4392_v38, 16  ;;  %v4438_v21 = vld [vmem:[%s4305_s8 + $0x4c] sm:$0xf] }
  0x2c   : > { %3826 = vmatmul.mubr.msk.bf16.gmra.mxu1 %vm525_vm3, %v3284_v37  ;;  %v3262_v60 = vcombine.low %v333_v41, %v343_v51  ;;  %v352_v61 = vrot.slane %v351_v47, 4  ;;  %v374_v62 = vrot.slane %v372_v14, 5  ;;  %v380_v63 = vrot.slane %v378_v50, 5  ;;  %v4107_v41 = vld [vmem:[%s5340_s1 + $0x48] sm:$0xff]  }
  0x2d   : > { %3868 = vmatpush3.bf16.msra.mxu1 %v4100_v13  ;;  %v362_v2 = vrot.slane %v361_v53, 4  ;;  %3840 = vmatpush3.bf16.msra.mxu0 %v4096_v24  ;;  %v384_v4 = vrot.slane %v382_v55, 4  ;;  %v390_v5 = vrot.slane %v388_v57, 5  ;;  %v3285_v6 = vcombine.low %v4375_v15, %v4380_v22  ;;  %v4462_v53 = vld [vmem:[%s4305_s8 + $0x5c] sm:$0x1] }
  0x2e   : > { %3869 = vmatprep.subr.bf16.mxu1 %v4104_v40  ;;  %3799 = vmatprep.mubr.msk.bf16.mxu0 %vm525_vm3, %v3262_v60  ;;  %v357_v10 = vsel %vm4334_vm4, %v352_v61, %v356_v36  ;;  %v375_v11 = vor.u32 %v374_v62, %v371_v49  ;;  %v393_v12 = vshrl.u32 %v246_v58, 16  ;;  %v396_v13 = vshll.u32 %v246_v58, 16 }
  0x2f   : > { %3841 = vmatprep.subr.bf16.mxu0 %v4099_v48  ;;  %v367_v16 = vsel %vm4334_vm4, %v362_v2, %v366_v45  ;;  %v385_v15 = vor.u32 %v384_v4, %v380_v63  ;;  %3829 = vmatprep.mubr.msk.bf16.mxu1 %vm525_vm3, %v3285_v6  ;;  %v402_v19 = vshll.u32 %v4413_v59, 16  ;;  %v406_v20 = vshrl.u32 %v4413_v59, 16  ;;  %v4474_v2 = vld [vmem:[%s5340_s1 + $0xb0] ss:$0 sps:$4 sm:$0xff]   ;;  %v4112_v4 = vld [vmem:[%s5340_s1 + $0xd4] ss:$0 sps:$4 sm:$0xff]  }
  0x30   : > { %v3263_v23 = vcombine.low %v357_v10, %v367_v16  ;;  %v376_v24 = vrot.slane %v375_v11, 4  ;;  %v395_v26 = vrot.slane %v393_v12, 4  ;;  %v398_v29 = vrot.slane %v396_v13, 5  ;;  %v842_v11 = vld [vmem:[%s4305_s8] sm:$0xe] }
  0x31   : > { %3870 = vmatpush3.bf16.msra.mxu1 %v4104_v40  ;;  %3842 = vmatpush3.bf16.msra.mxu0 %v4099_v48  ;;  %v386_v31 = vrot.slane %v385_v15, 4  ;;  %v404_v32 = vrot.slane %v402_v19, 5  ;;  %v408_v33 = vrot.slane %v406_v20, 4  ;;  %v412_v34 = vshll.u32 %v4416_v0, 16  ;;  %v250_v40 = vld [vmem:[%s4305_s8 + $0x54] sm:$0xf] }
  0x32   : > { %3871 = vmatprep.subr.bf16.mxu1 %v4108_v1  ;;  %3800 = vmatmul.mubr.msk.bf16.gmra.mxu0 %vm525_vm3, %v3263_v23  ;;  %v381_v35 = vsel %vm4334_vm4, %v376_v24, %v380_v63  ;;  %v399_v36 = vor.u32 %v398_v29, %v395_v26  ;;  %v3286_v37 = vcombine.low %v246_v58, %v4413_v59  ;;  %v417_v39 = vshrl.u32 %v4427_v9, 16  ;;  %v4457_v48 = vld [vmem:[%s4305_s8 + $0x58] sm:$0xf]  ;;  %v843_v15 = vld [vmem:[%s4305_s8 + $0xc] sm:$0xe] }
  0x33   : > { %3843 = vmatprep.subr.bf16.mxu0 %v4103_v7  ;;  %v391_v43 = vsel %vm4334_vm4, %v386_v31, %v390_v5  ;;  %v409_v44 = vor.u32 %v408_v33, %v404_v32  ;;  %v414_v45 = vrot.slane %v412_v34, 5  ;;  %v420_v47 = vshll.u32 %v4427_v9, 16  ;;  %v4109_v26 = vld [vmem:[%s4305_s8 + $0xc] sm:$0xff]  }
  0x34   : > { %v3264_v49 = vcombine.low %v381_v35, %v391_v43  ;;  %v400_v14 = vrot.slane %v399_v36, 4  ;;  %3830 = vmatmul.mubr.msk.bf16.gmra.mxu1 %vm525_vm3, %v3286_v37  ;;  %v419_v50 = vrot.slane %v417_v39, 4  ;;  %v426_v51 = vshll.u32 %v4438_v21, 16 }
  0x35   : > { %3872 = vmatpush3.bf16.msra.mxu1 %v4108_v1  ;;  %v410_v55 = vrot.slane %v409_v44, 4  ;;  %3844 = vmatpush3.bf16.msra.mxu0 %v4103_v7  ;;  %v422_v57 = vrot.slane %v420_v47, 5  ;;  %v430_v58 = vshrl.u32 %v4438_v21, 16  ;;  %v436_v60 = vshll.u32 %v4441_v30, 16 }
  0x36   : > { %3803 = vmatprep.mubr.msk.bf16.mxu0 %vm525_vm3, %v3264_v49  ;;  %v405_v61 = vsel %vm4334_vm4, %v400_v14, %v404_v32  ;;  %v428_v62 = vrot.slane %v426_v51, 5  ;;  %v3287_v63 = vcombine.low %v4427_v9, %v4438_v21  ;;  %v441_v1 = vshrl.u32 %v250_v40, 16  ;;  %3845 = vmatprep.subr.bf16.mxu0 %v4107_v41  ;;  %v845_v14 = vld [vmem:[%s4305_s8 + $0x24] sm:$0xe] }
  0x37   : > { %v415_v5 = vsel %vm4334_vm4, %v410_v55, %v414_v45  ;;  %v423_v6 = vor.u32 %v422_v57, %v419_v50  ;;  %v432_v7 = vrot.slane %v430_v58, 4  ;;  %v438_v10 = vrot.slane %v436_v60, 5  ;;  %4034 = vmatprep.subr.msk.bf16.mxu1 %vm550_vm0, %v4112_v4  ;;  %v4110_v60 = vld [vmem:[%s4305_s8 + $0x18] sm:$0xff]  }
  0x38   : > { %v3265_v9 = vcombine.low %v405_v61, %v415_v5  ;;  %3833 = vmatprep.mubr.msk.bf16.mxu1 %vm525_vm3, %v3287_v63  ;;  %v443_v12 = vrot.slane %v441_v1, 4  ;;  %v444_v13 = vshll.u32 %v250_v40, 16  ;;  %v450_v16 = vshll.u32 %v4457_v48, 16  ;;  %v4113_v63 = vld [vmem:[%s4305_s8 + $0x24] sm:$0xff]   ;;  %v846_v1 = vld [vmem:[%s4305_s8 + $0x30] sm:$0xe] }
  0x39   : > { %v424_v19 = vrot.slane %v423_v6, 4  ;;  %v433_v20 = vor.u32 %v432_v7, %v428_v62  ;;  %v454_v23 = vshrl.u32 %v4457_v48, 16  ;;  %v460_v24 = vshll.u32 %v4462_v53, 16  ;;  %3846 = vmatpush3.bf16.msra.mxu0 %v4107_v41 }
  0x3a   : > { %3804 = vmatmul.mubr.msk.bf16.gmra.mxu0 %vm525_vm3, %v3265_v9  ;;  %v446_v29 = vrot.slane %v444_v13, 5  ;;  %v452_v31 = vrot.slane %v450_v16, 5  ;;  %v3288_v32 = vcombine.low %v250_v40, %v4457_v48  ;;  %4033 = vmatprep.subr.msk.bf16.mxu0 %vm550_vm0, %v4474_v2  ;;  %v3302_v39 = vrot.slane %v842_v11, 9  ;;  %v844_v40 = vld [vmem:[%s4305_s8 + $0x18] sm:$0xe] }
  0x3b   : > { %v429_v33 = vsel %vm4334_vm4, %v424_v19, %v428_v62  ;;  %v434_v34 = vrot.slane %v433_v20, 4  ;;  %v456_v35 = vrot.slane %v454_v23, 4  ;;  %v462_v36 = vrot.slane %v460_v24, 5  ;;  %v4116_v23 = vld [vmem:[%s4305_s8 + $0x30] sm:$0xff]  }
  0x3c   : > { %v447_v37 = vor.u32 %v446_v29, %v443_v12  ;;  %3834 = vmatmul.mubr.msk.bf16.gmra.mxu1 %vm525_vm3, %v3288_v32  ;;  %v871_v41 = vrot.slane %v4309_v17, 5  ;;  %v3303_v47 = vrot.slane %v843_v15, 9  ;;  %v880_v49 = vrot.slane %v878_v46, 4 }
  0x3d   : > { %v439_v43 = vsel %vm4334_vm4, %v434_v34, %v438_v10  ;;  %v457_v44 = vor.u32 %v456_v35, %v452_v31  ;;  %3873 = vmatprep.mubr.msk.bf16.mxu1 %vm525_vm3, %v4109_v26  ;;  %v3304_v7 = vrot.slane %v844_v40, 9  ;;  %v885_v18 = vrot.slane %v4344_v52, 5  ;;  %v847_v10 = vld [vmem:[%s4305_s8 + $0x3c] sm:$0xe] }
  0x3e   : > { %v3266_v50 = vcombine.low %v429_v33, %v439_v43  ;;  %v448_v17 = vrot.slane %v447_v37, 4  ;;  %v872_v51 = vsel %vm4500_vm7, %v3302_v39, %v871_v41  ;;  %v873_v55 = vrot.slane %v871_v41, 4  ;;  %v4114_v33 = vld [vmem:[%s5340_s1 + $0xa8] sm:$0xff]   ;;  %v849_v39 = vld [vmem:[%s4305_s8 + $0x54] sm:$0xe]  ;;  %v4122_v43 = vld [vmem:[%s5340_s1 + $0xbc] sm:$0xff]  }
  0x3f   : > { %v458_v57 = vrot.slane %v457_v44, 4  ;;  %v4514_v58 = vsel %vm4500_vm7, %v3303_v47, %v878_v46  ;;  %v4528_v27 = vsel %vm4500_vm7, %v880_v49, %v881_v54  ;;  %v1951_v46 = vsel %vm550_vm0, %v4112_v4, 0 }
  0x40   : > { %3807 = vmatprep.mubr.msk.bf16.mxu0 %vm525_vm3, %v3266_v50  ;;  %v453_v61 = vsel %vm4334_vm4, %v448_v17, %v452_v31  ;;  %v875_v62 = vsel %vm4500_vm7, %v873_v55, %v874_v25  ;;  %v888_v25 = vrot.slane %v4349_v56, 5  ;;  %v3305_v54 = vrot.slane %v845_v14, 9  ;;  %v848_v31 = vld [vmem:[%s4305_s8 + $0x48] sm:$0xe] }
  0x41   : > { %v463_v5 = vsel %vm4334_vm4, %v458_v57, %v462_v36  ;;  %v3319_v6 = vcombine.low %v872_v51, %v875_v62  ;;  %v892_v4 = vrot.slane %v4359_v3, 5  ;;  %v887_v9 = vrot.slane %v885_v18, 4  ;;  %v3386_v57 = vld [vmem:[%s4305_s8 + $0xc] sm:$0xf]  ;;  %v3388_v62 = vld [vmem:[%s4305_s8 + $0x14] sm:$0x1] }
  0x42   : > { %v3267_v11 = vcombine.low %v453_v61, %v463_v5  ;;  %v895_v12 = vrot.slane %v4365_v8, 5  ;;  %v3306_v13 = vrot.slane %v846_v1, 9  ;;  %v1662_v52 = vsel %vm550_vm0, %v4474_v2, 0  ;;  %v3387_v61 = vld [vmem:[%s4305_s8 + $0x10] sm:$0xf] }
  0x43   : > { %v894_v56 = vrot.slane %v892_v4, 4  ;;  %v899_v16 = vrot.slane %v4380_v22, 5  ;;  %v902_v15 = vrot.slane %v4392_v38, 5  ;;  %v3320_v3 = vcombine.low %v4514_v58, %v4528_v27 }
  0x44   : > { %3808 = vmatmul.mubr.msk.bf16.gmra.mxu0 %vm525_vm3, %v3267_v11  ;;  %3874 = vmatmul.mubr.msk.bf16.vlgmr.msra.gmra.mxu1 %vm525_vm3, %v4110_v60  ;;  %v3307_v8 = vrot.slane %v847_v10, 9  ;;  %v906_v19 = vrot.slane %v4413_v59, 5  ;;  %v909_v20 = vrot.slane %v4416_v0, 5  ;;  %v886_v2 = vsel %vm4500_vm7, %v3304_v7, %v885_v18  ;;  %v4118_v59 = vld [vmem:[%s5340_s1 + $0xc4] sm:$0xff]  }
  0x45   : > { %3847 = vmatprep.mubr.msk.bf16.mxu0 %vm525_vm3, %v3319_v6  ;;  %3916 = vmatpush3.bf16.msra.mxu1 %v1951_v46  ;;  %v889_v22 = vsel %vm4500_vm7, %v887_v9, %v888_v25  ;;  %v4561_v38 = vsel %vm4500_vm7, %v3305_v54, %v892_v4  ;;  %v901_v0 = vrot.slane %v899_v16, 4  ;;  %v4569_v24 = vsel %vm4500_vm7, %v894_v56, %v895_v12  ;;  %v3440_v6 = vld [vmem:[%s4305_s8 + $0xc] sm:$0xe]  ;;  %v4126_v4 = vld [vmem:[%s5340_s1 + $0xb4] sm:$0xff]  }
  0x46   : > { %3877 = vmatprep.mubr.msk.bf16.mxu1 %vm525_vm3, %v4113_v63  ;;  %3917 = vmatprep.subr.bf16.mxu1 %v4115_v28  ;;  %v4573_v26 = vsel %vm4500_vm7, %v3306_v13, %v899_v16  ;;  %v908_v29 = vrot.slane %v906_v19, 4  ;;  %v913_v32 = vrot.slane %v4438_v21, 5  ;;  %v4586_v35 = vsel %vm4500_vm7, %v3307_v8, %v906_v19  ;;  %v4119_v21 = vld [vmem:[%s4305_s8 + $0x3c] sm:$0xff]   ;;  %v4120_v7 = vld [vmem:[%s4305_s8 + $0x48] sm:$0xff]  }
  0x47   : > { %v4582_v34 = vsel %vm4500_vm7, %v901_v0, %v902_v15  ;;  %v3308_v36 = vrot.slane %v848_v31, 9  ;;  %v916_v37 = vrot.slane %v4441_v30, 5  ;;  %v3321_v41 = vcombine.low %v886_v2, %v889_v22  ;;  %v4121_v56 = vld [vmem:[%s5340_s1 + $0x98] sm:$0xff]   ;;  %v3391_v19 = vld [vmem:[%s4305_s8 + $0x20] sm:$0x1] }
  0x48   : > { %v4593_v40 = vsel %vm4500_vm7, %v908_v29, %v909_v20  ;;  %v915_v44 = vrot.slane %v913_v32, 4  ;;  %v3309_v47 = vrot.slane %v849_v39, 9  ;;  %v920_v49 = vrot.slane %v4457_v48, 5  ;;  %v4117_v48 = vld [vmem:[%s5340_s1 + $0xa0] sm:$0xff]  }
  0x49   : > { %3918 = vmatpush3.bf16.msra.mxu1 %v4115_v28  ;;  %v4600_v30 = vsel %vm4500_vm7, %v3308_v36, %v913_v32  ;;  %v923_v14 = vrot.slane %v4462_v53, 5  ;;  %v3322_v50 = vcombine.low %v4561_v38, %v4569_v24  ;;  %v3323_v17 = vcombine.low %v4573_v26, %v4582_v34  ;;  %v3389_v28 = vld [vmem:[%s4305_s8 + $0x18] sm:$0xf]  ;;  %v4125_v26 = vld [vmem:[%s5340_s1 + $0x90] sm:$0xff]  }
  0x4a   : > { %3919 = vmatprep.subr.bf16.mxu1 %v4118_v59  ;;  %v3324_v51 = vcombine.low %v4586_v35, %v4593_v40  ;;  %v4612_v55 = vsel %vm4500_vm7, %v915_v44, %v916_v37  ;;  %v4624_v58 = vsel %vm4500_vm7, %v3309_v47, %v920_v49  ;;  %v922_v60 = vrot.slane %v920_v49, 4  ;;  %v4660_v32 = vld [vmem:[%s5340_s1 + $0xf8] ss:$0 sps:$4 sm:$0xff]   ;;  %v4128_v47 = vld [vmem:[%s5340_s1 + $0x11c] ss:$0 sps:$4 sm:$0xff]  }
  0x4b   : > { %v3325_v53 = vcombine.low %v4600_v30, %v4612_v55  ;;  %v1385_v27 = vshrl.u32 %v3386_v57, 16  ;;  %v1388_v46 = vshll.u32 %v3386_v57, 16  ;;  %v1394_v63 = vshll.u32 %v3387_v61, 16  ;;  %v3443_v35 = vld [vmem:[%s4305_s8 + $0x30] sm:$0xe] }
  0x4c   : > { %3848 = vmatmul.mubr.msk.bf16.vlgmr.msra.gmra.mxu0 %vm525_vm3, %v3320_v3  ;;  %3878 = vmatmul.mubr.msk.bf16.gmra.mxu1 %vm525_vm3, %v4116_v23  ;;  %v1398_v1 = vshrl.u32 %v3387_v61, 16  ;;  %v1404_v5 = vshll.u32 %v3388_v62, 16  ;;  %v4633_v18 = vsel %vm4500_vm7, %v922_v60, %v923_v14  ;;  %v3448_v11 = vrot.slane %v3440_v6, 9  ;;  %v3441_v23 = vld [vmem:[%s4305_s8 + $0x18] sm:$0xe] }
  0x4d   : > { %3890 = vmatpush3.bf16.msra.mxu0 %v1662_v52  ;;  %3851 = vmatprep.mubr.msk.bf16.mxu0 %vm525_vm3, %v3321_v41  ;;  %v1387_v10 = vrot.slane %v1385_v27, 4  ;;  %v1811_v25 = vrot.slane %v3387_v61, 5  ;;  %v3326_v54 = vcombine.low %v4624_v58, %v4633_v18  ;;  %v1390_v9 = vrot.slane %v1388_v46, 5  ;;  %v3390_v52 = vld [vmem:[%s4305_s8 + $0x1c] sm:$0xf]  ;;  %v4124_v46 = vld [vmem:[%s4305_s8 + $0x60] sm:$0xff]  }
  0x4e   : > { %3891 = vmatprep.subr.bf16.mxu0 %v4114_v33  ;;  %3920 = vmatpush3.bf16.msra.mxu1 %v4118_v59  ;;  %v1396_v12 = vrot.slane %v1394_v63, 5  ;;  %v1400_v13 = vrot.slane %v1398_v1, 4  ;;  %v1406_v16 = vrot.slane %v1404_v5, 5  ;;  %v1814_v8 = vrot.slane %v3388_v62, 5  ;;  %v4123_v59 = vld [vmem:[%s4305_s8 + $0x54] sm:$0xff]  }
  0x4f   : > { %3881 = vmatprep.mubr.msk.bf16.mxu1 %vm525_vm3, %v4119_v21  ;;  %3921 = vmatprep.subr.bf16.mxu1 %v4122_v43  ;;  %v4648_v15 = vsel %vm4500_vm7, %v3448_v11, %v1811_v25  ;;  %v1813_v3 = vrot.slane %v1811_v25, 4  ;;  %v1391_v20 = vor.u32 %v1390_v9, %v1387_v10  ;;  %v1409_v22 = vshrl.u32 %v3389_v28, 16  ;;  %v3392_v60 = vld [vmem:[%s4305_s8 + $0x24] sm:$0xf]  ;;  %v3393_v62 = vld [vmem:[%s4305_s8 + $0x28] sm:$0xf] }
  0x50   : > { %v1401_v2 = vor.u32 %v1400_v13, %v1396_v12  ;;  %v1412_v38 = vshll.u32 %v3389_v28, 16  ;;  %v1418_v24 = vshll.u32 %v3390_v52, 16  ;;  %v1422_v29 = vshrl.u32 %v3390_v52, 16  ;;  %v3394_v27 = vld [vmem:[%s4305_s8 + $0x2c] sm:$0x1] }
  0x51   : > { %3892 = vmatpush3.bf16.msra.mxu0 %v4114_v33  ;;  %v4655_v0 = vsel %vm4500_vm7, %v1813_v3, %v1814_v8  ;;  %v1428_v31 = vshll.u32 %v3391_v19, 16  ;;  %v1392_v33 = vrot.slane %v1391_v20, 4  ;;  %v1411_v39 = vrot.slane %v1409_v22, 4 }
  0x52   : > { %3893 = vmatprep.subr.bf16.mxu0 %v4117_v48  ;;  %3922 = vmatpush3.bf16.msra.mxu1 %v4122_v43  ;;  %v1402_v36 = vrot.slane %v1401_v2, 4  ;;  %v3465_v37 = vcombine.low %v4648_v15, %v4655_v0  ;;  %v1414_v41 = vrot.slane %v1412_v38, 5  ;;  %v1420_v21 = vrot.slane %v1418_v24, 5  ;;  %v3396_v38 = vld [vmem:[%s4305_s8 + $0x34] sm:$0xf] }
  0x53   : > { %3923 = vmatprep.subr.bf16.mxu1 %v4126_v4  ;;  %v1424_v43 = vrot.slane %v1422_v29, 4  ;;  %v1430_v44 = vrot.slane %v1428_v31, 5  ;;  %v1397_v49 = vsel %vm4334_vm4, %v1392_v33, %v1396_v12  ;;  %v1818_v57 = vrot.slane %v3390_v52, 5  ;;  %v3397_v31 = vld [vmem:[%s4305_s8 + $0x38] sm:$0x1] }
  0x54   : > { %3852 = vmatmul.mubr.msk.bf16.gmra.mxu0 %vm525_vm3, %v3322_v50  ;;  %3882 = vmatmul.mubr.msk.bf16.gmra.mxu1 %vm525_vm3, %v4120_v7  ;;  %v1407_v14 = vsel %vm4334_vm4, %v1402_v36, %v1406_v16  ;;  %v3449_v50 = vrot.slane %v3441_v23, 9  ;;  %v1821_v61 = vrot.slane %v3391_v19, 5  ;;  %v4693_v5 = vsel %vm550_vm0, %v4660_v32, 0  ;;  %v3442_v7 = vld [vmem:[%s4305_s8 + $0x24] sm:$0xe] }
  0x55   : > { %3894 = vmatpush3.bf16.msra.mxu0 %v4117_v48  ;;  %3855 = vmatprep.mubr.msk.bf16.mxu0 %vm525_vm3, %v3323_v17  ;;  %v4682_v34 = vcombine.low %v1397_v49, %v1407_v14  ;;  %v1415_v17 = vor.u32 %v1414_v41, %v1411_v39  ;;  %v1425_v48 = vor.u32 %v1424_v43, %v1420_v21  ;;  %v1820_v1 = vrot.slane %v1818_v57, 4  ;;  %v3395_v19 = vld [vmem:[%s4305_s8 + $0x30] sm:$0xf] }
  0x56   : > { %3895 = vmatprep.subr.bf16.mxu0 %v4121_v56  ;;  %3885 = vmatprep.mubr.msk.bf16.mxu1 %vm525_vm3, %v4123_v59  ;;  %v4689_v63 = vsel %vm4500_vm7, %v3449_v50, %v1818_v57  ;;  %v4696_v6 = vsel %vm550_vm0, %v4128_v47, 0  ;;  %v1433_v25 = vshrl.u32 %v3392_v60, 16  ;;  %v1436_v28 = vshll.u32 %v3392_v60, 16  ;;  %v3398_v57 = vld [vmem:[%s4305_s8 + $0x3c] sm:$0xf] }
  0x57   : > { %3924 = vmatpush3.bf16.msra.mxu1 %v4126_v4  ;;  %v1416_v10 = vrot.slane %v1415_v17, 4  ;;  %v1426_v11 = vrot.slane %v1425_v48, 4  ;;  %v1822_v4 = vsel %vm4500_vm7, %v1820_v1, %v1821_v61  ;;  %v1442_v9 = vshll.u32 %v3393_v62, 16  ;;  %v3399_v60 = vld [vmem:[%s4305_s8 + $0x40] sm:$0xf]  ;;  %v4130_v17 = vld [vmem:[%s5340_s1 + $0x114] sm:$0xff]  }
  0x58   : > { %4036 = vmatprep.subr.msk.bf16.mxu1 %vm550_vm0, %v4128_v47  ;;  %v1446_v12 = vshrl.u32 %v3393_v62, 16  ;;  %v1452_v13 = vshll.u32 %v3394_v27, 16  ;;  %v3466_v3 = vcombine.low %v4689_v63, %v1822_v4  ;;  %v1435_v8 = vrot.slane %v1433_v25, 4  ;;  %v3400_v1 = vld [vmem:[%s4305_s8 + $0x44] sm:$0x1] }
  0x59   : > { %3896 = vmatpush3.bf16.msra.mxu0 %v4121_v56  ;;  %v1421_v52 = vsel %vm4334_vm4, %v1416_v10, %v1420_v21  ;;  %v1431_v16 = vsel %vm4334_vm4, %v1426_v11, %v1430_v44  ;;  %v1438_v56 = vrot.slane %v1436_v28, 5  ;;  %v1444_v2 = vrot.slane %v1442_v9, 5  ;;  %v3444_v4 = vld [vmem:[%s4305_s8 + $0x3c] sm:$0xe] }
  0x5a   : > { %3897 = vmatprep.subr.bf16.mxu0 %v4125_v26  ;;  %v4708_v20 = vcombine.low %v1421_v52, %v1431_v16  ;;  %v1448_v22 = vrot.slane %v1446_v12, 4  ;;  %v1454_v23 = vrot.slane %v1452_v13, 5  ;;  %v3450_v59 = vrot.slane %v3442_v7, 9  ;;  %v3401_v12 = vld [vmem:[%s4305_s8 + $0x48] sm:$0xf] }
  0x5b   : > { %v1825_v24 = vrot.slane %v3393_v62, 5  ;;  %v1828_v29 = vrot.slane %v3394_v27, 5  ;;  %v1439_v33 = vor.u32 %v1438_v56, %v1435_v8  ;;  %v1457_v39 = vshrl.u32 %v3395_v19, 16 }
  0x5c   : > { %3856 = vmatmul.mubr.msk.bf16.gmra.mxu0 %vm525_vm3, %v3324_v51  ;;  %3886 = vmatmul.mubr.msk.bf16.gmra.mxu1 %vm525_vm3, %v4124_v46  ;;  %v1449_v36 = vor.u32 %v1448_v22, %v1444_v2  ;;  %v1460_v41 = vshll.u32 %v3395_v19, 16  ;;  %v1466_v51 = vshll.u32 %v3396_v38, 16  ;;  %v1470_v55 = vshrl.u32 %v3396_v38, 16 }
  0x5d   : > { %3859 = vmatprep.mubr.msk.bf16.mxu0 %vm525_vm3, %v3325_v53  ;;  %3898 = vmatpush3.bf16.msra.mxu0 %v4125_v26  ;;  %v1826_v40 = vsel %vm4500_vm7, %v3450_v59, %v1825_v24  ;;  %v1827_v30 = vrot.slane %v1825_v24, 4  ;;  %v1440_v53 = vrot.slane %v1439_v33, 4  ;;  %v1459_v43 = vrot.slane %v1457_v39, 4  ;;  %v3402_v59 = vld [vmem:[%s4305_s8 + $0x4c] sm:$0xf]  ;;  %v4129_v39 = vld [vmem:[%s5340_s1 + $0xf0] sm:$0xff]  }
  0x5e   : > { %3925 = vmatprep.mubr.msk.bf16.mxu1 %vm525_vm3, %v3465_v37  ;;  %4035 = vmatprep.subr.msk.bf16.mxu0 %vm550_vm0, %v4660_v32  ;;  %v1450_v21 = vrot.slane %v1449_v36, 4  ;;  %v1462_v44 = vrot.slane %v1460_v41, 5  ;;  %v1468_v0 = vrot.slane %v1466_v51, 5  ;;  %v1472_v37 = vrot.slane %v1470_v55, 4  ;;  %v4134_v51 = vld [vmem:[%s5340_s1 + $0x104] sm:$0xff]  }
  0x5f   : > { %v1829_v15 = vsel %vm4500_vm7, %v1827_v30, %v1828_v29  ;;  %v1476_v47 = vshll.u32 %v3397_v31, 16  ;;  %v1445_v32 = vsel %vm4334_vm4, %v1440_v53, %v1444_v2  ;;  %v3451_v62 = vrot.slane %v3443_v35, 9 }
  0x60   : > { %v1455_v49 = vsel %vm4334_vm4, %v1450_v21, %v1454_v23  ;;  %v3467_v14 = vcombine.low %v1826_v40, %v1829_v15  ;;  %v1463_v50 = vor.u32 %v1462_v44, %v1459_v43  ;;  %v1473_v48 = vor.u32 %v1472_v37, %v1468_v0  ;;  %v3445_v44 = vld [vmem:[%s4305_s8 + $0x48] sm:$0xe] }
  0x61   : > { %v4738_v26 = vcombine.low %v1445_v32, %v1455_v49  ;;  %v1478_v61 = vrot.slane %v1476_v47, 5  ;;  %v1832_v46 = vrot.slane %v3396_v38, 5  ;;  %v1835_v63 = vrot.slane %v3397_v31, 5  ;;  %v3403_v31 = vld [vmem:[%s4305_s8 + $0x50] sm:$0x1]  ;;  %v4131_v15 = vld [vmem:[%s5340_s1 + $0xe8] sm:$0xff]  }
  0x62   : > { %v1464_v27 = vrot.slane %v1463_v50, 4  ;;  %v1481_v7 = vshrl.u32 %v3398_v57, 16  ;;  %v1474_v10 = vrot.slane %v1473_v48, 4  ;;  %v1484_v11 = vshll.u32 %v3398_v57, 16  ;;  %v3404_v49 = vld [vmem:[%s4305_s8 + $0x54] sm:$0xf] }
  0x63   : > { %v1490_v25 = vshll.u32 %v3399_v60, 16  ;;  %v1494_v28 = vshrl.u32 %v3399_v60, 16  ;;  %v1833_v58 = vsel %vm4500_vm7, %v3451_v62, %v1832_v46  ;;  %v1834_v18 = vrot.slane %v1832_v46, 4  ;;  %v4136_v48 = vld [vmem:[%s5340_s1 + $0xfc] sm:$0xff]  }
  0x64   : > { %3860 = vmatmul.mubr.msk.bf16.gmra.mxu0 %vm525_vm3, %v3326_v54  ;;  %3926 = vmatmul.mubr.msk.bf16.vlgmr.msra.gmra.mxu1 %vm525_vm3, %v3466_v3  ;;  %v1469_v9 = vsel %vm4334_vm4, %v1464_v27, %v1468_v0  ;;  %v1483_v54 = vrot.slane %v1481_v7, 4  ;;  %v1479_v13 = vsel %vm4334_vm4, %v1474_v10, %v1478_v61  ;;  %v1500_v19 = vshll.u32 %v3400_v1, 16 }
  0x65   : > { %3899 = vmatprep.mubr.msk.bf16.mxu0 %vm525_vm3, %v4682_v34  ;;  %3968 = vmatpush3.bf16.msra.mxu1 %v4696_v6  ;;  %v4132_v34 = vld [vmem:[%s5340_s1 + $0x10c] sm:$0xff]   ;;  %v1486_v6 = vrot.slane %v1484_v11, 5  ;;  %v1492_v52 = vrot.slane %v1490_v25, 5  ;;  %v1496_v16 = vrot.slane %v1494_v28, 4  ;;  %v4764_v3 = vcombine.low %v1469_v9, %v1479_v13  ;;  %v4133_v13 = vld [vmem:[%s5340_s1 + $0xe0] sm:$0xff]  }
  0x66   : > { %3929 = vmatprep.mubr.msk.bf16.mxu1 %vm525_vm3, %v3467_v14  ;;  %3969 = vmatprep.subr.bf16.mxu1 %v4130_v17  ;;  %v1836_v8 = vsel %vm4500_vm7, %v1834_v18, %v1835_v63  ;;  %v3452_v56 = vrot.slane %v3444_v4, 9  ;;  %v1839_v23 = vrot.slane %v3399_v60, 5  ;;  %v1502_v24 = vrot.slane %v1500_v19, 5  ;;  %v3405_v14 = vld [vmem:[%s4305_s8 + $0x58] sm:$0xf] }
  0x67   : > { %v3468_v2 = vcombine.low %v1833_v58, %v1836_v8  ;;  %v1487_v22 = vor.u32 %v1486_v6, %v1483_v54  ;;  %v1497_v38 = vor.u32 %v1496_v16, %v1492_v52  ;;  %v1842_v29 = vrot.slane %v3400_v1, 5 }
  0x68   : > { %v1505_v33 = vshrl.u32 %v3401_v12, 16  ;;  %v1508_v36 = vshll.u32 %v3401_v12, 16  ;;  %v1840_v40 = vsel %vm4500_vm7, %v3452_v56, %v1839_v23  ;;  %v1841_v30 = vrot.slane %v1839_v23, 4 }
  0x69   : > { %3970 = vmatpush3.bf16.msra.mxu1 %v4130_v17  ;;  %v1488_v41 = vrot.slane %v1487_v22, 4  ;;  %v1498_v35 = vrot.slane %v1497_v38, 4  ;;  %v1514_v21 = vshll.u32 %v3402_v59, 16  ;;  %v1518_v43 = vshrl.u32 %v3402_v59, 16  ;;  %v4797_v17 = vld [vmem:[%s4305_s8 + $0x5c] sm:$0x1] }
  0x6a   : > { %3971 = vmatprep.subr.bf16.mxu1 %v4132_v34  ;;  %v1507_v55 = vrot.slane %v1505_v33, 4  ;;  %v1510_v53 = vrot.slane %v1508_v36, 5  ;;  %v1843_v47 = vsel %vm4500_vm7, %v1841_v30, %v1842_v29  ;;  %v1524_v32 = vshll.u32 %v3403_v31, 16  ;;  %v4817_v22 = vld [vmem:[%s4305_s8 + $0x68] sm:$0x1]  ;;  %v4135_v30 = vld [vmem:[%s5340_s1 + $0xd8] sm:$0xff]  }
  0x6b   : > { %v1493_v0 = vsel %vm4334_vm4, %v1488_v41, %v1492_v52  ;;  %v1503_v37 = vsel %vm4334_vm4, %v1498_v35, %v1502_v24  ;;  %v3469_v50 = vcombine.low %v1840_v40, %v1843_v47  ;;  %v1516_v60 = vrot.slane %v1514_v21, 5  ;;  %v3407_v52 = vld [vmem:[%s4305_s8 + $0x60] sm:$0xf] }
  0x6c   : > { %3900 = vmatmul.mubr.msk.bf16.vlgmr.msra.gmra.mxu0 %vm525_vm3, %v4708_v20  ;;  %3930 = vmatmul.mubr.msk.bf16.gmra.mxu1 %vm525_vm3, %v3468_v2  ;;  %v3423_v20 = vcombine.low %v1493_v0, %v1503_v37  ;;  %v1511_v57 = vor.u32 %v1510_v53, %v1507_v55  ;;  %v1520_v61 = vrot.slane %v1518_v43, 4  ;;  %v1526_v62 = vrot.slane %v1524_v32, 5  ;;  %v3408_v2 = vld [vmem:[%s4305_s8 + $0x64] sm:$0xf] }
  0x6d   : > { %3942 = vmatpush3.bf16.msra.mxu0 %v4693_v5  ;;  %3903 = vmatprep.mubr.msk.bf16.mxu0 %vm525_vm3, %v4738_v26  ;;  %v3453_v27 = vrot.slane %v3445_v44, 9  ;;  %v1846_v46 = vrot.slane %v3402_v59, 5  ;;  %v3446_v5 = vld [vmem:[%s4305_s8 + $0x54] sm:$0xe]  ;;  %v1849_v63 = vrot.slane %v3403_v31, 5  ;;  %v1529_v1 = vshrl.u32 %v3404_v49, 16 }
  0x6e   : > { %3943 = vmatprep.subr.bf16.mxu0 %v4129_v39  ;;  %3972 = vmatpush3.bf16.msra.mxu1 %v4132_v34  ;;  %v1512_v26 = vrot.slane %v1511_v57, 4  ;;  %v1532_v7 = vshll.u32 %v3404_v49, 16  ;;  %v1521_v10 = vor.u32 %v1520_v61, %v1516_v60  ;;  %v1538_v28 = vshll.u32 %v3405_v14, 16  ;;  %v4836_v44 = vld [vmem:[%s4305_s8 + $0x1c] sm:$0xf] }
  0x6f   : > { %3933 = vmatprep.mubr.msk.bf16.mxu1 %vm525_vm3, %v3469_v50  ;;  %3973 = vmatprep.subr.bf16.mxu1 %v4134_v51  ;;  %v1847_v11 = vsel %vm4500_vm7, %v3453_v27, %v1846_v46  ;;  %v1848_v25 = vrot.slane %v1846_v46, 4  ;;  %v1531_v9 = vrot.slane %v1529_v1, 4  ;;  %v1542_v18 = vshrl.u32 %v3405_v14, 16  ;;  %v4139_v50 = vld [vmem:[%s5340_s1 + $0x140] ss:$0 sps:$4 sm:$0xff]  }
  0x70   : > { %v1517_v4 = vsel %vm4334_vm4, %v1512_v26, %v1516_v60  ;;  %v1534_v58 = vrot.slane %v1532_v7, 5  ;;  %v1522_v54 = vrot.slane %v1521_v10, 4  ;;  %v1540_v34 = vrot.slane %v1538_v28, 5  ;;  %v4847_v61 = vld [vmem:[%s4305_s8 + $0x20] sm:$0x1] }
  0x71   : > { %3944 = vmatpush3.bf16.msra.mxu0 %v4129_v39  ;;  %v1850_v12 = vsel %vm4500_vm7, %v1848_v25, %v1849_v63  ;;  %v1548_v6 = vshll.u32 %v4797_v17, 16  ;;  %v1544_v19 = vrot.slane %v1542_v18, 4  ;;  %v3454_v56 = vrot.slane %v3446_v5, 9  ;;  %v3447_v39 = vld [vmem:[%s4305_s8 + $0x60] sm:$0xe] }
  0x72   : > { %3945 = vmatprep.subr.bf16.mxu0 %v4131_v15  ;;  %3974 = vmatpush3.bf16.msra.mxu1 %v4134_v51  ;;  %v3470_v16 = vcombine.low %v1847_v11, %v1850_v12  ;;  %v1535_v8 = vor.u32 %v1534_v58, %v1531_v9  ;;  %v1527_v38 = vsel %vm4334_vm4, %v1522_v54, %v1526_v62  ;;  %v1853_v59 = vrot.slane %v3405_v14, 5  ;;  %v3532_v51 = vld [vmem:[%s4305_s8 + $0x18] sm:$0xf]  ;;  %v3535_v26 = vld [vmem:[%s4305_s8 + $0x24] sm:$0xf] }
  0x73   : > { %3975 = vmatprep.subr.bf16.mxu1 %v4136_v48  ;;  %v1550_v23 = vrot.slane %v1548_v6, 5  ;;  %v1856_v24 = vrot.slane %v4797_v17, 5  ;;  %v3424_v29 = vcombine.low %v1517_v4, %v1527_v38  ;;  %v1545_v33 = vor.u32 %v1544_v19, %v1540_v34  ;;  %v4858_v11 = vld [vmem:[%s4305_s8 + $0x28] sm:$0xf]  ;;  %v4137_v38 = vld [vmem:[%s4305_s8 + $0x18] sm:$0xff]  }
  0x74   : > { %3904 = vmatmul.mubr.msk.bf16.gmra.mxu0 %vm525_vm3, %v4764_v3  ;;  %v1536_v31 = vrot.slane %v1535_v8, 4  ;;  %v1553_v36 = vshrl.u32 %v3407_v52, 16  ;;  %3934 = vmatmul.mubr.msk.bf16.gmra.mxu1 %vm525_vm3, %v3470_v16  ;;  %v1854_v3 = vsel %vm4500_vm7, %v3454_v56, %v1853_v59  ;;  %v1855_v41 = vrot.slane %v1853_v59, 4  ;;  %v4871_v16 = vld [vmem:[%s4305_s8 + $0x2c] sm:$0x1] }
  0x75   : > { %3946 = vmatpush3.bf16.msra.mxu0 %v4131_v15  ;;  %3907 = vmatprep.mubr.msk.bf16.mxu0 %vm525_vm3, %v3423_v20  ;;  %v1556_v35 = vshll.u32 %v3407_v52, 16  ;;  %v1562_v40 = vshll.u32 %v3408_v2, 16  ;;  %v1546_v53 = vrot.slane %v1545_v33, 4  ;;  %v1566_v43 = vshrl.u32 %v3408_v2, 16 }
  0x76   : > { %3947 = vmatprep.subr.bf16.mxu0 %v4133_v13  ;;  %v1541_v55 = vsel %vm4334_vm4, %v1536_v31, %v1540_v34  ;;  %v1555_v21 = vrot.slane %v1553_v36, 4  ;;  %3976 = vmatpush3.bf16.msra.mxu1 %v4136_v48  ;;  %v1857_v15 = vsel %vm4500_vm7, %v1855_v41, %v1856_v24  ;;  %v1572_v47 = vshll.u32 %v4817_v22, 16  ;;  %v4879_v31 = vld [vmem:[%s4305_s8 + $0x34] sm:$0xf]  ;;  %v4884_v41 = vld [vmem:[%s4305_s8 + $0x38] sm:$0x1] }
  0x77   : > { %v1558_v0 = vrot.slane %v1556_v35, 5  ;;  %v1564_v37 = vrot.slane %v1562_v40, 5  ;;  %v1551_v32 = vsel %vm4334_vm4, %v1546_v53, %v1550_v23  ;;  %v3471_v49 = vcombine.low %v1854_v3, %v1857_v15  ;;  %4038 = vmatprep.subr.msk.bf16.mxu1 %vm550_vm0, %v4139_v50 }
  0x78   : > { %v1568_v14 = vrot.slane %v1566_v43, 4  ;;  %v3455_v20 = vrot.slane %v3447_v39, 9  ;;  %v3425_v57 = vcombine.low %v1541_v55, %v1551_v32  ;;  %v1574_v17 = vrot.slane %v1572_v47, 5  ;;  %v3541_v32 = vld [vmem:[%s4305_s8 + $0x3c] sm:$0xf] }
  0x79   : > { %3948 = vmatpush3.bf16.msra.mxu0 %v4133_v13  ;;  %v1559_v60 = vor.u32 %v1558_v0, %v1555_v21  ;;  %v1860_v48 = vrot.slane %v3408_v2, 5  ;;  %3937 = vmatprep.mubr.msk.bf16.mxu1 %vm525_vm3, %v3471_v49  ;;  %v1863_v27 = vrot.slane %v4817_v22, 5  ;;  %v2325_v46 = vshrl.u32 %v3532_v51, 16  ;;  %v3538_v22 = vld [vmem:[%s4305_s8 + $0x30] sm:$0xf] }
  0x7a   : > { %3949 = vmatprep.subr.bf16.mxu0 %v4135_v30  ;;  %v1569_v62 = vor.u32 %v1568_v14, %v1564_v37  ;;  %v2328_v5 = vshll.u32 %v3532_v51, 16  ;;  %v2334_v10 = vshll.u32 %v4836_v44, 16  ;;  %v2338_v9 = vshrl.u32 %v4836_v44, 16  ;;  %v4138_v14 = vld [vmem:[%s4305_s8 + $0x24] sm:$0xff]  }
  0x7b   : > { %v1560_v63 = vrot.slane %v1559_v60, 4  ;;  %v1861_v1 = vsel %vm4500_vm7, %v3455_v20, %v1860_v48  ;;  %v1862_v7 = vrot.slane %v1860_v48, 4  ;;  %v2327_v28 = vrot.slane %v2325_v46, 4  ;;  %v4897_v60 = vld [vmem:[%s4305_s8 + $0x40] sm:$0xf] }
  0x7c   : > { %3908 = vmatmul.mubr.msk.bf16.gmra.mxu0 %vm525_vm3, %v3424_v29  ;;  %v1570_v25 = vrot.slane %v1569_v62, 4  ;;  %v2330_v4 = vrot.slane %v2328_v5, 5  ;;  %v2336_v54 = vrot.slane %v2334_v10, 5  ;;  %v2344_v12 = vshll.u32 %v4847_v61, 16  ;;  %v4901_v46 = vld [vmem:[%s4305_s8 + $0x44] sm:$0x1] }
  0x7d   : > { %3911 = vmatprep.mubr.msk.bf16.mxu0 %vm525_vm3, %v3425_v57  ;;  %3950 = vmatpush3.bf16.msra.mxu0 %v4135_v30  ;;  %v1565_v58 = vsel %vm4334_vm4, %v1560_v63, %v1564_v37  ;;  %v1864_v18 = vsel %vm4500_vm7, %v1862_v7, %v1863_v27  ;;  %v2340_v52 = vrot.slane %v2338_v9, 4  ;;  %v2349_v56 = vshrl.u32 %v3535_v26, 16  ;;  %v3544_v9 = vld [vmem:[%s4305_s8 + $0x48] sm:$0xf] }
  0x7e   : > { %4037 = vmatprep.subr.msk.bf16.mxu0 %vm550_vm0, %v4139_v50  ;;  %v1575_v13 = vsel %vm4334_vm4, %v1570_v25, %v1574_v17  ;;  %v3472_v34 = vcombine.low %v1861_v1, %v1864_v18  ;;  %v2331_v6 = vor.u32 %v2330_v4, %v2327_v28  ;;  %v2346_v19 = vrot.slane %v2344_v12, 5  ;;  %v4141_v12 = vld [vmem:[%s5340_s1 + $0x138] sm:$0xff]  }
  0x7f   : > { %v3426_v8 = vcombine.low %v1565_v58, %v1575_v13  ;;  %v2352_v2 = vshll.u32 %v3535_v26, 16  ;;  %v2341_v59 = vor.u32 %v2340_v52, %v2336_v54  ;;  %v2358_v24 = vshll.u32 %v4858_v11, 16  ;;  %v4140_v26 = vld [vmem:[%s4305_s8 + $0x30] sm:$0xff]   ;;  %v4912_v58 = vld [vmem:[%s4305_s8 + $0x4c] sm:$0xf] }
  0x80   : > { %3938 = vmatmul.mubr.msk.bf16.gmra.mxu1 %vm525_vm3, %v3472_v34  ;;  %v2332_v23 = vrot.slane %v2331_v6, 4  ;;  %v2362_v29 = vshrl.u32 %v4858_v11, 16  ;;  %v2351_v33 = vrot.slane %v2349_v56, 4  ;;  %v2368_v39 = vshll.u32 %v4871_v16, 16  ;;  %v4918_v6 = vld [vmem:[%s4305_s8 + $0x50] sm:$0x1] }
  0x81   : > { %v2354_v36 = vrot.slane %v2352_v2, 5  ;;  %v2891_v3 = vsel %vm550_vm0, %v4139_v50, 0  ;;  %v2342_v40 = vrot.slane %v2341_v59, 4  ;;  %v2360_v30 = vrot.slane %v2358_v24, 5  ;;  %v3547_v2 = vld [vmem:[%s4305_s8 + $0x54] sm:$0xf] }
  0x82   : > { %v2337_v35 = vsel %vm4334_vm4, %v2332_v23, %v2336_v54  ;;  %v2364_v51 = vrot.slane %v2362_v29, 4  ;;  %v2370_v53 = vrot.slane %v2368_v39, 5  ;;  %v2373_v21 = vshrl.u32 %v3538_v22, 16 }
  0x83   : > { %v2355_v55 = vor.u32 %v2354_v36, %v2351_v33  ;;  %v2376_v43 = vshll.u32 %v3538_v22, 16  ;;  %v2347_v15 = vsel %vm4334_vm4, %v2342_v40, %v2346_v19  ;;  %v2382_v37 = vshll.u32 %v4879_v31, 16  ;;  %v4143_v40 = vld [vmem:[%s5340_s1 + $0x130] sm:$0xff]  }
  0x84   : > { %3912 = vmatmul.mubr.msk.bf16.gmra.mxu0 %vm525_vm3, %v3426_v8  ;;  %v2365_v0 = vor.u32 %v2364_v51, %v2360_v30  ;;  %v2386_v47 = vshrl.u32 %v4879_v31, 16  ;;  %v3565_v49 = vcombine.low %v2337_v35, %v2347_v15  ;;  %v2375_v50 = vrot.slane %v2373_v21, 4 }
  0x85   : > { %3951 = vmatprep.mubr.msk.bf16.mxu0 %vm525_vm3, %v4137_v38  ;;  %v2356_v20 = vrot.slane %v2355_v55, 4  ;;  %v2378_v57 = vrot.slane %v2376_v43, 5  ;;  %v2384_v48 = vrot.slane %v2382_v37, 5  ;;  %v2392_v27 = vshll.u32 %v4884_v41, 16  ;;  %v4142_v55 = vld [vmem:[%s4305_s8 + $0x3c] sm:$0xff]  }
  0x86   : > { %v2366_v17 = vrot.slane %v2365_v0, 4  ;;  %v2388_v62 = vrot.slane %v2386_v47, 4  ;;  %3977 = vmatprep.mubr.msk.bf16.mxu1 %vm525_vm3, %v3565_v49  ;;  %v2397_v1 = vshrl.u32 %v3541_v32, 16  ;;  %v2400_v7 = vshll.u32 %v3541_v32, 16  ;;  %v4944_v47 = vld [vmem:[%s4305_s8 + $0x5c] sm:$0x1] }
  0x87   : > { %v2361_v5 = vsel %vm4334_vm4, %v2356_v20, %v2360_v30  ;;  %v2379_v63 = vor.u32 %v2378_v57, %v2375_v50  ;;  %v2394_v28 = vrot.slane %v2392_v27, 5  ;;  %v2406_v4 = vshll.u32 %v4897_v60, 16 }
  0x88   : > { %v2371_v10 = vsel %vm4334_vm4, %v2366_v17, %v2370_v53  ;;  %v2389_v25 = vor.u32 %v2388_v62, %v2384_v48  ;;  %v2399_v13 = vrot.slane %v2397_v1, 4  ;;  %v2402_v34 = vrot.slane %v2400_v7, 5  ;;  %v4144_v17 = vld [vmem:[%s4305_s8 + $0x48] sm:$0xff]  }
  0x89   : > { %v3566_v18 = vcombine.low %v2361_v5, %v2371_v10  ;;  %v2380_v54 = vrot.slane %v2379_v63, 4  ;;  %v2408_v8 = vrot.slane %v2406_v4, 5  ;;  %v2410_v19 = vshrl.u32 %v4897_v60, 16 }
  0x8a   : > { %v2390_v52 = vrot.slane %v2389_v25, 4  ;;  %v2416_v56 = vshll.u32 %v4901_v46, 16  ;;  %v2403_v38 = vor.u32 %v2402_v34, %v2399_v13  ;;  %v2421_v23 = vshrl.u32 %v3544_v9, 16  ;;  %v3550_v25 = vld [vmem:[%s4305_s8 + $0x60] sm:$0xf] }
  0x8b   : > { %3978 = vmatmul.mubr.msk.bf16.vlgmr.msra.gmra.mxu1 %vm525_vm3, %v3566_v18  ;;  %v2385_v22 = vsel %vm4334_vm4, %v2380_v54, %v2384_v48  ;;  %v2424_v59 = vshll.u32 %v3544_v9, 16  ;;  %v2412_v29 = vrot.slane %v2410_v19, 4  ;;  %v2430_v36 = vshll.u32 %v4912_v58, 16 }
  0x8c   : > { %3952 = vmatmul.mubr.msk.bf16.vlgmr.msra.gmra.mxu0 %vm525_vm3, %v4138_v14  ;;  %4024 = vmatpush3.bf16.msra.mxu1 %v2891_v3  ;;  %v2395_v24 = vsel %vm4334_vm4, %v2390_v52, %v2394_v28  ;;  %v2418_v33 = vrot.slane %v2416_v56, 5  ;;  %v2404_v35 = vrot.slane %v2403_v38, 4  ;;  %v2423_v30 = vrot.slane %v2421_v23, 4  ;;  %v4957_v28 = vld [vmem:[%s4305_s8 + $0x64] sm:$0xf] }
  0x8d   : > { %3994 = vmatpush3.bf16.msra.mxu0 %v2891_v3  ;;  %3955 = vmatprep.mubr.msk.bf16.mxu0 %vm525_vm3, %v4140_v26  ;;  %v3567_v39 = vcombine.low %v2385_v22, %v2395_v24  ;;  %v2426_v51 = vrot.slane %v2424_v59, 5  ;;  %v4935_v3 = vld [vmem:[%s4305_s8 + $0x58] sm:$0xf]  ;;  %v2413_v53 = vor.u32 %v2412_v29, %v2408_v8  ;;  %v2432_v21 = vrot.slane %v2430_v36, 5  ;;  %v4146_v26 = vld [vmem:[%s5340_s1 + $0x128] sm:$0xff]   ;;  %v4149_v23 = vld [vmem:[%s5340_s1 + $0x120] sm:$0xff]  }
  0x8e   : > { %3995 = vmatprep.subr.bf16.mxu0 %v4141_v12  ;;  %4020 = vmatprep.subr.bf16.mxu1 %v4141_v12  ;;  %v2434_v43 = vshrl.u32 %v4912_v58, 16  ;;  %v2440_v15 = vshll.u32 %v4918_v6, 16  ;;  %v2409_v0 = vsel %vm4334_vm4, %v2404_v35, %v2408_v8  ;;  %v2445_v32 = vshrl.u32 %v3547_v2, 16  ;;  %v4965_v8 = vld [vmem:[%s4305_s8 + $0x68] sm:$0x1]  ;;  %v4145_v35 = vld [vmem:[%s4305_s8 + $0x54] sm:$0xff]  }
  0x8f   : > { %3981 = vmatprep.mubr.msk.bf16.mxu1 %vm525_vm3, %v3567_v39  ;;  %v2427_v37 = vor.u32 %v2426_v51, %v2423_v30  ;;  %v2448_v49 = vshll.u32 %v3547_v2, 16  ;;  %v2414_v14 = vrot.slane %v2413_v53, 4  ;;  %v2454_v57 = vshll.u32 %v4935_v3, 16  ;;  %v3553_v38 = vld [vmem:[%s4305_s8 + $0x6c] sm:$0xf]  ;;  %v4147_v51 = vld [vmem:[%s4305_s8 + $0x60] sm:$0xff]  }
  0x90   : > { %4025 = vmatpush3.bf16.msra.mxu1 %v4141_v12  ;;  %v2436_v20 = vrot.slane %v2434_v43, 4  ;;  %v2442_v50 = vrot.slane %v2440_v15, 5  ;;  %v2447_v62 = vrot.slane %v2445_v32, 4  ;;  %v2458_v5 = vshrl.u32 %v4935_v3, 16  ;;  %v4982_v36 = vld [vmem:[%s4305_s8 + $0x70] sm:$0xf] }
  0x91   : > { %3996 = vmatpush3.bf16.msra.mxu0 %v4141_v12  ;;  %4021 = vmatprep.subr.bf16.mxu1 %v4143_v40  ;;  %v2428_v48 = vrot.slane %v2427_v37, 4  ;;  %v2450_v27 = vrot.slane %v2448_v49, 5  ;;  %v2419_v63 = vsel %vm4334_vm4, %v2414_v14, %v2418_v33  ;;  %v2456_v7 = vrot.slane %v2454_v57, 5 }
  0x92   : > { %3997 = vmatprep.subr.bf16.mxu0 %v4143_v40  ;;  %v2437_v1 = vor.u32 %v2436_v20, %v2432_v21  ;;  %v2464_v10 = vshll.u32 %v4944_v47, 16  ;;  %v3568_v4 = vcombine.low %v2409_v0, %v2419_v63  ;;  %v2460_v54 = vrot.slane %v2458_v5, 4  ;;  %v4990_v0 = vld [vmem:[%s4305_s8 + $0x74] sm:$0x1]  ;;  %v3586_v20 = vld [vmem:[%s4305_s8 + $0x18] sm:$0xe] }
  0x93   : > { %v2433_v9 = vsel %vm4334_vm4, %v2428_v48, %v2432_v21  ;;  %v2451_v18 = vor.u32 %v2450_v27, %v2447_v62  ;;  %v2786_v34 = vrot.slane %v4935_v3, 5  ;;  %v2789_v52 = vrot.slane %v4944_v47, 5  ;;  %v3590_v63 = vld [vmem:[%s4305_s8 + $0x48] sm:$0xe] }
  0x94   : > { %3956 = vmatmul.mubr.msk.bf16.gmra.mxu0 %vm525_vm3, %v4142_v55  ;;  %4026 = vmatpush3.bf16.msra.mxu1 %v4143_v40  ;;  %v2438_v12 = vrot.slane %v2437_v1, 4  ;;  %v2466_v13 = vrot.slane %v2464_v10, 5  ;;  %v2461_v56 = vor.u32 %v2460_v54, %v2456_v7  ;;  %v2469_v2 = vshrl.u32 %v3550_v25, 16 }
  0x95   : > { %3998 = vmatpush3.bf16.msra.mxu0 %v4143_v40  ;;  %3982 = vmatmul.mubr.msk.bf16.gmra.mxu1 %vm525_vm3, %v3568_v4  ;;  %v2452_v19 = vrot.slane %v2451_v18, 4  ;;  %v2472_v22 = vshll.u32 %v3550_v25, 16  ;;  %v4977_v24 = vrot.slane %v2786_v34, 4  ;;  %v2478_v29 = vshll.u32 %v4957_v28, 16 }
  0x96   : > { %3959 = vmatprep.mubr.msk.bf16.mxu0 %vm525_vm3, %v4144_v17  ;;  %v2443_v59 = vsel %vm4334_vm4, %v2438_v12, %v2442_v50  ;;  %3999 = vmatprep.subr.bf16.mxu0 %v4146_v26  ;;  %v2482_v33 = vshrl.u32 %v4957_v28, 16  ;;  %v2462_v30 = vrot.slane %v2461_v56, 4  ;;  %v2471_v55 = vrot.slane %v2469_v2, 4  ;;  %v3587_v12 = vld [vmem:[%s4305_s8 + $0x24] sm:$0xe] }
  0x97   : > { %4022 = vmatprep.subr.bf16.mxu1 %v4146_v26  ;;  %v3569_v39 = vcombine.low %v2433_v9, %v2443_v59  ;;  %v2457_v40 = vsel %vm4334_vm4, %v2452_v19, %v2456_v7  ;;  %v2474_v53 = vrot.slane %v2472_v22, 5  ;;  %v2480_v21 = vrot.slane %v2478_v29, 5 }
  0x98   : > { %4027 = vmatpush3.bf16.msra.mxu1 %v4146_v26  ;;  %v2484_v43 = vrot.slane %v2482_v33, 4  ;;  %v2488_v15 = vshll.u32 %v4965_v8, 16  ;;  %v2467_v37 = vsel %vm4334_vm4, %v2462_v30, %v2466_v13  ;;  %v2493_v32 = vshrl.u32 %v3553_v38, 16  ;;  %v3591_v33 = vld [vmem:[%s4305_s8 + $0x54] sm:$0xe] }
  0x99   : > { %4000 = vmatpush3.bf16.msra.mxu0 %v4146_v26  ;;  %3985 = vmatprep.mubr.msk.bf16.mxu1 %vm525_vm3, %v3569_v39  ;;  %v2496_v49 = vshll.u32 %v3553_v38, 16  ;;  %v2502_v14 = vshll.u32 %v4982_v36, 16  ;;  %v3570_v50 = vcombine.low %v2457_v40, %v2467_v37  ;;  %v2475_v57 = vor.u32 %v2474_v53, %v2471_v55  ;;  %v4148_v38 = vld [vmem:[%s4305_s8 + $0x6c] sm:$0xff]  }
  0x9a   : > { %4001 = vmatprep.subr.bf16.mxu0 %v4149_v23  ;;  %v2485_v17 = vor.u32 %v2484_v43, %v2480_v21  ;;  %v2490_v48 = vrot.slane %v2488_v15, 5  ;;  %4023 = vmatprep.subr.bf16.mxu1 %v4149_v23  ;;  %v2495_v62 = vrot.slane %v2493_v32, 4  ;;  %v2506_v26 = vshrl.u32 %v4982_v36, 16  ;;  %v3588_v43 = vld [vmem:[%s4305_s8 + $0x30] sm:$0xe] }
  0x9b   : > { %v2498_v27 = vrot.slane %v2496_v49, 5  ;;  %v2504_v5 = vrot.slane %v2502_v14, 5  ;;  %v2476_v1 = vrot.slane %v2475_v57, 4  ;;  %v2512_v10 = vshll.u32 %v4990_v0, 16 }
  0x9c   : > { %3960 = vmatmul.mubr.msk.bf16.gmra.mxu0 %vm525_vm3, %v4145_v35  ;;  %v2486_v7 = vrot.slane %v2485_v17, 4  ;;  %v3594_v25 = vrot.slane %v3586_v20, 9  ;;  %v2508_v9 = vrot.slane %v2506_v26, 4  ;;  %v2751_v18 = vrot.slane %v4836_v44, 5  ;;  %4028 = vmatpush3.bf16.msra.mxu1 %v4149_v23  ;;  %v3589_v17 = vld [vmem:[%s4305_s8 + $0x3c] sm:$0xe] }
  0x9d   : > { %3963 = vmatprep.mubr.msk.bf16.mxu0 %vm525_vm3, %v4147_v51  ;;  %4002 = vmatpush3.bf16.msra.mxu0 %v4149_v23  ;;  %v2499_v4 = vor.u32 %v2498_v27, %v2495_v62  ;;  %v2754_v54 = vrot.slane %v4847_v61, 5  ;;  %v2481_v13 = vsel %vm4334_vm4, %v2476_v1, %v2480_v21  ;;  %v2514_v56 = vrot.slane %v2512_v10, 5 }
  0x9e   : > { %3986 = vmatmul.mubr.msk.bf16.gmra.mxu1 %vm525_vm3, %v3570_v50  ;;  %v2491_v19 = vsel %vm4334_vm4, %v2486_v7, %v2490_v48  ;;  %v3598_v2 = vrot.slane %v3590_v63, 9  ;;  %v2509_v29 = vor.u32 %v2508_v9, %v2504_v5  ;;  %v2752_v44 = vsel %vm4500_vm7, %v3594_v25, %v2751_v18 }
  0x9f   : > { %v3571_v22 = vcombine.low %v2481_v13, %v2491_v19  ;;  %v2500_v59 = vrot.slane %v2499_v4, 4  ;;  %v2753_v61 = vrot.slane %v2751_v18, 4  ;;  %v2779_v39 = vrot.slane %v4912_v58, 5 }
  0xa0   : > { %v2782_v35 = vrot.slane %v4918_v6, 5  ;;  %v3595_v40 = vrot.slane %v3587_v12, 9  ;;  %v2510_v30 = vrot.slane %v2509_v29, 4  ;;  %v2758_v51 = vrot.slane %v4858_v11, 5  ;;  %v3592_v11 = vld [vmem:[%s4305_s8 + $0x60] sm:$0xe] }
  0xa1   : > { %3989 = vmatprep.mubr.msk.bf16.mxu1 %vm525_vm3, %v3571_v22  ;;  %v2505_v23 = vsel %vm4334_vm4, %v2500_v59, %v2504_v5  ;;  %v2761_v55 = vrot.slane %v4871_v16, 5  ;;  %v2755_v53 = vsel %vm4500_vm7, %v2753_v61, %v2754_v54  ;;  %v2780_v58 = vsel %vm4500_vm7, %v3598_v2, %v2779_v39 }
  0xa2   : > { %v2781_v21 = vrot.slane %v2779_v39, 4  ;;  %v3599_v6 = vrot.slane %v3591_v33, 9  ;;  %v2515_v15 = vsel %vm4334_vm4, %v2510_v30, %v2514_v56  ;;  %v3611_v37 = vcombine.low %v2752_v44, %v2755_v53 }
  0xa3   : > { %v2760_v32 = vrot.slane %v2758_v51, 4  ;;  %v3572_v49 = vcombine.low %v2505_v23, %v2515_v15  ;;  %v2759_v14 = vsel %vm4500_vm7, %v3595_v40, %v2758_v51  ;;  %v3596_v57 = vrot.slane %v3588_v43, 9 }
  0xa4   : > { %3964 = vmatmul.mubr.msk.bf16.gmra.mxu0 %vm525_vm3, %v4148_v38  ;;  %v2783_v16 = vsel %vm4500_vm7, %v2781_v21, %v2782_v35  ;;  %v2787_v42 = vsel %vm4500_vm7, %v3599_v6, %v2786_v34  ;;  %v2790_v48 = vsel %vm4500_vm7, %v4977_v24, %v2789_v52  ;;  %v2765_v62 = vrot.slane %v4879_v31, 5  ;;  %v3593_v31 = vld [vmem:[%s4305_s8 + $0x6c] sm:$0xe]  ;;  %s3248_s8 = sshll.u32 %s4172_s15, 4 }
  0xa5   : > { %4003 = vmatprep.mubr.msk.bf16.mxu0 %vm525_vm3, %v3611_v37  ;;  %v3615_v20 = vcombine.low %v2780_v58, %v2783_v16  ;;  %v2762_v50 = vsel %vm4500_vm7, %v2760_v32, %v2761_v55  ;;  %v2768_v27 = vrot.slane %v4884_v41, 5  ;;  %v3600_v5 = vrot.slane %v3592_v11, 9  ;;  %p5198_p7 = scmp.lt.s32.totalorder %s3248_s8, 31 }
  0xa6   : > { %3990 = vmatmul.mubr.msk.bf16.gmra.mxu1 %vm525_vm3, %v3572_v49  ;;  %v3612_v3 = vcombine.low %v2759_v14, %v2762_v50  ;;  %v2793_v34 = vrot.slane %v4957_v28, 5  ;;  %v2796_v26 = vrot.slane %v4965_v8, 5  ;;  %v2772_v63 = vrot.slane %v4897_v60, 5 }
  0xa7   : > { %4011 = vmatprep.mubr.msk.bf16.mxu1 %vm525_vm3, %v3615_v20  ;;  %v2766_v47 = vsel %vm4500_vm7, %v3596_v57, %v2765_v62  ;;  %v2767_v1 = vrot.slane %v2765_v62, 4  ;;  %v3597_v7 = vrot.slane %v3589_v17, 9  ;;  %v2775_v52 = vrot.slane %v4901_v46, 5  ;;  %s5390_s8 = smov (!%p5198_p7, %s3248_s8), 31 }
  0xa8   : > { %v2794_v41 = vsel %vm4500_vm7, %v3600_v5, %v2793_v34  ;;  %v2795_v24 = vrot.slane %v2793_v34, 4  ;;  %v2774_v10 = vrot.slane %v2772_v63, 4  ;;  %v3616_v25 = vcombine.low %v2787_v42, %v2790_v48  ;;  %s5232_s15 = sadd.s32 %s3249_s29, %s5390_s8 }
  0xa9   : > { %v2769_v28 = vsel %vm4500_vm7, %v2767_v1, %v2768_v27  ;;  %v2800_v8 = vrot.slane %v4982_v36, 5  ;;  %v3601_v9 = vrot.slane %v3593_v31, 9  ;;  %v2803_v46 = vrot.slane %v4990_v0, 5  ;;  %s3250_s7 = sshll.u32 %s5232_s15, 2 }
  0xaa   : > { %v3613_v60 = vcombine.low %v2766_v47, %v2769_v28  ;;  %v2797_v4 = vsel %vm4500_vm7, %v2795_v24, %v2796_v26  ;;  %v2773_v54 = vsel %vm4500_vm7, %v3597_v7, %v2772_v63  ;;  %v2776_v12 = vsel %vm4500_vm7, %v2774_v10, %v2775_v52  ;;  %s5259_s11 = scalar_lea.vmem %s5343_s4, %s3250_s7 }
  0xab   : > { %v3617_v18 = vcombine.low %v2794_v41, %v2797_v4  ;;  %v2802_v13 = vrot.slane %v2800_v8, 4  ;;  %v3614_v36 = vcombine.low %v2773_v54, %v2776_v12  ;;  %v2801_v19 = vsel %vm4500_vm7, %v3601_v9, %v2800_v8 }
  0xac   : > { %4004 = vmatmul.mubr.msk.bf16.vlgmr.msra.gmra.mxu0 %vm525_vm3, %v3612_v3 }
  0xad   : > { %4007 = vmatprep.mubr.msk.bf16.mxu0 %vm525_vm3, %v3613_v60  ;;  %v2804_v0 = vsel %vm4500_vm7, %v2802_v13, %v2803_v46 }
  0xae   : > { %4012 = vmatmul.mubr.msk.bf16.vlgmr.msra.gmra.mxu1 %vm525_vm3, %v3616_v25  ;;  %v3618_v56 = vcombine.low %v2801_v19, %v2804_v0 }
  0xaf   : > { %4015 = vmatprep.mubr.msk.bf16.mxu1 %vm525_vm3, %v3617_v18 }
  0xb4   : > { %4008 = vmatmul.mubr.msk.bf16.gmra.mxu0 %vm525_vm3, %v3614_v36 }
  0xb6   : > { %4016 = vmatmul.mubr.msk.bf16.gmra.mxu1 %vm525_vm3, %v3618_v56 }
  0xe4   : > { %v3823_v2 = vpop.f32.mrf.mxu1 }
  0xe6   : > { %v779_v22 = vpop.f32.mrf.mxu1 }
  0xe8   : > { %v3824_v38 = vpop.f32.mrf.mxu1  ;;  %v3797_v59 = vpop.f32.mrf.mxu0 }
  0xe9   : > { %v788_v44 = vadd.f32 %v3823_v2, %v3797_v59 }
  0xea   : > { %v782_v29 = vpop.f32.mrf.mxu1  ;;  %v588_v33 = vpop.f32.mrf.mxu0 }
  0xeb   : > { %v780_v39 = vadd.f32 %v779_v22, %v588_v33 }
  0xec   : > { %v3827_v61 = vpop.f32.mrf.mxu1  ;;  %v3798_v35 = vpop.f32.mrf.mxu0 }
  0xed   : > { %v791_v23 = vadd.f32 %v3824_v38, %v3798_v35 }
  0xee   : > { %v795_v40 = vpop.f32.mrf.mxu1  ;;  %v591_v30 = vpop.f32.mrf.mxu0 }
  0xef   : > { %v783_v51 = vadd.f32 %v782_v29, %v591_v30 }
  0xf0   : > { %v3828_v45 = vpop.f32.mrf.mxu1 }
  0xf2   : > { %v798_v55 = vpop.f32.mrf.mxu1  ;;  %v3801_v53 = vpop.f32.mrf.mxu0 }
  0xf3   : > { %v804_v58 = vadd.f32 %v3827_v61, %v3801_v53 }
  0xf4   : > { %v604_v21 = vpop.f32.mrf.mxu0  ;;  %v3831_v6 = vpop.f32.mrf.mxu1 }
  0xf5   : > { %v796_v43 = vadd.f32 %v795_v40, %v604_v21 }
  0xf6   : > { %v3802_v15 = vpop.f32.mrf.mxu0  ;;  %v811_v37 = vpop.f32.mrf.mxu1 }
  0xf7   : > { %v807_v32 = vadd.f32 %v3828_v45, %v3802_v15 }
  0xf8   : > { %v607_v11 = vpop.f32.mrf.mxu0  ;;  %v3832_v49 = vpop.f32.mrf.mxu1 }
  0xf9   : > { %v799_v16 = vadd.f32 %v798_v55, %v607_v11 }
  0xfa   : > { %v3805_v14 = vpop.f32.mrf.mxu0  ;;  %v814_v20 = vpop.f32.mrf.mxu1 }
  0xfb   : > { %v820_v50 = vadd.f32 %v3831_v6, %v3805_v14 }
  0xfc   : > { %v620_v42 = vpop.f32.mrf.mxu0  ;;  %v3835_v57 = vpop.f32.mrf.mxu1 }
  0xfd   : > { %v812_v17 = vadd.f32 %v811_v37, %v620_v42 }
  0xfe   : > { %v3806_v48 = vpop.f32.mrf.mxu0  ;;  %v827_v62 = vpop.f32.mrf.mxu1 }
  0xff   : > { %v823_v27 = vadd.f32 %v3832_v49, %v3806_v48 }
 0x100   : > { %v623_v5 = vpop.f32.mrf.mxu0  ;;  %v3836_v3 = vpop.f32.mrf.mxu1 }
 0x101   : > { %v815_v34 = vadd.f32 %v814_v20, %v623_v5 }
 0x102   : > { %v830_v26 = vpop.f32.mrf.mxu1 }
 0x104   : > { %v3809_v63 = vpop.f32.mrf.mxu0  ;;  %v3875_v47 = vpop.f32.mrf.mxu1 }
 0x105   : > { %v836_v1 = vadd.f32 %v3835_v57, %v3809_v63 }
 0x106   : > { %v636_v7 = vpop.f32.mrf.mxu0  ;;  %v1281_v52 = vpop.f32.mrf.mxu1 }
 0x107   : > { %v828_v31 = vadd.f32 %v827_v62, %v636_v7 }
 0x108   : > { %v3810_v41 = vpop.f32.mrf.mxu0  ;;  %v3876_v24 = vpop.f32.mrf.mxu1 }
 0x109   : > { %v839_v10 = vadd.f32 %v3836_v3, %v3810_v41 }
 0x10a   : > { %v639_v25 = vpop.f32.mrf.mxu0  ;;  %v1284_v28 = vpop.f32.mrf.mxu1 }
 0x10b   : > { %v5080_v8 = vadd.f32 %v830_v26, %v639_v25 }
 0x10c   : > { %v3849_v60 = vpop.f32.mrf.mxu0  ;;  %v3879_v4 = vpop.f32.mrf.mxu1 }
 0x10d   : > { %v1112_v9 = vadd.f32 %v3849_v60, %v788_v44 }
 0x10e   : > { %v1047_v46 = vpop.f32.mrf.mxu0  ;;  %v1297_v18 = vpop.f32.mrf.mxu1 }
 0x10f   : > { %v5082_v54 = vadd.f32 %v3875_v47, %v1112_v9  ;;  %v1110_v12 = vadd.f32 %v1047_v46, %v780_v39 }
 0x110   : > { %v3850_v13 = vpop.f32.mrf.mxu0  ;;  %v3880_v36 = vpop.f32.mrf.mxu1 }
 0x111   : > { %v5084_v19 = vadd.f32 %v1281_v52, %v1110_v12  ;;  %v1113_v0 = vadd.f32 %v3850_v13, %v791_v23 }
 0x112   : > { %v1050_v56 = vpop.f32.mrf.mxu0  ;;  %v1300_v2 = vpop.f32.mrf.mxu1 }
 0x113   : > { %v5086_v22 = vadd.f32 %v3876_v24, %v1113_v0  ;;  %v1111_v38 = vadd.f32 %v1050_v56, %v783_v51 }
 0x114   : > { %v3853_v59 = vpop.f32.mrf.mxu0  ;;  %v3883_v29 = vpop.f32.mrf.mxu1 }
 0x115   : > { %v5088_v33 = vadd.f32 %v1284_v28, %v1111_v38  ;;  %v1116_v44 = vadd.f32 %v3853_v59, %v804_v58 }
 0x116   : > { %v1063_v61 = vpop.f32.mrf.mxu0  ;;  %v1313_v35 = vpop.f32.mrf.mxu1 }
 0x117   : > { %v5090_v40 = vadd.f32 %v3879_v4, %v1116_v44  ;;  %v1114_v39 = vadd.f32 %v1063_v61, %v796_v43 }
 0x118   : > { %v3854_v30 = vpop.f32.mrf.mxu0  ;;  %v3884_v45 = vpop.f32.mrf.mxu1 }
 0x119   : > { %v5092_v55 = vadd.f32 %v1297_v18, %v1114_v39  ;;  %v1117_v23 = vadd.f32 %v3854_v30, %v807_v32 }
 0x11a   : > { %v1066_v53 = vpop.f32.mrf.mxu0  ;;  %v1316_v21 = vpop.f32.mrf.mxu1 }
 0x11b   : > { %v5094_v6 = vadd.f32 %v3880_v36, %v1117_v23  ;;  %v1115_v51 = vadd.f32 %v1066_v53, %v799_v16 }
 0x11c   : > { %v3857_v15 = vpop.f32.mrf.mxu0  ;;  %v3887_v37 = vpop.f32.mrf.mxu1 }
 0x11d   : > { %v5096_v11 = vadd.f32 %v1300_v2, %v1115_v51  ;;  %v1120_v58 = vadd.f32 %v3857_v15, %v820_v50 }
 0x11e   : > { %v1079_v49 = vpop.f32.mrf.mxu0  ;;  %v1329_v14 = vpop.f32.mrf.mxu1 }
 0x11f   : > { %v5098_v20 = vadd.f32 %v3883_v29, %v1120_v58  ;;  %v1118_v43 = vadd.f32 %v1079_v49, %v812_v17 }
 0x120   : > { %v3858_v42 = vpop.f32.mrf.mxu0  ;;  %v3888_v57 = vpop.f32.mrf.mxu1 }
 0x121   : > { %v5100_v48 = vadd.f32 %v1313_v35, %v1118_v43  ;;  %v1121_v32 = vadd.f32 %v3858_v42, %v823_v27 }
 0x122   : > { %v1082_v62 = vpop.f32.mrf.mxu0  ;;  %v1332_v5 = vpop.f32.mrf.mxu1 }
 0x123   : > { %v5102_v3 = vadd.f32 %v3884_v45, %v1121_v32  ;;  %v1119_v16 = vadd.f32 %v1082_v62, %v815_v34 }
 0x124   : > { %v3861_v26 = vpop.f32.mrf.mxu0  ;;  %v5104_v63 = vpop.f32.mrf.mxu1 }
 0x125   : > { %v5106_v47 = vadd.f32 %v1316_v21, %v1119_v16  ;;  %v1124_v50 = vadd.f32 %v3861_v26, %v836_v1 }
 0x126   : > { %v1095_v7 = vpop.f32.mrf.mxu0  ;;  %v5108_v52 = vpop.f32.mrf.mxu1 }
 0x127   : > { %v5110_v17 = vadd.f32 %v3887_v37, %v1124_v50  ;;  %v1122_v41 = vadd.f32 %v1095_v7, %v828_v31 }
 0x128   : > { %v3862_v24 = vpop.f32.mrf.mxu0  ;;  %v5112_v25 = vpop.f32.mrf.mxu1 }
 0x129   : > { %v5114_v27 = vadd.f32 %v1329_v14, %v1122_v41  ;;  %v1125_v28 = vadd.f32 %v3862_v24, %v839_v10 }
 0x12a   : > { %v1098_v60 = vpop.f32.mrf.mxu0  ;;  %v5116_v34 = vpop.f32.mrf.mxu1 }
 0x12b   : > { %v5118_v4 = vadd.f32 %v3888_v57, %v1125_v28  ;;  %v1123_v9 = vadd.f32 %v1098_v60, %v5080_v8 }
 0x12c   : > { %v3901_v1 = vpop.f32.mrf.mxu0  ;;  %v5121_v46 = vpop.f32.mrf.mxu1 }
 0x12d   : > { %v5123_v18 = vadd.f32 %v1332_v5, %v1123_v9 }
 0x12e   : > { %v1698_v12 = vpop.f32.mrf.mxu0  ;;  %v5125_v31 = vpop.f32.mrf.mxu1 }
 0x130   : > { %v3902_v13 = vpop.f32.mrf.mxu0  ;;  %v5127_v36 = vpop.f32.mrf.mxu1 }
 0x132   : > { %v1701_v0 = vpop.f32.mrf.mxu0  ;;  %v5129_v10 = vpop.f32.mrf.mxu1 }
 0x134   : > { %v3905_v56 = vpop.f32.mrf.mxu0  ;;  %v5131_v38 = vpop.f32.mrf.mxu1 }
 0x136   : > { %v1714_v2 = vpop.f32.mrf.mxu0  ;;  %v5133_v8 = vpop.f32.mrf.mxu1 }
 0x138   : > { %v3906_v59 = vpop.f32.mrf.mxu0  ;;  %v5135_v44 = vpop.f32.mrf.mxu1 }
 0x13a   : > { %v1717_v29 = vpop.f32.mrf.mxu0  ;;  %v5137_v35 = vpop.f32.mrf.mxu1 }
 0x13b   : > { %5348 = vst [vmem:[#allocation2_spill] sm:$0xff] %v5137_v35 }
 0x13c   : > { %v3909_v61 = vpop.f32.mrf.mxu0 }
 0x13e   : > { %v1730_v39 = vpop.f32.mrf.mxu0 }
 0x140   : > { %v3910_v30 = vpop.f32.mrf.mxu0  ;;  %v5139_v45 = vpop.f32.mrf.mxu1 }
 0x141   : > { %5349 = vst [vmem:[#allocation3_spill] sm:$0xff] %v5139_v45  ;;  %v1768_v45 = vadd.f32 %v3906_v59, %v5094_v6  ;;  %v1772_v6 = vadd.f32 %v3910_v30, %v5102_v3 }
 0x142   : > { %v1733_v23 = vpop.f32.mrf.mxu0  ;;  %v5141_v53 = vpop.f32.mrf.mxu1 }
 0x143   : > { %5350 = vst [vmem:[#allocation4_spill] sm:$0xff] %v5141_v53 }
 0x144   : > { %v3913_v21 = vpop.f32.mrf.mxu0  ;;  %v5143_v51 = vpop.f32.mrf.mxu1 }
 0x145   : > { %5351 = vst [vmem:[#allocation5_spill] sm:$0xff] %v5143_v51  ;;  %v1762_v51 = vadd.f32 %v1701_v0, %v5088_v33  ;;  %v1771_v33 = vadd.f32 %v3909_v61, %v5098_v20  ;;  %v1775_v20 = vadd.f32 %v3913_v21, %v5110_v17  ;;  %v2057_v0 = vadd.f32 %v5127_v36, %v1768_v45 }
 0x146   : > { %v1746_v15 = vpop.f32.mrf.mxu0  ;;  %v5145_v58 = vpop.f32.mrf.mxu1  ;;  %v2061_v36 = vadd.f32 %v5135_v44, %v1772_v6 }
 0x147   : > { %5352 = vst [vmem:[#allocation6_spill] sm:$0xff] %v5145_v58 }
 0x148   : > { %v3914_v37 = vpop.f32.mrf.mxu0 }
 0x14a   : > { %v1749_v49 = vpop.f32.mrf.mxu0 }
 0x14b   : > { %v5147_v43 = vpop.f32.mrf.mxu1  ;;  %v1774_v3 = vadd.f32 %v1749_v49, %v5123_v18 }
 0x14c   : > { %v3953_v14 = vpop.f32.mrf.mxu0  ;;  %5353 = vst [vmem:[#allocation7_spill] sm:$0xff] %v5147_v43 }
 0x14d   : > { %v5149_v57 = vpop.f32.mrf.mxu1 }
 0x14e   : > { %v2221_v42 = vpop.f32.mrf.mxu0  ;;  %5354 = vst [vmem:[#allocation8_spill] sm:$0xff] %v5149_v57 }
 0x14f   : > { %v5151_v62 = vpop.f32.mrf.mxu1 }
 0x150   : > { %v3954_v32 = vpop.f32.mrf.mxu0  ;;  %5355 = vst [vmem:[#allocation9_spill] sm:$0xff] %v5151_v62  ;;  %v1763_v62 = vadd.f32 %v3901_v1, %v5082_v54  ;;  %v1769_v1 = vadd.f32 %v1730_v39, %v5100_v48  ;;  %v1773_v48 = vadd.f32 %v1746_v15, %v5114_v27  ;;  %v5365_v39 = vld [vmem:[#allocation4_spill] sm:$0xff] }
 0x151   : > { %v5153_v16 = vpop.f32.mrf.mxu1 }
 0x152   : > { %v2224_v5 = vpop.f32.mrf.mxu0  ;;  %5356 = vst [vmem:[#allocation10_spill] sm:$0xff] %v5153_v16  ;;  %v1761_v16 = vadd.f32 %v1698_v12, %v5084_v19  ;;  %v2052_v19 = vadd.f32 %v5104_v63, %v1763_v62  ;;  %v2058_v17 = vadd.f32 %v5133_v8, %v1769_v1  ;;  %v2062_v30 = vadd.f32 %v5365_v39, %v1773_v48 }
 0x154   : > { %v3957_v26 = vpop.f32.mrf.mxu0 }
 0x155   : > { %v5155_v50 = vpop.f32.mrf.mxu1 }
 0x156   : > { %5357 = vst [vmem:[#allocation11_spill] sm:$0xff] %v5155_v50  ;;  %v2237_v7 = vpop.f32.mrf.mxu0  ;;  %v1764_v50 = vadd.f32 %v3902_v13, %v5086_v22  ;;  %v2050_v22 = vadd.f32 %v5108_v52, %v1761_v16 }
 0x157   : > { %v5157_v41 = vpop.f32.mrf.mxu1 }
 0x158   : > { %5358 = vst [vmem:[#allocation12_spill] sm:$0xff] %v5157_v41  ;;  %v3958_v24 = vpop.f32.mrf.mxu0  ;;  %v2284_v27 = vadd.f32 %v2221_v42, %v2050_v22 }
 0x159   : > { %v5159_v28 = vpop.f32.mrf.mxu1 }
 0x15a   : > { %5359 = vst [vmem:[#allocation13_spill] sm:$0xff] %v5159_v28  ;;  %v2240_v60 = vpop.f32.mrf.mxu0  ;;  %v1767_v28 = vadd.f32 %v3905_v56, %v5090_v40  ;;  %v2053_v40 = vadd.f32 %v5112_v25, %v1764_v50 }
 0x15b   : > { %v5161_v9 = vpop.f32.mrf.mxu1 }
 0x15c   : > { %5360 = vst [vmem:[#allocation14_spill] sm:$0xff] %v5161_v9  ;;  %v3961_v43 = vpop.f32.mrf.mxu0  ;;  %v1765_v9 = vadd.f32 %v1714_v2, %v5092_v55  ;;  %v2051_v55 = vadd.f32 %v5116_v34, %v1762_v51  ;;  %v2056_v63 = vadd.f32 %v5121_v46, %v1767_v28  ;;  %v1776_v34 = vadd.f32 %v3914_v37, %v5118_v4  ;;  %v5363_v4 = vld [vmem:[#allocation2_spill] sm:$0xff] }
 0x15d   : > { %v2060_v46 = vadd.f32 %v5131_v38, %v1771_v33  ;;  %v2287_v18 = vadd.f32 %v3954_v32, %v2053_v40  ;;  %v5367_v51 = vld [vmem:[#allocation6_spill] sm:$0xff]  ;;  %v2291_v37 = vadd.f32 %v3958_v24, %v2057_v0  ;;  %v5372_v22 = vld [vmem:[#allocation11_spill] sm:$0xff] }
 0x15e   : > { %v5163_v57 = vpop.f32.mrf.mxu1  ;;  %v2253_v58 = vpop.f32.mrf.mxu0  ;;  %v2054_v52 = vadd.f32 %v5125_v31, %v1765_v9  ;;  %v2286_v31 = vadd.f32 %v3953_v14, %v2052_v19  ;;  %v2285_v2 = vadd.f32 %v2224_v5, %v2051_v55  ;;  %v2290_v38 = vadd.f32 %v3957_v26, %v2056_v63  ;;  %v5368_v14 = vld [vmem:[#allocation7_spill] sm:$0xff]  ;;  %v5370_v26 = vld [vmem:[#allocation9_spill] sm:$0xff] }
 0x15f   : > { %5361 = vst [vmem:[#allocation15_spill] sm:$0xff] %v5163_v57  ;;  %v1766_v57 = vadd.f32 %v1717_v29, %v5096_v11  ;;  %v1770_v11 = vadd.f32 %v1733_v23, %v5106_v47  ;;  %v5364_v29 = vld [vmem:[#allocation3_spill] sm:$0xff]  ;;  %v5366_v23 = vld [vmem:[#allocation5_spill] sm:$0xff]  ;;  %v2063_v15 = vadd.f32 %v5367_v51, %v1774_v3  ;;  %v2294_v49 = vadd.f32 %v3961_v43, %v2060_v46  ;;  %v5222_v43 = vld [vmem:[%s5341_s2] ss:$0 sm:$0xff] }
 0x160   : > { %v5169_v41 = vpop.f32.mrf.mxu1  ;;  %v3962_v53 = vpop.f32.mrf.mxu0  ;;  %v2064_v61 = vadd.f32 %v5364_v29, %v1775_v20  ;;  %v2288_v45 = vadd.f32 %v2237_v7, %v2054_v52  ;;  %v2065_v21 = vadd.f32 %v5366_v23, %v1776_v34  ;;  %v2703_v42 = vadd.f32 %v5368_v14, %v2286_v31  ;;  %v5371_v7 = vld [vmem:[#allocation10_spill] sm:$0xff]  ;;  %v5373_v1 = vld [vmem:[#allocation12_spill] sm:$0xff] }
 0x161   : > { %v2055_v25 = vadd.f32 %v5129_v10, %v1766_v57  ;;  %v2059_v10 = vadd.f32 %v5363_v4, %v1770_v11  ;;  %v5369_v57 = vld [vmem:[#allocation8_spill] sm:$0xff]  ;;  %v2292_v5 = vadd.f32 %v2253_v58, %v2058_v17  ;;  %v2704_v50 = vadd.f32 %v5370_v26, %v2287_v18  ;;  %v5374_v6 = vld [vmem:[#allocation13_spill] sm:$0xff]  ;;  %v5237_v20 = vld [vmem:[%s5342_s3] ss:$0 sm:$0xff] }
 0x162   : > { %v5175_v35 = vpop.f32.mrf.mxu1  ;;  %v2256_v54 = vpop.f32.mrf.mxu0  ;;  %v2701_v32 = vadd.f32 %v5369_v57, %v2284_v27  ;;  %v2702_v28 = vadd.f32 %v5371_v7, %v2285_v2  ;;  %v2295_v9 = vadd.f32 %v3962_v53, %v2061_v36  ;;  %v2707_v33 = vadd.f32 %v5372_v22, %v2290_v38 }
 0x163   : > { %v2289_v62 = vadd.f32 %v2240_v60, %v2055_v25  ;;  %v2293_v19 = vadd.f32 %v2256_v54, %v2059_v10  ;;  %v5226_v60 = vadd.f32 %v5373_v1, %v2288_v45  ;;  %v5229_v11 = vadd.f32 %v5374_v6, %v2291_v37  ;;  %v5376_v0 = vld [vmem:[#allocation14_spill] sm:$0xff] }
 0x164   : > { %v5186_v12 = vpop.f32.mrf.mxu1  ;;  %v3965_v13 = vpop.f32.mrf.mxu0  ;;  %v2709_v25 = vadd.f32 %v5169_v41, %v2292_v5 }
 0x165   : > { %v2298_v58 = vadd.f32 %v3965_v13, %v2064_v61  ;;  %v5240_v13 = vadd.f32 %v5376_v0, %v2289_v62  ;;  %v2710_v17 = vadd.f32 %v5186_v12, %v2293_v19 }
 0x166   : > { %v2269_v47 = vpop.f32.mrf.mxu0  ;;  %v3991_v56 = vpop.f32.mrf.mxu1  ;;  %v5375_v53 = vld [vmem:[#allocation15_spill] sm:$0xff] }
 0x167   : > { %v2711_v54 = vadd.f32 %v5375_v53, %v2294_v49  ;;  %v2296_v63 = vadd.f32 %v2269_v47, %v2062_v30  ;;  %v2712_v47 = vadd.f32 %v5175_v35, %v2295_v9  ;;  %v2715_v4 = vadd.f32 %v3991_v56, %v2298_v58 }
 0x168   : > { %v3966_v59 = vpop.f32.mrf.mxu0  ;;  %v2686_v8 = vpop.f32.mrf.mxu1 }
 0x169   : > { %v2299_v52 = vadd.f32 %v3966_v59, %v2065_v21  ;;  %v2713_v41 = vadd.f32 %v2686_v8, %v2296_v63 }
 0x16a   : > { %v2272_v44 = vpop.f32.mrf.mxu0  ;;  %v3992_v16 = vpop.f32.mrf.mxu1 }
 0x16b   : > { %v2297_v31 = vadd.f32 %v2272_v44, %v2063_v15  ;;  %v5249_v29 = vadd.f32 %v3992_v16, %v2299_v52 }
 0x16c   : > { %v4005_v24 = vpop.f32.mrf.mxu0  ;;  %v2689_v40 = vpop.f32.mrf.mxu1 }
 0x16d   : > { %v2992_v55 = vadd.f32 %v4005_v24, %v2703_v42  ;;  %v5254_v23 = vadd.f32 %v2689_v40, %v2297_v31 }
 0x16e   : > { %v2927_v48 = vpop.f32.mrf.mxu0  ;;  %v4013_v3 = vpop.f32.mrf.mxu1 }
 0x16f   : > { %v3015_v34 = vmul.f32 %v5222_v43, %v2992_v55  ;;  %v2990_v46 = vadd.f32 %v2927_v48, %v2701_v32  ;;  %v3000_v27 = vadd.f32 %v4013_v3, %v2711_v54 }
 0x170   : > { %v4006_v36 = vpop.f32.mrf.mxu0  ;;  %v2959_v2 = vpop.f32.mrf.mxu1 }
 0x171   : > { %v3038_v10 = vadd.f32 %v5237_v20, %v3015_v34  ;;  %v3013_v18 = vmul.f32 %v5222_v43, %v2990_v46  ;;  %v2993_v59 = vadd.f32 %v4006_v36, %v2704_v50  ;;  %v3023_v61 = vmul.f32 %v5222_v43, %v3000_v27 }
 0x172   : > { %v2998_v39 = vadd.f32 %v2959_v2, %v2709_v25  ;;  %v2930_v35 = vpop.f32.mrf.mxu0  ;;  %v4014_v56 = vpop.f32.mrf.mxu1 }
 0x173   : > { %v3054_v30 = vmax.f32 %v3038_v10, 0.0  ;;  %v3036_v12 = vadd.f32 %v5237_v20, %v3013_v18  ;;  %v3016_v38 = vmul.f32 %v5222_v43, %v2993_v59  ;;  %v2991_v45 = vadd.f32 %v2930_v35, %v2702_v28 }
 0x174   : > { %v3046_v8 = vadd.f32 %v5237_v20, %v3023_v61  ;;  %v3021_v21 = vmul.f32 %v5222_v43, %v2998_v39  ;;  %v3001_v51 = vadd.f32 %v4014_v56, %v2712_v47  ;;  %v4009_v15 = vpop.f32.mrf.mxu0  ;;  %v2962_v42 = vpop.f32.mrf.mxu1 }
 0x175   : > { %v3654_v37 = vpack.c.bf16 %v3054_v30, %v3054_v30  ;;  %v3052_v49 = vmax.f32 %v3036_v12, 0.0  ;;  %v3039_v44 = vadd.f32 %v5237_v20, %v3016_v38  ;;  %v3014_v14 = vmul.f32 %v5222_v43, %v2991_v45 }
 0x176   : > { %v3062_v57 = vmax.f32 %v3046_v8, 0.0  ;;  %v3044_v32 = vadd.f32 %v5237_v20, %v3021_v21  ;;  %v3024_v62 = vmul.f32 %v5222_v43, %v3001_v51  ;;  %v2999_v5 = vadd.f32 %v2962_v42, %v2710_v17  ;;  %v2943_v16 = vpop.f32.mrf.mxu0  ;;  %v4017_v9 = vpop.f32.mrf.mxu1 }
 0x177   : > { %3135 = vst.msk [vmem:[%s5259_s11 + $0x8] sm:$0xf] %vm3132_vm8, %v3654_v37  ;;  %v3652_v26 = vpack.c.bf16 %v3052_v49, %v3052_v49  ;;  %v3055_v50 = vmax.f32 %v3039_v44, 0.0  ;;  %v3037_v7 = vadd.f32 %v5237_v20, %v3014_v14  ;;  %v2996_v28 = vadd.f32 %v4009_v15, %v2707_v33 }
 0x178   : > { %v3662_v19 = vpack.c.bf16 %v3062_v57, %v3062_v57  ;;  %v3060_v24 = vmax.f32 %v3044_v32, 0.0  ;;  %v3047_v22 = vadd.f32 %v5237_v20, %v3024_v62  ;;  %v3022_v1 = vmul.f32 %v5222_v43, %v2999_v5  ;;  %v4010_v58 = vpop.f32.mrf.mxu0  ;;  %v2975_v54 = vpop.f32.mrf.mxu1 }
 0x179   : > { %3133 = vst.msk [vmem:[%s5259_s11] sm:$0xf] %vm3132_vm8, %v3652_v26  ;;  %v3655_v40 = vpack.c.bf16 %v3055_v50, %v3055_v50  ;;  %v3053_v55 = vmax.f32 %v3037_v7, 0.0  ;;  %v3019_v6 = vmul.f32 %v5222_v43, %v2996_v28  ;;  %v3004_v53 = vadd.f32 %v4017_v9, %v2715_v4 }
 0x17a   : > { %3143 = vst.msk [vmem:[%s5259_s11 + $0x28] sm:$0xf] %vm3132_vm8, %v3662_v19  ;;  %v3660_v33 = vpack.c.bf16 %v3060_v24, %v3060_v24  ;;  %v3063_v63 = vmax.f32 %v3047_v22, 0.0  ;;  %v3045_v52 = vadd.f32 %v5237_v20, %v3022_v1  ;;  %v2994_v48 = vadd.f32 %v2943_v16, %v5226_v60  ;;  %v4018_v46 = vpop.f32.mrf.mxu1  ;;  %v2946_v47 = vpop.f32.mrf.mxu0 }
 0x17b   : > { %3136 = vst.msk [vmem:[%s5259_s11 + $0xc] sm:$0xf] %vm3132_vm8, %v3655_v40  ;;  %v3653_v0 = vpack.c.bf16 %v3053_v55, %v3053_v55  ;;  %v3042_v25 = vadd.f32 %v5237_v20, %v3019_v6  ;;  %v3027_v34 = vmul.f32 %v5222_v43, %v3004_v53  ;;  %v3002_v3 = vadd.f32 %v2975_v54, %v2713_v41 }
 0x17c   : > { %3141 = vst.msk [vmem:[%s5259_s11 + $0x20] sm:$0xf] %vm3132_vm8, %v3660_v33  ;;  %v3663_v17 = vpack.c.bf16 %v3063_v63, %v3063_v63  ;;  %v3061_v31 = vmax.f32 %v3045_v52, 0.0  ;;  %v3017_v27 = vmul.f32 %v5222_v43, %v2994_v48  ;;  %v2997_v36 = vadd.f32 %v4010_v58, %v5229_v11  ;;  %v2978_v2 = vpop.f32.mrf.mxu1 }
 0x17d   : > { %3134 = vst.msk [vmem:[%s5259_s11 + $0x4] sm:$0xf] %vm3132_vm8, %v3653_v0  ;;  %v3058_v60 = vmax.f32 %v3042_v25, 0.0  ;;  %v3050_v4 = vadd.f32 %v5237_v20, %v3027_v34  ;;  %v3025_v10 = vmul.f32 %v5222_v43, %v3002_v3  ;;  %v3005_v18 = vadd.f32 %v4018_v46, %v5249_v29 }
 0x17e   : > { %3144 = vst.msk [vmem:[%s5259_s11 + $0x2c] sm:$0xf] %vm3132_vm8, %v3663_v17  ;;  %v3661_v59 = vpack.c.bf16 %v3061_v31, %v3061_v31  ;;  %v3040_v41 = vadd.f32 %v5237_v20, %v3017_v27  ;;  %v3020_v61 = vmul.f32 %v5222_v43, %v2997_v36  ;;  %v2995_v11 = vadd.f32 %v2946_v47, %v5240_v13 }
 0x17f   : > { %v3658_v39 = vpack.c.bf16 %v3058_v60, %v3058_v60  ;;  %v3066_v35 = vmax.f32 %v3050_v4, 0.0  ;;  %v3048_v30 = vadd.f32 %v5237_v20, %v3025_v10  ;;  %v3028_v12 = vmul.f32 %v5222_v43, %v3005_v18 }
 0x180   : > { %3142 = vst.msk [vmem:[%s5259_s11 + $0x24] sm:$0xf] %vm3132_vm8, %v3661_v59  ;;  %v3056_v29 = vmax.f32 %v3040_v41, 0.0  ;;  %v3043_v38 = vadd.f32 %v5237_v20, %v3020_v61  ;;  %v3018_v56 = vmul.f32 %v5222_v43, %v2995_v11  ;;  %v3003_v45 = vadd.f32 %v2978_v2, %v5254_v23 }
 0x181   : > { %3139 = vst.msk [vmem:[%s5259_s11 + $0x18] sm:$0xf] %vm3132_vm8, %v3658_v39  ;;  %v3666_v13 = vpack.c.bf16 %v3066_v35, %v3066_v35  ;;  %v3064_v8 = vmax.f32 %v3048_v30, 0.0  ;;  %v3051_v21 = vadd.f32 %v5237_v20, %v3028_v12 }
 0x182   : > { %v3656_v51 = vpack.c.bf16 %v3056_v29, %v3056_v29  ;;  %v3059_v15 = vmax.f32 %v3043_v38, 0.0  ;;  %v3041_v37 = vadd.f32 %v5237_v20, %v3018_v56  ;;  %v3026_v49 = vmul.f32 %v5222_v43, %v3003_v45 }
 0x183   : > { %3147 = vst.msk [vmem:[%s5259_s11 + $0x38] sm:$0xf] %vm3132_vm8, %v3666_v13  ;;  %v3664_v23 = vpack.c.bf16 %v3064_v8, %v3064_v8  ;;  %v3067_v44 = vmax.f32 %v3051_v21, 0.0 }
 0x184   : > { %3137 = vst.msk [vmem:[%s5259_s11 + $0x10] sm:$0xf] %vm3132_vm8, %v3656_v51  ;;  %v3659_v14 = vpack.c.bf16 %v3059_v15, %v3059_v15  ;;  %v3057_v42 = vmax.f32 %v3041_v37, 0.0  ;;  %v3049_v57 = vadd.f32 %v5237_v20, %v3026_v49 }
 0x185   : > { %3145 = vst.msk [vmem:[%s5259_s11 + $0x30] sm:$0xf] %vm3132_vm8, %v3664_v23  ;;  %v3667_v32 = vpack.c.bf16 %v3067_v44, %v3067_v44 }
 0x186   : > { %3140 = vst.msk [vmem:[%s5259_s11 + $0x1c] sm:$0xf] %vm3132_vm8, %v3659_v14  ;;  %v3657_v62 = vpack.c.bf16 %v3057_v42, %v3057_v42  ;;  %v3065_v5 = vmax.f32 %v3049_v57, 0.0 }
 0x187   : > { %3148 = vst.msk [vmem:[%s5259_s11 + $0x3c] sm:$0xf] %vm3132_vm8, %v3667_v32 }
 0x188   : > { %3138 = vst.msk [vmem:[%s5259_s11 + $0x14] sm:$0xf] %vm3132_vm8, %v3657_v62  ;;  %v3665_v43 = vpack.c.bf16 %v3065_v5, %v3065_v5 }
 0x18a   : > { %3146 = vst.msk [vmem:[%s5259_s11 + $0x34] sm:$0xf] %vm3132_vm8, %v3665_v43 }
 0x18b PF: > { %s14_s19 = sadd.s32 1, %s4188_s19   ;;  %s5377_s15 = smov %s4180_s17 }
 0x18c   : > { %p11_p8 = scmp.ge.s32.totalorder %s14_s19, 6   ;;  %s5378_s16 = smov %s4184_s18 }
 0x18d   : > { %s5379_s17 = smov %s5382_s20  ;;  %s5380_s18 = smov %s5386_s21 }
 0x18e   :  { %13 = sbr.rel (!%p11_p8) target bundleno = 3 (0x3), region = 76 }

// kernel: _forward.3
= control target key start
LH: loop header
LB: loop body
LE: loop exit
PB: predicated region body
PF: predicated region fallthrough
CT: control target
= control target key end

     0   :  { %s4240_s18 = smov 0   ;;  %s4242_s19 = smov 0   ;;  %s5391_s0 = inlined_call_operand.vmem [shape: bf16[2,2,10,18,72], index: 0, kind: input, shape index: {}]   ;;  %s5392_s1 = inlined_call_operand.vmem [shape: bf16[9,72,64], index: 1, kind: input, shape index: {}]   ;;  %s5393_s2 = inlined_call_operand.vmem [shape: f32[1,64], index: 2, kind: input, shape index: {}]   ;;  %s5394_s3 = inlined_call_operand.vmem [shape: f32[1,64], index: 3, kind: input, shape index: {}]   ;;  %s5395_s4 = inlined_call_operand.vmem [shape: f32[2,256,64], index: 4, kind: input, shape index: {}]   ;;  %s5396_s5 = inlined_call_operand.vmem [shape: f32[2,256,64], index: 5, kind: output, shape index: {}]  }
   0x1   :  { %s4244_s20 = smov 0   ;;  %s4246_s21 = smov 0  }
   0x2   :  { %s4248_s22 = smov 0  }
   0x3 LB: > { %s24_s23 = sadd.s32 1, %s4200_s20  ;;  %s27_s24 = sadd.s32 1, %s4204_s21  ;;  %s4208_s22 = sphi %s4248_s22, %s15_s22   ;;  %s4204_s21 = sphi %s4246_s21, %s5429_s21   ;;  %s4200_s20 = sphi %s4244_s20, %s5428_s20   ;;  %s4196_s19 = sphi %s4242_s19, %s5427_s19   ;;  %s4192_s18 = sphi %s4240_s18, %s5426_s18  }
   0x4   : > { %p25_p0 = scmp.ge.s32.totalorder %s24_s23, 2  ;;  %p3295_p1 = scmp.ge.s32.totalorder %s4208_s22, 1 }
   0x5   : > { %p224_p2 = scmp.lt.s32.totalorder %s4208_s22, 5 }
   0x6   : > { %s5431_s23 = smov (%p25_p0, %s24_s23), 0  ;;  %s5433_s24 = smov (!%p25_p0, %s27_s24), %s4204_s21 }
   0x7   : > { %p225_p3 = pnand %p3295_p1, %p224_p2  ;;  %p29_p4 = scmp.ge.s32.totalorder %s5433_s24, 2 }
   0x9   : > { %s5435_s24 = smov (%p29_p4, %s5433_s24), 0  ;;  %228 = sbr.rel (%p225_p3) target bundleno = 395 (0x18b), region = 40 }
   0xe   : > { %v4101_v0 = vld [vmem:[%s5392_s1 + $0x44] ss:$0 sps:$4 sm:$0xff]   ;;  %vm613_vm0 = vcmask 1043456   ;;  %v4103_v1 = vld [vmem:[%s5392_s1 + $0x3c] sm:$0xff]   ;;  %v4105_v6 = vld [vmem:[%s5392_s1 + $0x34] sm:$0xff]   ;;  %p269_p5 = scmp.lt.s32.totalorder %s4196_s19, 1 }
   0xf   : > { %v4102_v2 = vld [vmem:[%s5392_s1 + $0x20] ss:$0 sps:$4 sm:$0xff]   ;;  %4049 = vmatprep.subr.msk.bf16.mxu0 %vm613_vm0, %v4101_v0  ;;  %v615_v3 = vsel %vm613_vm0, %v4101_v0, 0  ;;  %v4104_v4 = vld [vmem:[%s5392_s1 + $0x18] sm:$0xff]   ;;  %v4106_v7 = vld [vmem:[%s5392_s1 + $0x10] sm:$0xff]   ;;  %p271_p6 = scmp.lt.s32.totalorder %s4192_s18, 1 }
  0x10   : > { %4050 = vmatprep.subr.msk.bf16.mxu1 %vm613_vm0, %v4102_v2  ;;  %3806 = vmatpush3.bf16.msra.mxu0 %v615_v3  ;;  %v806_v5 = vsel %vm613_vm0, %v4102_v2, 0  ;;  %s5437_s19 = smov (!%p269_p5, %s4196_s19), 1  ;;  %v4107_v8 = vld [vmem:[%s5392_s1 + $0x2c] sm:$0xff]   ;;  %v4109_v10 = vld [vmem:[%s5392_s1 + $0x24] sm:$0xff]   ;;  %vm332_vm1 = vsmask.f32 3328 }
  0x11   : > { %3832 = vmatpush3.bf16.msra.mxu1 %v806_v5  ;;  %3807 = vmatprep.subr.bf16.mxu0 %v4103_v1  ;;  %s272_s14 = scalar_select %p271_p6, %s4192_s18, 1  ;;  %v4108_v9 = vld [vmem:[%s5392_s1 + $0x8] sm:$0xff]   ;;  %v4110_v12 = vld [vmem:[%s5392_s1] sm:$0xff]   ;;  %vm333_vm2 = vsmask.f32 7440  ;;  %vm588_vm3 = vcmask 588800  }
  0x12   : > { %3833 = vmatprep.subr.bf16.mxu1 %v4104_v4  ;;  %s4060_s17 = smul.u32 60, %s5437_s19  ;;  %v4113_v11 = vld [vmem:[%s5392_s1 + $0x68] ss:$0 sps:$4 sm:$0xff]   ;;  %v4114_v13 = vld [vmem:[%s5392_s1 + $0x8c] ss:$0 sps:$4 sm:$0xff]   ;;  %vm4359_vm4 = vmor %vm332_vm1, %vm333_vm2  ;;  %vm929_vm5 = vcmask 1042432  }
  0x13   : > { %s4059_s27 = smul.u32 30, %s272_s14  ;;  %v4322_v14 = vsel %vm613_vm0, %v4113_v11, 0  ;;  %v4325_v15 = vsel %vm613_vm0, %v4114_v13, 0  ;;  %v4117_v47 = vld [vmem:[%s5392_s1 + $0x84] sm:$0xff]   ;;  %vm930_vm6 = vcmask 1046532   ;;  %vm3163_vm8 = vcmask 523264  }
  0x14   : > { %3808 = vmatpush3.bf16.msra.mxu0 %v4103_v1  ;;  %vm4525_vm7 = vmor %vm929_vm5, %vm930_vm6 }
  0x15   : > { %3834 = vmatpush3.bf16.msra.mxu1 %v4104_v4  ;;  %3809 = vmatprep.subr.bf16.mxu0 %v4105_v6  ;;  %s275_s9 = sadd.s32 %s4060_s17, %s4059_s27 }
  0x16   : > { %3835 = vmatprep.subr.bf16.mxu1 %v4106_v7  ;;  %s3296_s10 = sshll.u32 %s275_s9, 2 }
  0x17   : > { %s4330_s13 = scalar_lea.vmem %s5391_s0, %s3296_s10 }
  0x18   : > { %3810 = vmatpush3.bf16.msra.mxu0 %v4105_v6  ;;  %v299_v16 = vld [vmem:[%s4330_s13] sm:$0xf]  ;;  %v4334_v17 = vld [vmem:[%s4330_s13 + $0x4] sm:$0xf]  ;;  %v4337_v18 = vld [vmem:[%s4330_s13 + $0x8] sm:$0x1] }
  0x19   : > { %3836 = vmatpush3.bf16.msra.mxu1 %v4106_v7  ;;  %3811 = vmatprep.subr.bf16.mxu0 %v4107_v8  ;;  %v336_v19 = vshrl.u32 %v299_v16, 16  ;;  %v339_v20 = vshll.u32 %v299_v16, 16  ;;  %v345_v21 = vshll.u32 %v4334_v17, 16  ;;  %v349_v22 = vshrl.u32 %v4334_v17, 16  ;;  %v301_v23 = vld [vmem:[%s4330_s13 + $0xc] sm:$0xf] }
  0x1a   : > { %3837 = vmatprep.subr.bf16.mxu1 %v4108_v9  ;;  %v355_v24 = vshll.u32 %v4337_v18, 16  ;;  %v937_v25 = vrot.slane %v4337_v18, 5  ;;  %v3333_v26 = vcombine.low %v299_v16, %v4334_v17  ;;  %v4346_v27 = vld [vmem:[%s4330_s13 + $0x10] sm:$0xf]  ;;  %v4349_v28 = vld [vmem:[%s4330_s13 + $0x14] sm:$0x1] }
  0x1b   : > { %v338_v29 = vrot.slane %v336_v19, 4  ;;  %v341_v30 = vrot.slane %v339_v20, 5  ;;  %v347_v31 = vrot.slane %v345_v21, 5  ;;  %v351_v32 = vrot.slane %v349_v22, 4  ;;  %v303_v41 = vld [vmem:[%s4330_s13 + $0x18] sm:$0xf] }
  0x1c   : > { %3812 = vmatpush3.bf16.msra.mxu0 %v4107_v8  ;;  %v357_v33 = vrot.slane %v355_v24, 5  ;;  %3841 = vmatprep.mubr.msk.bf16.mxu1 %vm588_vm3, %v3333_v26  ;;  %v360_v34 = vshrl.u32 %v301_v23, 16  ;;  %v363_v35 = vshll.u32 %v301_v23, 16  ;;  %v369_v36 = vshll.u32 %v4346_v27, 16  ;;  %v4369_v52 = vld [vmem:[%s4330_s13 + $0x1c] sm:$0xf] }
  0x1d   : > { %3838 = vmatpush3.bf16.msra.mxu1 %v4108_v9  ;;  %3813 = vmatprep.subr.bf16.mxu0 %v4109_v10  ;;  %v342_v37 = vor.u32 %v341_v30, %v338_v29  ;;  %v352_v38 = vor.u32 %v351_v32, %v347_v31  ;;  %v373_v39 = vshrl.u32 %v4346_v27, 16  ;;  %v379_v40 = vshll.u32 %v4349_v28, 16  ;;  %v4374_v56 = vld [vmem:[%s4330_s13 + $0x20] sm:$0x1]  ;;  %v305_v62 = vld [vmem:[%s4330_s13 + $0x24] sm:$0xf] }
  0x1e   : > { %3839 = vmatprep.subr.bf16.mxu1 %v4110_v12  ;;  %v362_v43 = vrot.slane %v360_v34, 4  ;;  %v365_v44 = vrot.slane %v363_v35, 5  ;;  %v371_v45 = vrot.slane %v369_v36, 5  ;;  %v941_v46 = vrot.slane %v4346_v27, 5  ;;  %v4384_v3 = vld [vmem:[%s4330_s13 + $0x28] sm:$0xf] }
  0x1f   : > { %v343_v48 = vrot.slane %v342_v37, 4  ;;  %v353_v49 = vrot.slane %v352_v38, 4  ;;  %v375_v50 = vrot.slane %v373_v39, 4  ;;  %v381_v51 = vrot.slane %v379_v40, 5  ;;  %v4390_v8 = vld [vmem:[%s4330_s13 + $0x2c] sm:$0x1] }
  0x20   : > { %3814 = vmatpush3.bf16.msra.mxu0 %v4109_v10  ;;  %v366_v53 = vor.u32 %v365_v44, %v362_v43  ;;  %v944_v54 = vrot.slane %v4349_v28, 5  ;;  %v3334_v55 = vcombine.low %v301_v23, %v4346_v27  ;;  %v384_v57 = vshrl.u32 %v303_v41, 16  ;;  %v4405_v22 = vld [vmem:[%s4330_s13 + $0x34] sm:$0xf]  ;;  %v4116_v24 = vld [vmem:[%s5392_s1 + $0x60] sm:$0xff]   ;;  %v4135_v28 = vld [vmem:[%s5392_s1 + $0xcc] sm:$0xff]  }
  0x21   : > { %3840 = vmatpush3.bf16.msra.mxu1 %v4110_v12  ;;  %4051 = vmatprep.subr.msk.bf16.mxu0 %vm613_vm0, %v4113_v11  ;;  %v348_v58 = vsel %vm4359_vm4, %v343_v48, %v347_v31  ;;  %v358_v59 = vsel %vm4359_vm4, %v353_v49, %v357_v33  ;;  %v376_v60 = vor.u32 %v375_v50, %v371_v45  ;;  %v387_v61 = vshll.u32 %v303_v41, 16  ;;  %v4417_v38 = vld [vmem:[%s4330_s13 + $0x38] sm:$0x1] }
  0x22   : > { %4052 = vmatprep.subr.msk.bf16.mxu1 %vm613_vm0, %v4114_v13  ;;  %v3312_v63 = vcombine.low %v348_v58, %v358_v59  ;;  %v367_v0 = vrot.slane %v366_v53, 4  ;;  %v386_v1 = vrot.slane %v384_v57, 4  ;;  %v393_v2 = vshll.u32 %v4369_v52, 16  ;;  %v4120_v13 = vld [vmem:[%s5392_s1 + $0x7c] sm:$0xff]   ;;  %v4124_v40 = vld [vmem:[%s5392_s1 + $0x74] sm:$0xff]  }
  0x23   : > { %v377_v4 = vrot.slane %v376_v60, 4  ;;  %v389_v5 = vrot.slane %v387_v61, 5  ;;  %v397_v6 = vshrl.u32 %v4369_v52, 16  ;;  %v403_v7 = vshll.u32 %v4374_v56, 16  ;;  %v4119_v48 = vld [vmem:[%s5392_s1 + $0x58] sm:$0xff]  }
  0x24   : > { %3842 = vmatmul.mubr.msk.bf16.vlgmr.msra.gmra.mxu1 %vm588_vm3, %v3334_v55  ;;  %3815 = vmatprep.mubr.msk.bf16.mxu0 %vm588_vm3, %v3312_v63  ;;  %v372_v9 = vsel %vm4359_vm4, %v367_v0, %v371_v45  ;;  %v395_v10 = vrot.slane %v393_v2, 5  ;;  %v3335_v11 = vcombine.low %v303_v41, %v4369_v52  ;;  %v408_v12 = vshrl.u32 %v305_v62, 16  ;;  %v309_v58 = vld [vmem:[%s4330_s13 + $0x3c] sm:$0xf]  ;;  %v4438_v59 = vld [vmem:[%s4330_s13 + $0x40] sm:$0xf] }
  0x25   : > { %3884 = vmatpush3.bf16.msra.mxu1 %v4325_v15  ;;  %v4400_v15 = vld [vmem:[%s4330_s13 + $0x30] sm:$0xf]  ;;  %v382_v16 = vsel %vm4359_vm4, %v377_v4, %v381_v51  ;;  %v390_v19 = vor.u32 %v389_v5, %v386_v1  ;;  %v399_v20 = vrot.slane %v397_v6, 4  ;;  %v405_v21 = vrot.slane %v403_v7, 5  ;;  %v4441_v0 = vld [vmem:[%s4330_s13 + $0x44] sm:$0x1] }
  0x26   : > { %3885 = vmatprep.subr.bf16.mxu1 %v4117_v47  ;;  %v3313_v23 = vcombine.low %v372_v9, %v382_v16  ;;  %3845 = vmatprep.mubr.msk.bf16.mxu1 %vm588_vm3, %v3335_v11  ;;  %v410_v26 = vrot.slane %v408_v12, 4  ;;  %v411_v29 = vshll.u32 %v305_v62, 16  ;;  %v417_v30 = vshll.u32 %v4384_v3, 16  ;;  %v4128_v1 = vld [vmem:[%s5392_s1 + $0x6c] sm:$0xff]   ;;  %v4452_v9 = vld [vmem:[%s4330_s13 + $0x48] sm:$0xf] }
  0x27   : > { %v391_v31 = vrot.slane %v390_v19, 4  ;;  %v400_v32 = vor.u32 %v399_v20, %v395_v10  ;;  %v421_v33 = vshrl.u32 %v4384_v3, 16  ;;  %v427_v34 = vshll.u32 %v4390_v8, 16  ;;  %v4123_v7 = vld [vmem:[%s5392_s1 + $0x50] sm:$0xff]  }
  0x28   : > { %3816 = vmatmul.mubr.msk.bf16.vlgmr.msra.gmra.mxu0 %vm588_vm3, %v3313_v23  ;;  %v413_v35 = vrot.slane %v411_v29, 5  ;;  %v419_v36 = vrot.slane %v417_v30, 5  ;;  %v3336_v37 = vcombine.low %v305_v62, %v4384_v3  ;;  %v432_v39 = vshrl.u32 %v4400_v15, 16  ;;  %v4466_v30 = vld [vmem:[%s4330_s13 + $0x50] sm:$0x1] }
  0x29   : > { %3886 = vmatpush3.bf16.msra.mxu1 %v4117_v47  ;;  %3858 = vmatpush3.bf16.msra.mxu0 %v4322_v14  ;;  %v396_v41 = vsel %vm4359_vm4, %v391_v31, %v395_v10  ;;  %v401_v43 = vrot.slane %v400_v32, 4  ;;  %v423_v44 = vrot.slane %v421_v33, 4  ;;  %v429_v45 = vrot.slane %v427_v34, 5 }
  0x2a   : > { %3887 = vmatprep.subr.bf16.mxu1 %v4120_v13  ;;  %3859 = vmatprep.subr.bf16.mxu0 %v4116_v24  ;;  %v414_v47 = vor.u32 %v413_v35, %v410_v26  ;;  %v434_v49 = vrot.slane %v432_v39, 4  ;;  %v435_v14 = vshll.u32 %v4400_v15, 16  ;;  %v441_v50 = vshll.u32 %v4405_v22, 16 }
  0x2b   : > { %v406_v51 = vsel %vm4359_vm4, %v401_v43, %v405_v21  ;;  %v424_v53 = vor.u32 %v423_v44, %v419_v36  ;;  %v445_v55 = vshrl.u32 %v4405_v22, 16  ;;  %v451_v57 = vshll.u32 %v4417_v38, 16  ;;  %v4463_v21 = vld [vmem:[%s4330_s13 + $0x4c] sm:$0xf] }
  0x2c   : > { %3846 = vmatmul.mubr.msk.bf16.gmra.mxu1 %vm588_vm3, %v3336_v37  ;;  %v3314_v60 = vcombine.low %v396_v41, %v406_v51  ;;  %v415_v61 = vrot.slane %v414_v47, 4  ;;  %v437_v62 = vrot.slane %v435_v14, 5  ;;  %v443_v63 = vrot.slane %v441_v50, 5  ;;  %v4127_v41 = vld [vmem:[%s5392_s1 + $0x48] sm:$0xff]  }
  0x2d   : > { %3888 = vmatpush3.bf16.msra.mxu1 %v4120_v13  ;;  %v425_v2 = vrot.slane %v424_v53, 4  ;;  %3860 = vmatpush3.bf16.msra.mxu0 %v4116_v24  ;;  %v447_v4 = vrot.slane %v445_v55, 4  ;;  %v453_v5 = vrot.slane %v451_v57, 5  ;;  %v3337_v6 = vcombine.low %v4400_v15, %v4405_v22  ;;  %v4487_v53 = vld [vmem:[%s4330_s13 + $0x5c] sm:$0x1] }
  0x2e   : > { %3889 = vmatprep.subr.bf16.mxu1 %v4124_v40  ;;  %3819 = vmatprep.mubr.msk.bf16.mxu0 %vm588_vm3, %v3314_v60  ;;  %v420_v10 = vsel %vm4359_vm4, %v415_v61, %v419_v36  ;;  %v438_v11 = vor.u32 %v437_v62, %v434_v49  ;;  %v456_v12 = vshrl.u32 %v309_v58, 16  ;;  %v459_v13 = vshll.u32 %v309_v58, 16 }
  0x2f   : > { %3861 = vmatprep.subr.bf16.mxu0 %v4119_v48  ;;  %v430_v16 = vsel %vm4359_vm4, %v425_v2, %v429_v45  ;;  %v448_v15 = vor.u32 %v447_v4, %v443_v63  ;;  %3849 = vmatprep.mubr.msk.bf16.mxu1 %vm588_vm3, %v3337_v6  ;;  %v465_v19 = vshll.u32 %v4438_v59, 16  ;;  %v469_v20 = vshrl.u32 %v4438_v59, 16  ;;  %v4499_v2 = vld [vmem:[%s5392_s1 + $0xb0] ss:$0 sps:$4 sm:$0xff]   ;;  %v4132_v4 = vld [vmem:[%s5392_s1 + $0xd4] ss:$0 sps:$4 sm:$0xff]  }
  0x30   : > { %v3315_v23 = vcombine.low %v420_v10, %v430_v16  ;;  %v439_v24 = vrot.slane %v438_v11, 4  ;;  %v458_v26 = vrot.slane %v456_v12, 4  ;;  %v461_v29 = vrot.slane %v459_v13, 5  ;;  %v905_v11 = vld [vmem:[%s4330_s13] sm:$0xe] }
  0x31   : > { %3890 = vmatpush3.bf16.msra.mxu1 %v4124_v40  ;;  %3862 = vmatpush3.bf16.msra.mxu0 %v4119_v48  ;;  %v449_v31 = vrot.slane %v448_v15, 4  ;;  %v467_v32 = vrot.slane %v465_v19, 5  ;;  %v471_v33 = vrot.slane %v469_v20, 4  ;;  %v475_v34 = vshll.u32 %v4441_v0, 16  ;;  %v313_v40 = vld [vmem:[%s4330_s13 + $0x54] sm:$0xf] }
  0x32   : > { %3891 = vmatprep.subr.bf16.mxu1 %v4128_v1  ;;  %3820 = vmatmul.mubr.msk.bf16.gmra.mxu0 %vm588_vm3, %v3315_v23  ;;  %v444_v35 = vsel %vm4359_vm4, %v439_v24, %v443_v63  ;;  %v462_v36 = vor.u32 %v461_v29, %v458_v26  ;;  %v3338_v37 = vcombine.low %v309_v58, %v4438_v59  ;;  %v480_v39 = vshrl.u32 %v4452_v9, 16  ;;  %v4482_v48 = vld [vmem:[%s4330_s13 + $0x58] sm:$0xf]  ;;  %v906_v15 = vld [vmem:[%s4330_s13 + $0xc] sm:$0xe] }
  0x33   : > { %3863 = vmatprep.subr.bf16.mxu0 %v4123_v7  ;;  %v454_v43 = vsel %vm4359_vm4, %v449_v31, %v453_v5  ;;  %v472_v44 = vor.u32 %v471_v33, %v467_v32  ;;  %v477_v45 = vrot.slane %v475_v34, 5  ;;  %v483_v47 = vshll.u32 %v4452_v9, 16  ;;  %v4129_v26 = vld [vmem:[%s4330_s13 + $0xc] sm:$0xff]  }
  0x34   : > { %v3316_v49 = vcombine.low %v444_v35, %v454_v43  ;;  %v463_v14 = vrot.slane %v462_v36, 4  ;;  %3850 = vmatmul.mubr.msk.bf16.gmra.mxu1 %vm588_vm3, %v3338_v37  ;;  %v482_v50 = vrot.slane %v480_v39, 4  ;;  %v489_v51 = vshll.u32 %v4463_v21, 16 }
  0x35   : > { %3892 = vmatpush3.bf16.msra.mxu1 %v4128_v1  ;;  %v473_v55 = vrot.slane %v472_v44, 4  ;;  %3864 = vmatpush3.bf16.msra.mxu0 %v4123_v7  ;;  %v485_v57 = vrot.slane %v483_v47, 5  ;;  %v493_v58 = vshrl.u32 %v4463_v21, 16  ;;  %v499_v60 = vshll.u32 %v4466_v30, 16 }
  0x36   : > { %3823 = vmatprep.mubr.msk.bf16.mxu0 %vm588_vm3, %v3316_v49  ;;  %v468_v61 = vsel %vm4359_vm4, %v463_v14, %v467_v32  ;;  %v491_v62 = vrot.slane %v489_v51, 5  ;;  %v3339_v63 = vcombine.low %v4452_v9, %v4463_v21  ;;  %v504_v1 = vshrl.u32 %v313_v40, 16  ;;  %3865 = vmatprep.subr.bf16.mxu0 %v4127_v41  ;;  %v908_v14 = vld [vmem:[%s4330_s13 + $0x24] sm:$0xe] }
  0x37   : > { %v478_v5 = vsel %vm4359_vm4, %v473_v55, %v477_v45  ;;  %v486_v6 = vor.u32 %v485_v57, %v482_v50  ;;  %v495_v7 = vrot.slane %v493_v58, 4  ;;  %v501_v10 = vrot.slane %v499_v60, 5  ;;  %4054 = vmatprep.subr.msk.bf16.mxu1 %vm613_vm0, %v4132_v4  ;;  %v4130_v60 = vld [vmem:[%s4330_s13 + $0x18] sm:$0xff]  }
  0x38   : > { %v3317_v9 = vcombine.low %v468_v61, %v478_v5  ;;  %3853 = vmatprep.mubr.msk.bf16.mxu1 %vm588_vm3, %v3339_v63  ;;  %v506_v12 = vrot.slane %v504_v1, 4  ;;  %v507_v13 = vshll.u32 %v313_v40, 16  ;;  %v513_v16 = vshll.u32 %v4482_v48, 16  ;;  %v4133_v63 = vld [vmem:[%s4330_s13 + $0x24] sm:$0xff]   ;;  %v909_v1 = vld [vmem:[%s4330_s13 + $0x30] sm:$0xe] }
  0x39   : > { %v487_v19 = vrot.slane %v486_v6, 4  ;;  %v496_v20 = vor.u32 %v495_v7, %v491_v62  ;;  %v517_v23 = vshrl.u32 %v4482_v48, 16  ;;  %v523_v24 = vshll.u32 %v4487_v53, 16  ;;  %3866 = vmatpush3.bf16.msra.mxu0 %v4127_v41 }
  0x3a   : > { %3824 = vmatmul.mubr.msk.bf16.gmra.mxu0 %vm588_vm3, %v3317_v9  ;;  %v509_v29 = vrot.slane %v507_v13, 5  ;;  %v515_v31 = vrot.slane %v513_v16, 5  ;;  %v3340_v32 = vcombine.low %v313_v40, %v4482_v48  ;;  %4053 = vmatprep.subr.msk.bf16.mxu0 %vm613_vm0, %v4499_v2  ;;  %v3354_v39 = vrot.slane %v905_v11, 9  ;;  %v907_v40 = vld [vmem:[%s4330_s13 + $0x18] sm:$0xe] }
  0x3b   : > { %v492_v33 = vsel %vm4359_vm4, %v487_v19, %v491_v62  ;;  %v497_v34 = vrot.slane %v496_v20, 4  ;;  %v519_v35 = vrot.slane %v517_v23, 4  ;;  %v525_v36 = vrot.slane %v523_v24, 5  ;;  %v4136_v23 = vld [vmem:[%s4330_s13 + $0x30] sm:$0xff]  }
  0x3c   : > { %v510_v37 = vor.u32 %v509_v29, %v506_v12  ;;  %3854 = vmatmul.mubr.msk.bf16.gmra.mxu1 %vm588_vm3, %v3340_v32  ;;  %v934_v41 = vrot.slane %v4334_v17, 5  ;;  %v3355_v47 = vrot.slane %v906_v15, 9  ;;  %v943_v49 = vrot.slane %v941_v46, 4 }
  0x3d   : > { %v502_v43 = vsel %vm4359_vm4, %v497_v34, %v501_v10  ;;  %v520_v44 = vor.u32 %v519_v35, %v515_v31  ;;  %3893 = vmatprep.mubr.msk.bf16.mxu1 %vm588_vm3, %v4129_v26  ;;  %v3356_v7 = vrot.slane %v907_v40, 9  ;;  %v948_v18 = vrot.slane %v4369_v52, 5  ;;  %v910_v10 = vld [vmem:[%s4330_s13 + $0x3c] sm:$0xe] }
  0x3e   : > { %v3318_v50 = vcombine.low %v492_v33, %v502_v43  ;;  %v511_v17 = vrot.slane %v510_v37, 4  ;;  %v935_v51 = vsel %vm4525_vm7, %v3354_v39, %v934_v41  ;;  %v936_v55 = vrot.slane %v934_v41, 4  ;;  %v4134_v33 = vld [vmem:[%s5392_s1 + $0xa8] sm:$0xff]   ;;  %v912_v39 = vld [vmem:[%s4330_s13 + $0x54] sm:$0xe]  ;;  %v4142_v43 = vld [vmem:[%s5392_s1 + $0xbc] sm:$0xff]  }
  0x3f   : > { %v521_v57 = vrot.slane %v520_v44, 4  ;;  %v4539_v58 = vsel %vm4525_vm7, %v3355_v47, %v941_v46  ;;  %v4553_v27 = vsel %vm4525_vm7, %v943_v49, %v944_v54  ;;  %v2014_v46 = vsel %vm613_vm0, %v4132_v4, 0 }
  0x40   : > { %3827 = vmatprep.mubr.msk.bf16.mxu0 %vm588_vm3, %v3318_v50  ;;  %v516_v61 = vsel %vm4359_vm4, %v511_v17, %v515_v31  ;;  %v938_v62 = vsel %vm4525_vm7, %v936_v55, %v937_v25  ;;  %v951_v25 = vrot.slane %v4374_v56, 5  ;;  %v3357_v54 = vrot.slane %v908_v14, 9  ;;  %v911_v31 = vld [vmem:[%s4330_s13 + $0x48] sm:$0xe] }
  0x41   : > { %v526_v5 = vsel %vm4359_vm4, %v521_v57, %v525_v36  ;;  %v3371_v6 = vcombine.low %v935_v51, %v938_v62  ;;  %v955_v4 = vrot.slane %v4384_v3, 5  ;;  %v950_v9 = vrot.slane %v948_v18, 4  ;;  %v3438_v57 = vld [vmem:[%s4330_s13 + $0xc] sm:$0xf]  ;;  %v3440_v62 = vld [vmem:[%s4330_s13 + $0x14] sm:$0x1] }
  0x42   : > { %v3319_v11 = vcombine.low %v516_v61, %v526_v5  ;;  %v958_v12 = vrot.slane %v4390_v8, 5  ;;  %v3358_v13 = vrot.slane %v909_v1, 9  ;;  %v1725_v52 = vsel %vm613_vm0, %v4499_v2, 0  ;;  %v3439_v61 = vld [vmem:[%s4330_s13 + $0x10] sm:$0xf] }
  0x43   : > { %v957_v56 = vrot.slane %v955_v4, 4  ;;  %v962_v16 = vrot.slane %v4405_v22, 5  ;;  %v965_v15 = vrot.slane %v4417_v38, 5  ;;  %v3372_v3 = vcombine.low %v4539_v58, %v4553_v27 }
  0x44   : > { %3828 = vmatmul.mubr.msk.bf16.gmra.mxu0 %vm588_vm3, %v3319_v11  ;;  %3894 = vmatmul.mubr.msk.bf16.vlgmr.msra.gmra.mxu1 %vm588_vm3, %v4130_v60  ;;  %v3359_v8 = vrot.slane %v910_v10, 9  ;;  %v969_v19 = vrot.slane %v4438_v59, 5  ;;  %v972_v20 = vrot.slane %v4441_v0, 5  ;;  %v949_v2 = vsel %vm4525_vm7, %v3356_v7, %v948_v18  ;;  %v4138_v59 = vld [vmem:[%s5392_s1 + $0xc4] sm:$0xff]  }
  0x45   : > { %3867 = vmatprep.mubr.msk.bf16.mxu0 %vm588_vm3, %v3371_v6  ;;  %3936 = vmatpush3.bf16.msra.mxu1 %v2014_v46  ;;  %v952_v22 = vsel %vm4525_vm7, %v950_v9, %v951_v25  ;;  %v4586_v38 = vsel %vm4525_vm7, %v3357_v54, %v955_v4  ;;  %v964_v0 = vrot.slane %v962_v16, 4  ;;  %v4594_v24 = vsel %vm4525_vm7, %v957_v56, %v958_v12  ;;  %v3492_v6 = vld [vmem:[%s4330_s13 + $0xc] sm:$0xe]  ;;  %v4146_v4 = vld [vmem:[%s5392_s1 + $0xb4] sm:$0xff]  }
  0x46   : > { %3897 = vmatprep.mubr.msk.bf16.mxu1 %vm588_vm3, %v4133_v63  ;;  %3937 = vmatprep.subr.bf16.mxu1 %v4135_v28  ;;  %v4598_v26 = vsel %vm4525_vm7, %v3358_v13, %v962_v16  ;;  %v971_v29 = vrot.slane %v969_v19, 4  ;;  %v976_v32 = vrot.slane %v4463_v21, 5  ;;  %v4611_v35 = vsel %vm4525_vm7, %v3359_v8, %v969_v19  ;;  %v4139_v21 = vld [vmem:[%s4330_s13 + $0x3c] sm:$0xff]   ;;  %v4140_v7 = vld [vmem:[%s4330_s13 + $0x48] sm:$0xff]  }
  0x47   : > { %v4607_v34 = vsel %vm4525_vm7, %v964_v0, %v965_v15  ;;  %v3360_v36 = vrot.slane %v911_v31, 9  ;;  %v979_v37 = vrot.slane %v4466_v30, 5  ;;  %v3373_v41 = vcombine.low %v949_v2, %v952_v22  ;;  %v4141_v56 = vld [vmem:[%s5392_s1 + $0x98] sm:$0xff]   ;;  %v3443_v19 = vld [vmem:[%s4330_s13 + $0x20] sm:$0x1] }
  0x48   : > { %v4618_v40 = vsel %vm4525_vm7, %v971_v29, %v972_v20  ;;  %v978_v44 = vrot.slane %v976_v32, 4  ;;  %v3361_v47 = vrot.slane %v912_v39, 9  ;;  %v983_v49 = vrot.slane %v4482_v48, 5  ;;  %v4137_v48 = vld [vmem:[%s5392_s1 + $0xa0] sm:$0xff]  }
  0x49   : > { %3938 = vmatpush3.bf16.msra.mxu1 %v4135_v28  ;;  %v4625_v30 = vsel %vm4525_vm7, %v3360_v36, %v976_v32  ;;  %v986_v14 = vrot.slane %v4487_v53, 5  ;;  %v3374_v50 = vcombine.low %v4586_v38, %v4594_v24  ;;  %v3375_v17 = vcombine.low %v4598_v26, %v4607_v34  ;;  %v3441_v28 = vld [vmem:[%s4330_s13 + $0x18] sm:$0xf]  ;;  %v4145_v26 = vld [vmem:[%s5392_s1 + $0x90] sm:$0xff]  }
  0x4a   : > { %3939 = vmatprep.subr.bf16.mxu1 %v4138_v59  ;;  %v3376_v51 = vcombine.low %v4611_v35, %v4618_v40  ;;  %v4637_v55 = vsel %vm4525_vm7, %v978_v44, %v979_v37  ;;  %v4649_v58 = vsel %vm4525_vm7, %v3361_v47, %v983_v49  ;;  %v985_v60 = vrot.slane %v983_v49, 4  ;;  %v4685_v32 = vld [vmem:[%s5392_s1 + $0xf8] ss:$0 sps:$4 sm:$0xff]   ;;  %v4148_v47 = vld [vmem:[%s5392_s1 + $0x11c] ss:$0 sps:$4 sm:$0xff]  }
  0x4b   : > { %v3377_v53 = vcombine.low %v4625_v30, %v4637_v55  ;;  %v1448_v27 = vshrl.u32 %v3438_v57, 16  ;;  %v1451_v46 = vshll.u32 %v3438_v57, 16  ;;  %v1457_v63 = vshll.u32 %v3439_v61, 16  ;;  %v3495_v35 = vld [vmem:[%s4330_s13 + $0x30] sm:$0xe] }
  0x4c   : > { %3868 = vmatmul.mubr.msk.bf16.vlgmr.msra.gmra.mxu0 %vm588_vm3, %v3372_v3  ;;  %3898 = vmatmul.mubr.msk.bf16.gmra.mxu1 %vm588_vm3, %v4136_v23  ;;  %v1461_v1 = vshrl.u32 %v3439_v61, 16  ;;  %v1467_v5 = vshll.u32 %v3440_v62, 16  ;;  %v4658_v18 = vsel %vm4525_vm7, %v985_v60, %v986_v14  ;;  %v3500_v11 = vrot.slane %v3492_v6, 9  ;;  %v3493_v23 = vld [vmem:[%s4330_s13 + $0x18] sm:$0xe] }
  0x4d   : > { %3910 = vmatpush3.bf16.msra.mxu0 %v1725_v52  ;;  %3871 = vmatprep.mubr.msk.bf16.mxu0 %vm588_vm3, %v3373_v41  ;;  %v1450_v10 = vrot.slane %v1448_v27, 4  ;;  %v1874_v25 = vrot.slane %v3439_v61, 5  ;;  %v3378_v54 = vcombine.low %v4649_v58, %v4658_v18  ;;  %v1453_v9 = vrot.slane %v1451_v46, 5  ;;  %v3442_v52 = vld [vmem:[%s4330_s13 + $0x1c] sm:$0xf]  ;;  %v4144_v46 = vld [vmem:[%s4330_s13 + $0x60] sm:$0xff]  }
  0x4e   : > { %3911 = vmatprep.subr.bf16.mxu0 %v4134_v33  ;;  %3940 = vmatpush3.bf16.msra.mxu1 %v4138_v59  ;;  %v1459_v12 = vrot.slane %v1457_v63, 5  ;;  %v1463_v13 = vrot.slane %v1461_v1, 4  ;;  %v1469_v16 = vrot.slane %v1467_v5, 5  ;;  %v1877_v8 = vrot.slane %v3440_v62, 5  ;;  %v4143_v59 = vld [vmem:[%s4330_s13 + $0x54] sm:$0xff]  }
  0x4f   : > { %3901 = vmatprep.mubr.msk.bf16.mxu1 %vm588_vm3, %v4139_v21  ;;  %3941 = vmatprep.subr.bf16.mxu1 %v4142_v43  ;;  %v4673_v15 = vsel %vm4525_vm7, %v3500_v11, %v1874_v25  ;;  %v1876_v3 = vrot.slane %v1874_v25, 4  ;;  %v1454_v20 = vor.u32 %v1453_v9, %v1450_v10  ;;  %v1472_v22 = vshrl.u32 %v3441_v28, 16  ;;  %v3444_v60 = vld [vmem:[%s4330_s13 + $0x24] sm:$0xf]  ;;  %v3445_v62 = vld [vmem:[%s4330_s13 + $0x28] sm:$0xf] }
  0x50   : > { %v1464_v2 = vor.u32 %v1463_v13, %v1459_v12  ;;  %v1475_v38 = vshll.u32 %v3441_v28, 16  ;;  %v1481_v24 = vshll.u32 %v3442_v52, 16  ;;  %v1485_v29 = vshrl.u32 %v3442_v52, 16  ;;  %v3446_v27 = vld [vmem:[%s4330_s13 + $0x2c] sm:$0x1] }
  0x51   : > { %3912 = vmatpush3.bf16.msra.mxu0 %v4134_v33  ;;  %v4680_v0 = vsel %vm4525_vm7, %v1876_v3, %v1877_v8  ;;  %v1491_v31 = vshll.u32 %v3443_v19, 16  ;;  %v1455_v33 = vrot.slane %v1454_v20, 4  ;;  %v1474_v39 = vrot.slane %v1472_v22, 4 }
  0x52   : > { %3913 = vmatprep.subr.bf16.mxu0 %v4137_v48  ;;  %3942 = vmatpush3.bf16.msra.mxu1 %v4142_v43  ;;  %v1465_v36 = vrot.slane %v1464_v2, 4  ;;  %v3517_v37 = vcombine.low %v4673_v15, %v4680_v0  ;;  %v1477_v41 = vrot.slane %v1475_v38, 5  ;;  %v1483_v21 = vrot.slane %v1481_v24, 5  ;;  %v3448_v38 = vld [vmem:[%s4330_s13 + $0x34] sm:$0xf] }
  0x53   : > { %3943 = vmatprep.subr.bf16.mxu1 %v4146_v4  ;;  %v1487_v43 = vrot.slane %v1485_v29, 4  ;;  %v1493_v44 = vrot.slane %v1491_v31, 5  ;;  %v1460_v49 = vsel %vm4359_vm4, %v1455_v33, %v1459_v12  ;;  %v1881_v57 = vrot.slane %v3442_v52, 5  ;;  %v3449_v31 = vld [vmem:[%s4330_s13 + $0x38] sm:$0x1] }
  0x54   : > { %3872 = vmatmul.mubr.msk.bf16.gmra.mxu0 %vm588_vm3, %v3374_v50  ;;  %3902 = vmatmul.mubr.msk.bf16.gmra.mxu1 %vm588_vm3, %v4140_v7  ;;  %v1470_v14 = vsel %vm4359_vm4, %v1465_v36, %v1469_v16  ;;  %v3501_v50 = vrot.slane %v3493_v23, 9  ;;  %v1884_v61 = vrot.slane %v3443_v19, 5  ;;  %v4718_v5 = vsel %vm613_vm0, %v4685_v32, 0  ;;  %v3494_v7 = vld [vmem:[%s4330_s13 + $0x24] sm:$0xe] }
  0x55   : > { %3914 = vmatpush3.bf16.msra.mxu0 %v4137_v48  ;;  %3875 = vmatprep.mubr.msk.bf16.mxu0 %vm588_vm3, %v3375_v17  ;;  %v4707_v34 = vcombine.low %v1460_v49, %v1470_v14  ;;  %v1478_v17 = vor.u32 %v1477_v41, %v1474_v39  ;;  %v1488_v48 = vor.u32 %v1487_v43, %v1483_v21  ;;  %v1883_v1 = vrot.slane %v1881_v57, 4  ;;  %v3447_v19 = vld [vmem:[%s4330_s13 + $0x30] sm:$0xf] }
  0x56   : > { %3915 = vmatprep.subr.bf16.mxu0 %v4141_v56  ;;  %3905 = vmatprep.mubr.msk.bf16.mxu1 %vm588_vm3, %v4143_v59  ;;  %v4714_v63 = vsel %vm4525_vm7, %v3501_v50, %v1881_v57  ;;  %v4721_v6 = vsel %vm613_vm0, %v4148_v47, 0  ;;  %v1496_v25 = vshrl.u32 %v3444_v60, 16  ;;  %v1499_v28 = vshll.u32 %v3444_v60, 16  ;;  %v3450_v57 = vld [vmem:[%s4330_s13 + $0x3c] sm:$0xf] }
  0x57   : > { %3944 = vmatpush3.bf16.msra.mxu1 %v4146_v4  ;;  %v1479_v10 = vrot.slane %v1478_v17, 4  ;;  %v1489_v11 = vrot.slane %v1488_v48, 4  ;;  %v1885_v4 = vsel %vm4525_vm7, %v1883_v1, %v1884_v61  ;;  %v1505_v9 = vshll.u32 %v3445_v62, 16  ;;  %v3451_v60 = vld [vmem:[%s4330_s13 + $0x40] sm:$0xf]  ;;  %v4150_v17 = vld [vmem:[%s5392_s1 + $0x114] sm:$0xff]  }
  0x58   : > { %4056 = vmatprep.subr.msk.bf16.mxu1 %vm613_vm0, %v4148_v47  ;;  %v1509_v12 = vshrl.u32 %v3445_v62, 16  ;;  %v1515_v13 = vshll.u32 %v3446_v27, 16  ;;  %v3518_v3 = vcombine.low %v4714_v63, %v1885_v4  ;;  %v1498_v8 = vrot.slane %v1496_v25, 4  ;;  %v3452_v1 = vld [vmem:[%s4330_s13 + $0x44] sm:$0x1] }
  0x59   : > { %3916 = vmatpush3.bf16.msra.mxu0 %v4141_v56  ;;  %v1484_v52 = vsel %vm4359_vm4, %v1479_v10, %v1483_v21  ;;  %v1494_v16 = vsel %vm4359_vm4, %v1489_v11, %v1493_v44  ;;  %v1501_v56 = vrot.slane %v1499_v28, 5  ;;  %v1507_v2 = vrot.slane %v1505_v9, 5  ;;  %v3496_v4 = vld [vmem:[%s4330_s13 + $0x3c] sm:$0xe] }
  0x5a   : > { %3917 = vmatprep.subr.bf16.mxu0 %v4145_v26  ;;  %v4733_v20 = vcombine.low %v1484_v52, %v1494_v16  ;;  %v1511_v22 = vrot.slane %v1509_v12, 4  ;;  %v1517_v23 = vrot.slane %v1515_v13, 5  ;;  %v3502_v59 = vrot.slane %v3494_v7, 9  ;;  %v3453_v12 = vld [vmem:[%s4330_s13 + $0x48] sm:$0xf] }
  0x5b   : > { %v1888_v24 = vrot.slane %v3445_v62, 5  ;;  %v1891_v29 = vrot.slane %v3446_v27, 5  ;;  %v1502_v33 = vor.u32 %v1501_v56, %v1498_v8  ;;  %v1520_v39 = vshrl.u32 %v3447_v19, 16 }
  0x5c   : > { %3876 = vmatmul.mubr.msk.bf16.gmra.mxu0 %vm588_vm3, %v3376_v51  ;;  %3906 = vmatmul.mubr.msk.bf16.gmra.mxu1 %vm588_vm3, %v4144_v46  ;;  %v1512_v36 = vor.u32 %v1511_v22, %v1507_v2  ;;  %v1523_v41 = vshll.u32 %v3447_v19, 16  ;;  %v1529_v51 = vshll.u32 %v3448_v38, 16  ;;  %v1533_v55 = vshrl.u32 %v3448_v38, 16 }
  0x5d   : > { %3879 = vmatprep.mubr.msk.bf16.mxu0 %vm588_vm3, %v3377_v53  ;;  %3918 = vmatpush3.bf16.msra.mxu0 %v4145_v26  ;;  %v1889_v40 = vsel %vm4525_vm7, %v3502_v59, %v1888_v24  ;;  %v1890_v30 = vrot.slane %v1888_v24, 4  ;;  %v1503_v53 = vrot.slane %v1502_v33, 4  ;;  %v1522_v43 = vrot.slane %v1520_v39, 4  ;;  %v3454_v59 = vld [vmem:[%s4330_s13 + $0x4c] sm:$0xf]  ;;  %v4149_v39 = vld [vmem:[%s5392_s1 + $0xf0] sm:$0xff]  }
  0x5e   : > { %3945 = vmatprep.mubr.msk.bf16.mxu1 %vm588_vm3, %v3517_v37  ;;  %4055 = vmatprep.subr.msk.bf16.mxu0 %vm613_vm0, %v4685_v32  ;;  %v1513_v21 = vrot.slane %v1512_v36, 4  ;;  %v1525_v44 = vrot.slane %v1523_v41, 5  ;;  %v1531_v0 = vrot.slane %v1529_v51, 5  ;;  %v1535_v37 = vrot.slane %v1533_v55, 4  ;;  %v4154_v51 = vld [vmem:[%s5392_s1 + $0x104] sm:$0xff]  }
  0x5f   : > { %v1892_v15 = vsel %vm4525_vm7, %v1890_v30, %v1891_v29  ;;  %v1539_v47 = vshll.u32 %v3449_v31, 16  ;;  %v1508_v32 = vsel %vm4359_vm4, %v1503_v53, %v1507_v2  ;;  %v3503_v62 = vrot.slane %v3495_v35, 9 }
  0x60   : > { %v1518_v49 = vsel %vm4359_vm4, %v1513_v21, %v1517_v23  ;;  %v3519_v14 = vcombine.low %v1889_v40, %v1892_v15  ;;  %v1526_v50 = vor.u32 %v1525_v44, %v1522_v43  ;;  %v1536_v48 = vor.u32 %v1535_v37, %v1531_v0  ;;  %v3497_v44 = vld [vmem:[%s4330_s13 + $0x48] sm:$0xe] }
  0x61   : > { %v4763_v26 = vcombine.low %v1508_v32, %v1518_v49  ;;  %v1541_v61 = vrot.slane %v1539_v47, 5  ;;  %v1895_v46 = vrot.slane %v3448_v38, 5  ;;  %v1898_v63 = vrot.slane %v3449_v31, 5  ;;  %v3455_v31 = vld [vmem:[%s4330_s13 + $0x50] sm:$0x1]  ;;  %v4151_v15 = vld [vmem:[%s5392_s1 + $0xe8] sm:$0xff]  }
  0x62   : > { %v1527_v27 = vrot.slane %v1526_v50, 4  ;;  %v1544_v7 = vshrl.u32 %v3450_v57, 16  ;;  %v1537_v10 = vrot.slane %v1536_v48, 4  ;;  %v1547_v11 = vshll.u32 %v3450_v57, 16  ;;  %v3456_v49 = vld [vmem:[%s4330_s13 + $0x54] sm:$0xf] }
  0x63   : > { %v1553_v25 = vshll.u32 %v3451_v60, 16  ;;  %v1557_v28 = vshrl.u32 %v3451_v60, 16  ;;  %v1896_v58 = vsel %vm4525_vm7, %v3503_v62, %v1895_v46  ;;  %v1897_v18 = vrot.slane %v1895_v46, 4  ;;  %v4156_v48 = vld [vmem:[%s5392_s1 + $0xfc] sm:$0xff]  }
  0x64   : > { %3880 = vmatmul.mubr.msk.bf16.gmra.mxu0 %vm588_vm3, %v3378_v54  ;;  %3946 = vmatmul.mubr.msk.bf16.vlgmr.msra.gmra.mxu1 %vm588_vm3, %v3518_v3  ;;  %v1532_v9 = vsel %vm4359_vm4, %v1527_v27, %v1531_v0  ;;  %v1546_v54 = vrot.slane %v1544_v7, 4  ;;  %v1542_v13 = vsel %vm4359_vm4, %v1537_v10, %v1541_v61  ;;  %v1563_v19 = vshll.u32 %v3452_v1, 16 }
  0x65   : > { %3919 = vmatprep.mubr.msk.bf16.mxu0 %vm588_vm3, %v4707_v34  ;;  %3988 = vmatpush3.bf16.msra.mxu1 %v4721_v6  ;;  %v4152_v34 = vld [vmem:[%s5392_s1 + $0x10c] sm:$0xff]   ;;  %v1549_v6 = vrot.slane %v1547_v11, 5  ;;  %v1555_v52 = vrot.slane %v1553_v25, 5  ;;  %v1559_v16 = vrot.slane %v1557_v28, 4  ;;  %v4789_v3 = vcombine.low %v1532_v9, %v1542_v13  ;;  %v4153_v13 = vld [vmem:[%s5392_s1 + $0xe0] sm:$0xff]  }
  0x66   : > { %3949 = vmatprep.mubr.msk.bf16.mxu1 %vm588_vm3, %v3519_v14  ;;  %3989 = vmatprep.subr.bf16.mxu1 %v4150_v17  ;;  %v1899_v8 = vsel %vm4525_vm7, %v1897_v18, %v1898_v63  ;;  %v3504_v56 = vrot.slane %v3496_v4, 9  ;;  %v1902_v23 = vrot.slane %v3451_v60, 5  ;;  %v1565_v24 = vrot.slane %v1563_v19, 5  ;;  %v3457_v14 = vld [vmem:[%s4330_s13 + $0x58] sm:$0xf] }
  0x67   : > { %v3520_v2 = vcombine.low %v1896_v58, %v1899_v8  ;;  %v1550_v22 = vor.u32 %v1549_v6, %v1546_v54  ;;  %v1560_v38 = vor.u32 %v1559_v16, %v1555_v52  ;;  %v1905_v29 = vrot.slane %v3452_v1, 5 }
  0x68   : > { %v1568_v33 = vshrl.u32 %v3453_v12, 16  ;;  %v1571_v36 = vshll.u32 %v3453_v12, 16  ;;  %v1903_v40 = vsel %vm4525_vm7, %v3504_v56, %v1902_v23  ;;  %v1904_v30 = vrot.slane %v1902_v23, 4 }
  0x69   : > { %3990 = vmatpush3.bf16.msra.mxu1 %v4150_v17  ;;  %v1551_v41 = vrot.slane %v1550_v22, 4  ;;  %v1561_v35 = vrot.slane %v1560_v38, 4  ;;  %v1577_v21 = vshll.u32 %v3454_v59, 16  ;;  %v1581_v43 = vshrl.u32 %v3454_v59, 16  ;;  %v4822_v17 = vld [vmem:[%s4330_s13 + $0x5c] sm:$0x1] }
  0x6a   : > { %3991 = vmatprep.subr.bf16.mxu1 %v4152_v34  ;;  %v1570_v55 = vrot.slane %v1568_v33, 4  ;;  %v1573_v53 = vrot.slane %v1571_v36, 5  ;;  %v1906_v47 = vsel %vm4525_vm7, %v1904_v30, %v1905_v29  ;;  %v1587_v32 = vshll.u32 %v3455_v31, 16  ;;  %v4842_v22 = vld [vmem:[%s4330_s13 + $0x68] sm:$0x1]  ;;  %v4155_v30 = vld [vmem:[%s5392_s1 + $0xd8] sm:$0xff]  }
  0x6b   : > { %v1556_v0 = vsel %vm4359_vm4, %v1551_v41, %v1555_v52  ;;  %v1566_v37 = vsel %vm4359_vm4, %v1561_v35, %v1565_v24  ;;  %v3521_v50 = vcombine.low %v1903_v40, %v1906_v47  ;;  %v1579_v60 = vrot.slane %v1577_v21, 5  ;;  %v3459_v52 = vld [vmem:[%s4330_s13 + $0x60] sm:$0xf] }
  0x6c   : > { %3920 = vmatmul.mubr.msk.bf16.vlgmr.msra.gmra.mxu0 %vm588_vm3, %v4733_v20  ;;  %3950 = vmatmul.mubr.msk.bf16.gmra.mxu1 %vm588_vm3, %v3520_v2  ;;  %v3475_v20 = vcombine.low %v1556_v0, %v1566_v37  ;;  %v1574_v57 = vor.u32 %v1573_v53, %v1570_v55  ;;  %v1583_v61 = vrot.slane %v1581_v43, 4  ;;  %v1589_v62 = vrot.slane %v1587_v32, 5  ;;  %v3460_v2 = vld [vmem:[%s4330_s13 + $0x64] sm:$0xf] }
  0x6d   : > { %3962 = vmatpush3.bf16.msra.mxu0 %v4718_v5  ;;  %3923 = vmatprep.mubr.msk.bf16.mxu0 %vm588_vm3, %v4763_v26  ;;  %v3505_v27 = vrot.slane %v3497_v44, 9  ;;  %v1909_v46 = vrot.slane %v3454_v59, 5  ;;  %v3498_v5 = vld [vmem:[%s4330_s13 + $0x54] sm:$0xe]  ;;  %v1912_v63 = vrot.slane %v3455_v31, 5  ;;  %v1592_v1 = vshrl.u32 %v3456_v49, 16 }
  0x6e   : > { %3963 = vmatprep.subr.bf16.mxu0 %v4149_v39  ;;  %3992 = vmatpush3.bf16.msra.mxu1 %v4152_v34  ;;  %v1575_v26 = vrot.slane %v1574_v57, 4  ;;  %v1595_v7 = vshll.u32 %v3456_v49, 16  ;;  %v1584_v10 = vor.u32 %v1583_v61, %v1579_v60  ;;  %v1601_v28 = vshll.u32 %v3457_v14, 16  ;;  %v4861_v44 = vld [vmem:[%s4330_s13 + $0x1c] sm:$0xf] }
  0x6f   : > { %3953 = vmatprep.mubr.msk.bf16.mxu1 %vm588_vm3, %v3521_v50  ;;  %3993 = vmatprep.subr.bf16.mxu1 %v4154_v51  ;;  %v1910_v11 = vsel %vm4525_vm7, %v3505_v27, %v1909_v46  ;;  %v1911_v25 = vrot.slane %v1909_v46, 4  ;;  %v1594_v9 = vrot.slane %v1592_v1, 4  ;;  %v1605_v18 = vshrl.u32 %v3457_v14, 16  ;;  %v4159_v50 = vld [vmem:[%s5392_s1 + $0x140] ss:$0 sps:$4 sm:$0xff]  }
  0x70   : > { %v1580_v4 = vsel %vm4359_vm4, %v1575_v26, %v1579_v60  ;;  %v1597_v58 = vrot.slane %v1595_v7, 5  ;;  %v1585_v54 = vrot.slane %v1584_v10, 4  ;;  %v1603_v34 = vrot.slane %v1601_v28, 5  ;;  %v4872_v61 = vld [vmem:[%s4330_s13 + $0x20] sm:$0x1] }
  0x71   : > { %3964 = vmatpush3.bf16.msra.mxu0 %v4149_v39  ;;  %v1913_v12 = vsel %vm4525_vm7, %v1911_v25, %v1912_v63  ;;  %v1611_v6 = vshll.u32 %v4822_v17, 16  ;;  %v1607_v19 = vrot.slane %v1605_v18, 4  ;;  %v3506_v56 = vrot.slane %v3498_v5, 9  ;;  %v3499_v39 = vld [vmem:[%s4330_s13 + $0x60] sm:$0xe] }
  0x72   : > { %3965 = vmatprep.subr.bf16.mxu0 %v4151_v15  ;;  %3994 = vmatpush3.bf16.msra.mxu1 %v4154_v51  ;;  %v3522_v16 = vcombine.low %v1910_v11, %v1913_v12  ;;  %v1598_v8 = vor.u32 %v1597_v58, %v1594_v9  ;;  %v1590_v38 = vsel %vm4359_vm4, %v1585_v54, %v1589_v62  ;;  %v1916_v59 = vrot.slane %v3457_v14, 5  ;;  %v3584_v51 = vld [vmem:[%s4330_s13 + $0x18] sm:$0xf]  ;;  %v3587_v26 = vld [vmem:[%s4330_s13 + $0x24] sm:$0xf] }
  0x73   : > { %3995 = vmatprep.subr.bf16.mxu1 %v4156_v48  ;;  %v1613_v23 = vrot.slane %v1611_v6, 5  ;;  %v1919_v24 = vrot.slane %v4822_v17, 5  ;;  %v3476_v29 = vcombine.low %v1580_v4, %v1590_v38  ;;  %v1608_v33 = vor.u32 %v1607_v19, %v1603_v34  ;;  %v4883_v11 = vld [vmem:[%s4330_s13 + $0x28] sm:$0xf]  ;;  %v4157_v38 = vld [vmem:[%s4330_s13 + $0x18] sm:$0xff]  }
  0x74   : > { %3924 = vmatmul.mubr.msk.bf16.gmra.mxu0 %vm588_vm3, %v4789_v3  ;;  %v1599_v31 = vrot.slane %v1598_v8, 4  ;;  %v1616_v36 = vshrl.u32 %v3459_v52, 16  ;;  %3954 = vmatmul.mubr.msk.bf16.gmra.mxu1 %vm588_vm3, %v3522_v16  ;;  %v1917_v3 = vsel %vm4525_vm7, %v3506_v56, %v1916_v59  ;;  %v1918_v41 = vrot.slane %v1916_v59, 4  ;;  %v4896_v16 = vld [vmem:[%s4330_s13 + $0x2c] sm:$0x1] }
  0x75   : > { %3966 = vmatpush3.bf16.msra.mxu0 %v4151_v15  ;;  %3927 = vmatprep.mubr.msk.bf16.mxu0 %vm588_vm3, %v3475_v20  ;;  %v1619_v35 = vshll.u32 %v3459_v52, 16  ;;  %v1625_v40 = vshll.u32 %v3460_v2, 16  ;;  %v1609_v53 = vrot.slane %v1608_v33, 4  ;;  %v1629_v43 = vshrl.u32 %v3460_v2, 16 }
  0x76   : > { %3967 = vmatprep.subr.bf16.mxu0 %v4153_v13  ;;  %v1604_v55 = vsel %vm4359_vm4, %v1599_v31, %v1603_v34  ;;  %v1618_v21 = vrot.slane %v1616_v36, 4  ;;  %3996 = vmatpush3.bf16.msra.mxu1 %v4156_v48  ;;  %v1920_v15 = vsel %vm4525_vm7, %v1918_v41, %v1919_v24  ;;  %v1635_v47 = vshll.u32 %v4842_v22, 16  ;;  %v4904_v31 = vld [vmem:[%s4330_s13 + $0x34] sm:$0xf]  ;;  %v4909_v41 = vld [vmem:[%s4330_s13 + $0x38] sm:$0x1] }
  0x77   : > { %v1621_v0 = vrot.slane %v1619_v35, 5  ;;  %v1627_v37 = vrot.slane %v1625_v40, 5  ;;  %v1614_v32 = vsel %vm4359_vm4, %v1609_v53, %v1613_v23  ;;  %v3523_v49 = vcombine.low %v1917_v3, %v1920_v15  ;;  %4058 = vmatprep.subr.msk.bf16.mxu1 %vm613_vm0, %v4159_v50 }
  0x78   : > { %v1631_v14 = vrot.slane %v1629_v43, 4  ;;  %v3507_v20 = vrot.slane %v3499_v39, 9  ;;  %v3477_v57 = vcombine.low %v1604_v55, %v1614_v32  ;;  %v1637_v17 = vrot.slane %v1635_v47, 5  ;;  %v3593_v32 = vld [vmem:[%s4330_s13 + $0x3c] sm:$0xf] }
  0x79   : > { %3968 = vmatpush3.bf16.msra.mxu0 %v4153_v13  ;;  %v1622_v60 = vor.u32 %v1621_v0, %v1618_v21  ;;  %v1923_v48 = vrot.slane %v3460_v2, 5  ;;  %3957 = vmatprep.mubr.msk.bf16.mxu1 %vm588_vm3, %v3523_v49  ;;  %v1926_v27 = vrot.slane %v4842_v22, 5  ;;  %v2388_v46 = vshrl.u32 %v3584_v51, 16  ;;  %v3590_v22 = vld [vmem:[%s4330_s13 + $0x30] sm:$0xf] }
  0x7a   : > { %3969 = vmatprep.subr.bf16.mxu0 %v4155_v30  ;;  %v1632_v62 = vor.u32 %v1631_v14, %v1627_v37  ;;  %v2391_v5 = vshll.u32 %v3584_v51, 16  ;;  %v2397_v10 = vshll.u32 %v4861_v44, 16  ;;  %v2401_v9 = vshrl.u32 %v4861_v44, 16  ;;  %v4158_v14 = vld [vmem:[%s4330_s13 + $0x24] sm:$0xff]  }
  0x7b   : > { %v1623_v63 = vrot.slane %v1622_v60, 4  ;;  %v1924_v1 = vsel %vm4525_vm7, %v3507_v20, %v1923_v48  ;;  %v1925_v7 = vrot.slane %v1923_v48, 4  ;;  %v2390_v28 = vrot.slane %v2388_v46, 4  ;;  %v4922_v60 = vld [vmem:[%s4330_s13 + $0x40] sm:$0xf] }
  0x7c   : > { %3928 = vmatmul.mubr.msk.bf16.gmra.mxu0 %vm588_vm3, %v3476_v29  ;;  %v1633_v25 = vrot.slane %v1632_v62, 4  ;;  %v2393_v4 = vrot.slane %v2391_v5, 5  ;;  %v2399_v54 = vrot.slane %v2397_v10, 5  ;;  %v2407_v12 = vshll.u32 %v4872_v61, 16  ;;  %v4926_v46 = vld [vmem:[%s4330_s13 + $0x44] sm:$0x1] }
  0x7d   : > { %3931 = vmatprep.mubr.msk.bf16.mxu0 %vm588_vm3, %v3477_v57  ;;  %3970 = vmatpush3.bf16.msra.mxu0 %v4155_v30  ;;  %v1628_v58 = vsel %vm4359_vm4, %v1623_v63, %v1627_v37  ;;  %v1927_v18 = vsel %vm4525_vm7, %v1925_v7, %v1926_v27  ;;  %v2403_v52 = vrot.slane %v2401_v9, 4  ;;  %v2412_v56 = vshrl.u32 %v3587_v26, 16  ;;  %v3596_v9 = vld [vmem:[%s4330_s13 + $0x48] sm:$0xf] }
  0x7e   : > { %4057 = vmatprep.subr.msk.bf16.mxu0 %vm613_vm0, %v4159_v50  ;;  %v1638_v13 = vsel %vm4359_vm4, %v1633_v25, %v1637_v17  ;;  %v3524_v34 = vcombine.low %v1924_v1, %v1927_v18  ;;  %v2394_v6 = vor.u32 %v2393_v4, %v2390_v28  ;;  %v2409_v19 = vrot.slane %v2407_v12, 5  ;;  %v4161_v12 = vld [vmem:[%s5392_s1 + $0x138] sm:$0xff]  }
  0x7f   : > { %v3478_v8 = vcombine.low %v1628_v58, %v1638_v13  ;;  %v2415_v2 = vshll.u32 %v3587_v26, 16  ;;  %v2404_v59 = vor.u32 %v2403_v52, %v2399_v54  ;;  %v2421_v24 = vshll.u32 %v4883_v11, 16  ;;  %v4160_v26 = vld [vmem:[%s4330_s13 + $0x30] sm:$0xff]   ;;  %v4937_v58 = vld [vmem:[%s4330_s13 + $0x4c] sm:$0xf] }
  0x80   : > { %3958 = vmatmul.mubr.msk.bf16.gmra.mxu1 %vm588_vm3, %v3524_v34  ;;  %v2395_v23 = vrot.slane %v2394_v6, 4  ;;  %v2425_v29 = vshrl.u32 %v4883_v11, 16  ;;  %v2414_v33 = vrot.slane %v2412_v56, 4  ;;  %v2431_v39 = vshll.u32 %v4896_v16, 16  ;;  %v4943_v6 = vld [vmem:[%s4330_s13 + $0x50] sm:$0x1] }
  0x81   : > { %v2417_v36 = vrot.slane %v2415_v2, 5  ;;  %v2954_v3 = vsel %vm613_vm0, %v4159_v50, 0  ;;  %v2405_v40 = vrot.slane %v2404_v59, 4  ;;  %v2423_v30 = vrot.slane %v2421_v24, 5  ;;  %v3599_v2 = vld [vmem:[%s4330_s13 + $0x54] sm:$0xf] }
  0x82   : > { %v2400_v35 = vsel %vm4359_vm4, %v2395_v23, %v2399_v54  ;;  %v2427_v51 = vrot.slane %v2425_v29, 4  ;;  %v2433_v53 = vrot.slane %v2431_v39, 5  ;;  %v2436_v21 = vshrl.u32 %v3590_v22, 16 }
  0x83   : > { %v2418_v55 = vor.u32 %v2417_v36, %v2414_v33  ;;  %v2439_v43 = vshll.u32 %v3590_v22, 16  ;;  %v2410_v15 = vsel %vm4359_vm4, %v2405_v40, %v2409_v19  ;;  %v2445_v37 = vshll.u32 %v4904_v31, 16  ;;  %v4163_v40 = vld [vmem:[%s5392_s1 + $0x130] sm:$0xff]  }
  0x84   : > { %3932 = vmatmul.mubr.msk.bf16.gmra.mxu0 %vm588_vm3, %v3478_v8  ;;  %v2428_v0 = vor.u32 %v2427_v51, %v2423_v30  ;;  %v2449_v47 = vshrl.u32 %v4904_v31, 16  ;;  %v3617_v49 = vcombine.low %v2400_v35, %v2410_v15  ;;  %v2438_v50 = vrot.slane %v2436_v21, 4 }
  0x85   : > { %3971 = vmatprep.mubr.msk.bf16.mxu0 %vm588_vm3, %v4157_v38  ;;  %v2419_v20 = vrot.slane %v2418_v55, 4  ;;  %v2441_v57 = vrot.slane %v2439_v43, 5  ;;  %v2447_v48 = vrot.slane %v2445_v37, 5  ;;  %v2455_v27 = vshll.u32 %v4909_v41, 16  ;;  %v4162_v55 = vld [vmem:[%s4330_s13 + $0x3c] sm:$0xff]  }
  0x86   : > { %v2429_v17 = vrot.slane %v2428_v0, 4  ;;  %v2451_v62 = vrot.slane %v2449_v47, 4  ;;  %3997 = vmatprep.mubr.msk.bf16.mxu1 %vm588_vm3, %v3617_v49  ;;  %v2460_v1 = vshrl.u32 %v3593_v32, 16  ;;  %v2463_v7 = vshll.u32 %v3593_v32, 16  ;;  %v4969_v47 = vld [vmem:[%s4330_s13 + $0x5c] sm:$0x1] }
  0x87   : > { %v2424_v5 = vsel %vm4359_vm4, %v2419_v20, %v2423_v30  ;;  %v2442_v63 = vor.u32 %v2441_v57, %v2438_v50  ;;  %v2457_v28 = vrot.slane %v2455_v27, 5  ;;  %v2469_v4 = vshll.u32 %v4922_v60, 16 }
  0x88   : > { %v2434_v10 = vsel %vm4359_vm4, %v2429_v17, %v2433_v53  ;;  %v2452_v25 = vor.u32 %v2451_v62, %v2447_v48  ;;  %v2462_v13 = vrot.slane %v2460_v1, 4  ;;  %v2465_v34 = vrot.slane %v2463_v7, 5  ;;  %v4164_v17 = vld [vmem:[%s4330_s13 + $0x48] sm:$0xff]  }
  0x89   : > { %v3618_v18 = vcombine.low %v2424_v5, %v2434_v10  ;;  %v2443_v54 = vrot.slane %v2442_v63, 4  ;;  %v2471_v8 = vrot.slane %v2469_v4, 5  ;;  %v2473_v19 = vshrl.u32 %v4922_v60, 16 }
  0x8a   : > { %v2453_v52 = vrot.slane %v2452_v25, 4  ;;  %v2479_v56 = vshll.u32 %v4926_v46, 16  ;;  %v2466_v38 = vor.u32 %v2465_v34, %v2462_v13  ;;  %v2484_v23 = vshrl.u32 %v3596_v9, 16  ;;  %v3602_v25 = vld [vmem:[%s4330_s13 + $0x60] sm:$0xf] }
  0x8b   : > { %3998 = vmatmul.mubr.msk.bf16.vlgmr.msra.gmra.mxu1 %vm588_vm3, %v3618_v18  ;;  %v2448_v22 = vsel %vm4359_vm4, %v2443_v54, %v2447_v48  ;;  %v2487_v59 = vshll.u32 %v3596_v9, 16  ;;  %v2475_v29 = vrot.slane %v2473_v19, 4  ;;  %v2493_v36 = vshll.u32 %v4937_v58, 16 }
  0x8c   : > { %3972 = vmatmul.mubr.msk.bf16.vlgmr.msra.gmra.mxu0 %vm588_vm3, %v4158_v14  ;;  %4044 = vmatpush3.bf16.msra.mxu1 %v2954_v3  ;;  %v2458_v24 = vsel %vm4359_vm4, %v2453_v52, %v2457_v28  ;;  %v2481_v33 = vrot.slane %v2479_v56, 5  ;;  %v2467_v35 = vrot.slane %v2466_v38, 4  ;;  %v2486_v30 = vrot.slane %v2484_v23, 4  ;;  %v4982_v28 = vld [vmem:[%s4330_s13 + $0x64] sm:$0xf] }
  0x8d   : > { %4014 = vmatpush3.bf16.msra.mxu0 %v2954_v3  ;;  %3975 = vmatprep.mubr.msk.bf16.mxu0 %vm588_vm3, %v4160_v26  ;;  %v3619_v39 = vcombine.low %v2448_v22, %v2458_v24  ;;  %v2489_v51 = vrot.slane %v2487_v59, 5  ;;  %v4960_v3 = vld [vmem:[%s4330_s13 + $0x58] sm:$0xf]  ;;  %v2476_v53 = vor.u32 %v2475_v29, %v2471_v8  ;;  %v2495_v21 = vrot.slane %v2493_v36, 5  ;;  %v4166_v26 = vld [vmem:[%s5392_s1 + $0x128] sm:$0xff]   ;;  %v4169_v23 = vld [vmem:[%s5392_s1 + $0x120] sm:$0xff]  }
  0x8e   : > { %4015 = vmatprep.subr.bf16.mxu0 %v4161_v12  ;;  %4040 = vmatprep.subr.bf16.mxu1 %v4161_v12  ;;  %v2497_v43 = vshrl.u32 %v4937_v58, 16  ;;  %v2503_v15 = vshll.u32 %v4943_v6, 16  ;;  %v2472_v0 = vsel %vm4359_vm4, %v2467_v35, %v2471_v8  ;;  %v2508_v32 = vshrl.u32 %v3599_v2, 16  ;;  %v4990_v8 = vld [vmem:[%s4330_s13 + $0x68] sm:$0x1]  ;;  %v4165_v35 = vld [vmem:[%s4330_s13 + $0x54] sm:$0xff]  }
  0x8f   : > { %4001 = vmatprep.mubr.msk.bf16.mxu1 %vm588_vm3, %v3619_v39  ;;  %v2490_v37 = vor.u32 %v2489_v51, %v2486_v30  ;;  %v2511_v49 = vshll.u32 %v3599_v2, 16  ;;  %v2477_v14 = vrot.slane %v2476_v53, 4  ;;  %v2517_v57 = vshll.u32 %v4960_v3, 16  ;;  %v3605_v38 = vld [vmem:[%s4330_s13 + $0x6c] sm:$0xf]  ;;  %v4167_v51 = vld [vmem:[%s4330_s13 + $0x60] sm:$0xff]  }
  0x90   : > { %4045 = vmatpush3.bf16.msra.mxu1 %v4161_v12  ;;  %v2499_v20 = vrot.slane %v2497_v43, 4  ;;  %v2505_v50 = vrot.slane %v2503_v15, 5  ;;  %v2510_v62 = vrot.slane %v2508_v32, 4  ;;  %v2521_v5 = vshrl.u32 %v4960_v3, 16  ;;  %v5007_v36 = vld [vmem:[%s4330_s13 + $0x70] sm:$0xf] }
  0x91   : > { %4016 = vmatpush3.bf16.msra.mxu0 %v4161_v12  ;;  %4041 = vmatprep.subr.bf16.mxu1 %v4163_v40  ;;  %v2491_v48 = vrot.slane %v2490_v37, 4  ;;  %v2513_v27 = vrot.slane %v2511_v49, 5  ;;  %v2482_v63 = vsel %vm4359_vm4, %v2477_v14, %v2481_v33  ;;  %v2519_v7 = vrot.slane %v2517_v57, 5 }
  0x92   : > { %4017 = vmatprep.subr.bf16.mxu0 %v4163_v40  ;;  %v2500_v1 = vor.u32 %v2499_v20, %v2495_v21  ;;  %v2527_v10 = vshll.u32 %v4969_v47, 16  ;;  %v3620_v4 = vcombine.low %v2472_v0, %v2482_v63  ;;  %v2523_v54 = vrot.slane %v2521_v5, 4  ;;  %v5015_v0 = vld [vmem:[%s4330_s13 + $0x74] sm:$0x1]  ;;  %v3638_v20 = vld [vmem:[%s4330_s13 + $0x18] sm:$0xe] }
  0x93   : > { %v2496_v9 = vsel %vm4359_vm4, %v2491_v48, %v2495_v21  ;;  %v2514_v18 = vor.u32 %v2513_v27, %v2510_v62  ;;  %v2849_v34 = vrot.slane %v4960_v3, 5  ;;  %v2852_v52 = vrot.slane %v4969_v47, 5  ;;  %v3642_v63 = vld [vmem:[%s4330_s13 + $0x48] sm:$0xe] }
  0x94   : > { %3976 = vmatmul.mubr.msk.bf16.gmra.mxu0 %vm588_vm3, %v4162_v55  ;;  %4046 = vmatpush3.bf16.msra.mxu1 %v4163_v40  ;;  %v2501_v12 = vrot.slane %v2500_v1, 4  ;;  %v2529_v13 = vrot.slane %v2527_v10, 5  ;;  %v2524_v56 = vor.u32 %v2523_v54, %v2519_v7  ;;  %v2532_v2 = vshrl.u32 %v3602_v25, 16 }
  0x95   : > { %4018 = vmatpush3.bf16.msra.mxu0 %v4163_v40  ;;  %4002 = vmatmul.mubr.msk.bf16.gmra.mxu1 %vm588_vm3, %v3620_v4  ;;  %v2515_v19 = vrot.slane %v2514_v18, 4  ;;  %v2535_v22 = vshll.u32 %v3602_v25, 16  ;;  %v5002_v24 = vrot.slane %v2849_v34, 4  ;;  %v2541_v29 = vshll.u32 %v4982_v28, 16 }
  0x96   : > { %3979 = vmatprep.mubr.msk.bf16.mxu0 %vm588_vm3, %v4164_v17  ;;  %v2506_v59 = vsel %vm4359_vm4, %v2501_v12, %v2505_v50  ;;  %4019 = vmatprep.subr.bf16.mxu0 %v4166_v26  ;;  %v2545_v33 = vshrl.u32 %v4982_v28, 16  ;;  %v2525_v30 = vrot.slane %v2524_v56, 4  ;;  %v2534_v55 = vrot.slane %v2532_v2, 4  ;;  %v3639_v12 = vld [vmem:[%s4330_s13 + $0x24] sm:$0xe] }
  0x97   : > { %4042 = vmatprep.subr.bf16.mxu1 %v4166_v26  ;;  %v3621_v39 = vcombine.low %v2496_v9, %v2506_v59  ;;  %v2520_v40 = vsel %vm4359_vm4, %v2515_v19, %v2519_v7  ;;  %v2537_v53 = vrot.slane %v2535_v22, 5  ;;  %v2543_v21 = vrot.slane %v2541_v29, 5 }
  0x98   : > { %4047 = vmatpush3.bf16.msra.mxu1 %v4166_v26  ;;  %v2547_v43 = vrot.slane %v2545_v33, 4  ;;  %v2551_v15 = vshll.u32 %v4990_v8, 16  ;;  %v2530_v37 = vsel %vm4359_vm4, %v2525_v30, %v2529_v13  ;;  %v2556_v32 = vshrl.u32 %v3605_v38, 16  ;;  %v3643_v33 = vld [vmem:[%s4330_s13 + $0x54] sm:$0xe] }
  0x99   : > { %4020 = vmatpush3.bf16.msra.mxu0 %v4166_v26  ;;  %4005 = vmatprep.mubr.msk.bf16.mxu1 %vm588_vm3, %v3621_v39  ;;  %v2559_v49 = vshll.u32 %v3605_v38, 16  ;;  %v2565_v14 = vshll.u32 %v5007_v36, 16  ;;  %v3622_v50 = vcombine.low %v2520_v40, %v2530_v37  ;;  %v2538_v57 = vor.u32 %v2537_v53, %v2534_v55  ;;  %v4168_v38 = vld [vmem:[%s4330_s13 + $0x6c] sm:$0xff]  }
  0x9a   : > { %4021 = vmatprep.subr.bf16.mxu0 %v4169_v23  ;;  %v2548_v17 = vor.u32 %v2547_v43, %v2543_v21  ;;  %v2553_v48 = vrot.slane %v2551_v15, 5  ;;  %4043 = vmatprep.subr.bf16.mxu1 %v4169_v23  ;;  %v2558_v62 = vrot.slane %v2556_v32, 4  ;;  %v2569_v26 = vshrl.u32 %v5007_v36, 16  ;;  %v3640_v43 = vld [vmem:[%s4330_s13 + $0x30] sm:$0xe] }
  0x9b   : > { %v2561_v27 = vrot.slane %v2559_v49, 5  ;;  %v2567_v5 = vrot.slane %v2565_v14, 5  ;;  %v2539_v1 = vrot.slane %v2538_v57, 4  ;;  %v2575_v10 = vshll.u32 %v5015_v0, 16 }
  0x9c   : > { %3980 = vmatmul.mubr.msk.bf16.gmra.mxu0 %vm588_vm3, %v4165_v35  ;;  %v2549_v7 = vrot.slane %v2548_v17, 4  ;;  %v3646_v25 = vrot.slane %v3638_v20, 9  ;;  %v2571_v9 = vrot.slane %v2569_v26, 4  ;;  %v2814_v18 = vrot.slane %v4861_v44, 5  ;;  %4048 = vmatpush3.bf16.msra.mxu1 %v4169_v23  ;;  %v3641_v17 = vld [vmem:[%s4330_s13 + $0x3c] sm:$0xe] }
  0x9d   : > { %3983 = vmatprep.mubr.msk.bf16.mxu0 %vm588_vm3, %v4167_v51  ;;  %4022 = vmatpush3.bf16.msra.mxu0 %v4169_v23  ;;  %v2562_v4 = vor.u32 %v2561_v27, %v2558_v62  ;;  %v2817_v54 = vrot.slane %v4872_v61, 5  ;;  %v2544_v13 = vsel %vm4359_vm4, %v2539_v1, %v2543_v21  ;;  %v2577_v56 = vrot.slane %v2575_v10, 5 }
  0x9e   : > { %4006 = vmatmul.mubr.msk.bf16.gmra.mxu1 %vm588_vm3, %v3622_v50  ;;  %v2554_v19 = vsel %vm4359_vm4, %v2549_v7, %v2553_v48  ;;  %v3650_v2 = vrot.slane %v3642_v63, 9  ;;  %v2572_v29 = vor.u32 %v2571_v9, %v2567_v5  ;;  %v2815_v44 = vsel %vm4525_vm7, %v3646_v25, %v2814_v18 }
  0x9f   : > { %v3623_v22 = vcombine.low %v2544_v13, %v2554_v19  ;;  %v2563_v59 = vrot.slane %v2562_v4, 4  ;;  %v2816_v61 = vrot.slane %v2814_v18, 4  ;;  %v2842_v39 = vrot.slane %v4937_v58, 5 }
  0xa0   : > { %v2845_v35 = vrot.slane %v4943_v6, 5  ;;  %v3647_v40 = vrot.slane %v3639_v12, 9  ;;  %v2573_v30 = vrot.slane %v2572_v29, 4  ;;  %v2821_v51 = vrot.slane %v4883_v11, 5  ;;  %v3644_v11 = vld [vmem:[%s4330_s13 + $0x60] sm:$0xe] }
  0xa1   : > { %4009 = vmatprep.mubr.msk.bf16.mxu1 %vm588_vm3, %v3623_v22  ;;  %v2568_v23 = vsel %vm4359_vm4, %v2563_v59, %v2567_v5  ;;  %v2824_v55 = vrot.slane %v4896_v16, 5  ;;  %v2818_v53 = vsel %vm4525_vm7, %v2816_v61, %v2817_v54  ;;  %v2843_v58 = vsel %vm4525_vm7, %v3650_v2, %v2842_v39 }
  0xa2   : > { %v2844_v21 = vrot.slane %v2842_v39, 4  ;;  %v3651_v6 = vrot.slane %v3643_v33, 9  ;;  %v2578_v15 = vsel %vm4359_vm4, %v2573_v30, %v2577_v56  ;;  %v3663_v37 = vcombine.low %v2815_v44, %v2818_v53 }
  0xa3   : > { %v2823_v32 = vrot.slane %v2821_v51, 4  ;;  %v3624_v49 = vcombine.low %v2568_v23, %v2578_v15  ;;  %v2822_v14 = vsel %vm4525_vm7, %v3647_v40, %v2821_v51  ;;  %v3648_v57 = vrot.slane %v3640_v43, 9 }
  0xa4   : > { %3984 = vmatmul.mubr.msk.bf16.gmra.mxu0 %vm588_vm3, %v4168_v38  ;;  %v2846_v16 = vsel %vm4525_vm7, %v2844_v21, %v2845_v35  ;;  %v2850_v42 = vsel %vm4525_vm7, %v3651_v6, %v2849_v34  ;;  %v2853_v48 = vsel %vm4525_vm7, %v5002_v24, %v2852_v52  ;;  %v2828_v62 = vrot.slane %v4904_v31, 5  ;;  %v3645_v31 = vld [vmem:[%s4330_s13 + $0x6c] sm:$0xe]  ;;  %s3297_s13 = sshll.u32 %s4192_s18, 4  ;;  %s3298_s18 = sshll.u32 %s5437_s19, 5 }
  0xa5   : > { %4023 = vmatprep.mubr.msk.bf16.mxu0 %vm588_vm3, %v3663_v37  ;;  %v3667_v20 = vcombine.low %v2843_v58, %v2846_v16  ;;  %v2825_v50 = vsel %vm4525_vm7, %v2823_v32, %v2824_v55  ;;  %v2831_v27 = vrot.slane %v4909_v41, 5  ;;  %v3652_v5 = vrot.slane %v3644_v11, 9  ;;  %p5195_p7 = scmp.lt.s32.totalorder %s3297_s13, 31 }
  0xa6   : > { %4010 = vmatmul.mubr.msk.bf16.gmra.mxu1 %vm588_vm3, %v3624_v49  ;;  %v3664_v3 = vcombine.low %v2822_v14, %v2825_v50  ;;  %v2856_v34 = vrot.slane %v4982_v28, 5  ;;  %v2859_v26 = vrot.slane %v4990_v8, 5  ;;  %v2835_v63 = vrot.slane %v4922_v60, 5 }
  0xa7   : > { %4031 = vmatprep.mubr.msk.bf16.mxu1 %vm588_vm3, %v3667_v20  ;;  %v2829_v47 = vsel %vm4525_vm7, %v3648_v57, %v2828_v62  ;;  %v2830_v1 = vrot.slane %v2828_v62, 4  ;;  %v3649_v7 = vrot.slane %v3641_v17, 9  ;;  %v2838_v52 = vrot.slane %v4926_v46, 5  ;;  %s5439_s13 = smov (!%p5195_p7, %s3297_s13), 31 }
  0xa8   : > { %v2857_v41 = vsel %vm4525_vm7, %v3652_v5, %v2856_v34  ;;  %v2858_v24 = vrot.slane %v2856_v34, 4  ;;  %v2837_v10 = vrot.slane %v2835_v63, 4  ;;  %v3668_v25 = vcombine.low %v2850_v42, %v2853_v48  ;;  %s5232_s19 = sadd.s32 %s3298_s18, %s5439_s13 }
  0xa9   : > { %v2832_v28 = vsel %vm4525_vm7, %v2830_v1, %v2831_v27  ;;  %v2863_v8 = vrot.slane %v5007_v36, 5  ;;  %v3653_v9 = vrot.slane %v3645_v31, 9  ;;  %v2866_v46 = vrot.slane %v5015_v0, 5  ;;  %s3299_s12 = sshll.u32 %s5232_s19, 3 }
  0xaa   : > { %v3665_v60 = vcombine.low %v2829_v47, %v2832_v28  ;;  %v2860_v4 = vsel %vm4525_vm7, %v2858_v24, %v2859_v26  ;;  %v2836_v54 = vsel %vm4525_vm7, %v3649_v7, %v2835_v63  ;;  %v2839_v12 = vsel %vm4525_vm7, %v2837_v10, %v2838_v52  ;;  %s5262_s25 = scalar_lea.vmem %s5395_s4, %s3299_s12  ;;  %s5297_s30 = scalar_lea.vmem %s5396_s5, %s3299_s12 }
  0xab   : > { %v3669_v18 = vcombine.low %v2857_v41, %v2860_v4  ;;  %v2865_v13 = vrot.slane %v2863_v8, 4  ;;  %v3666_v36 = vcombine.low %v2836_v54, %v2839_v12  ;;  %v2864_v19 = vsel %vm4525_vm7, %v3653_v9, %v2863_v8 }
  0xac   : > { %4024 = vmatmul.mubr.msk.bf16.vlgmr.msra.gmra.mxu0 %vm588_vm3, %v3664_v3 }
  0xad   : > { %4027 = vmatprep.mubr.msk.bf16.mxu0 %vm588_vm3, %v3665_v60  ;;  %v2867_v0 = vsel %vm4525_vm7, %v2865_v13, %v2866_v46 }
  0xae   : > { %4032 = vmatmul.mubr.msk.bf16.vlgmr.msra.gmra.mxu1 %vm588_vm3, %v3668_v25  ;;  %v3670_v56 = vcombine.low %v2864_v19, %v2867_v0 }
  0xaf   : > { %4035 = vmatprep.mubr.msk.bf16.mxu1 %vm588_vm3, %v3669_v18 }
  0xb4   : > { %4028 = vmatmul.mubr.msk.bf16.gmra.mxu0 %vm588_vm3, %v3666_v36 }
  0xb6   : > { %4036 = vmatmul.mubr.msk.bf16.gmra.mxu1 %vm588_vm3, %v3670_v56 }
  0xe4   : > { %v3843_v2 = vpop.f32.mrf.mxu1 }
  0xe6   : > { %v842_v22 = vpop.f32.mrf.mxu1 }
  0xe8   : > { %v3844_v38 = vpop.f32.mrf.mxu1  ;;  %v3817_v59 = vpop.f32.mrf.mxu0 }
  0xe9   : > { %v851_v44 = vadd.f32 %v3843_v2, %v3817_v59 }
  0xea   : > { %v845_v29 = vpop.f32.mrf.mxu1  ;;  %v651_v33 = vpop.f32.mrf.mxu0 }
  0xeb   : > { %v843_v39 = vadd.f32 %v842_v22, %v651_v33 }
  0xec   : > { %v3847_v61 = vpop.f32.mrf.mxu1  ;;  %v3818_v35 = vpop.f32.mrf.mxu0 }
  0xed   : > { %v854_v23 = vadd.f32 %v3844_v38, %v3818_v35 }
  0xee   : > { %v858_v40 = vpop.f32.mrf.mxu1  ;;  %v654_v30 = vpop.f32.mrf.mxu0 }
  0xef   : > { %v846_v51 = vadd.f32 %v845_v29, %v654_v30 }
  0xf0   : > { %v3848_v45 = vpop.f32.mrf.mxu1 }
  0xf2   : > { %v861_v55 = vpop.f32.mrf.mxu1  ;;  %v3821_v53 = vpop.f32.mrf.mxu0 }
  0xf3   : > { %v867_v58 = vadd.f32 %v3847_v61, %v3821_v53 }
  0xf4   : > { %v667_v21 = vpop.f32.mrf.mxu0  ;;  %v3851_v6 = vpop.f32.mrf.mxu1 }
  0xf5   : > { %v859_v43 = vadd.f32 %v858_v40, %v667_v21 }
  0xf6   : > { %v3822_v15 = vpop.f32.mrf.mxu0  ;;  %v874_v37 = vpop.f32.mrf.mxu1 }
  0xf7   : > { %v870_v32 = vadd.f32 %v3848_v45, %v3822_v15 }
  0xf8   : > { %v670_v11 = vpop.f32.mrf.mxu0  ;;  %v3852_v49 = vpop.f32.mrf.mxu1 }
  0xf9   : > { %v862_v16 = vadd.f32 %v861_v55, %v670_v11 }
  0xfa   : > { %v3825_v14 = vpop.f32.mrf.mxu0  ;;  %v877_v20 = vpop.f32.mrf.mxu1 }
  0xfb   : > { %v883_v50 = vadd.f32 %v3851_v6, %v3825_v14 }
  0xfc   : > { %v683_v42 = vpop.f32.mrf.mxu0  ;;  %v3855_v57 = vpop.f32.mrf.mxu1 }
  0xfd   : > { %v875_v17 = vadd.f32 %v874_v37, %v683_v42 }
  0xfe   : > { %v3826_v48 = vpop.f32.mrf.mxu0  ;;  %v890_v62 = vpop.f32.mrf.mxu1 }
  0xff   : > { %v886_v27 = vadd.f32 %v3852_v49, %v3826_v48 }
 0x100   : > { %v686_v5 = vpop.f32.mrf.mxu0  ;;  %v3856_v3 = vpop.f32.mrf.mxu1 }
 0x101   : > { %v878_v34 = vadd.f32 %v877_v20, %v686_v5 }
 0x102   : > { %v893_v26 = vpop.f32.mrf.mxu1 }
 0x104   : > { %v3829_v63 = vpop.f32.mrf.mxu0  ;;  %v3895_v47 = vpop.f32.mrf.mxu1 }
 0x105   : > { %v899_v1 = vadd.f32 %v3855_v57, %v3829_v63 }
 0x106   : > { %v699_v7 = vpop.f32.mrf.mxu0  ;;  %v1344_v52 = vpop.f32.mrf.mxu1 }
 0x107   : > { %v891_v31 = vadd.f32 %v890_v62, %v699_v7 }
 0x108   : > { %v3830_v41 = vpop.f32.mrf.mxu0  ;;  %v3896_v24 = vpop.f32.mrf.mxu1 }
 0x109   : > { %v902_v10 = vadd.f32 %v3856_v3, %v3830_v41 }
 0x10a   : > { %v702_v25 = vpop.f32.mrf.mxu0  ;;  %v1347_v28 = vpop.f32.mrf.mxu1 }
 0x10b   : > { %v5105_v8 = vadd.f32 %v893_v26, %v702_v25 }
 0x10c   : > { %v3869_v60 = vpop.f32.mrf.mxu0  ;;  %v3899_v4 = vpop.f32.mrf.mxu1 }
 0x10d   : > { %v1175_v9 = vadd.f32 %v3869_v60, %v851_v44 }
 0x10e   : > { %v1110_v46 = vpop.f32.mrf.mxu0  ;;  %v1360_v18 = vpop.f32.mrf.mxu1 }
 0x10f   : > { %v5107_v54 = vadd.f32 %v3895_v47, %v1175_v9  ;;  %v1173_v12 = vadd.f32 %v1110_v46, %v843_v39 }
 0x110   : > { %v3870_v13 = vpop.f32.mrf.mxu0  ;;  %v3900_v36 = vpop.f32.mrf.mxu1 }
 0x111   : > { %v5109_v19 = vadd.f32 %v1344_v52, %v1173_v12  ;;  %v1176_v0 = vadd.f32 %v3870_v13, %v854_v23 }
 0x112   : > { %v1113_v56 = vpop.f32.mrf.mxu0  ;;  %v1363_v2 = vpop.f32.mrf.mxu1 }
 0x113   : > { %v5111_v22 = vadd.f32 %v3896_v24, %v1176_v0  ;;  %v1174_v38 = vadd.f32 %v1113_v56, %v846_v51 }
 0x114   : > { %v3873_v59 = vpop.f32.mrf.mxu0  ;;  %v3903_v29 = vpop.f32.mrf.mxu1 }
 0x115   : > { %v5113_v33 = vadd.f32 %v1347_v28, %v1174_v38  ;;  %v1179_v44 = vadd.f32 %v3873_v59, %v867_v58 }
 0x116   : > { %v1126_v61 = vpop.f32.mrf.mxu0  ;;  %v1376_v35 = vpop.f32.mrf.mxu1 }
 0x117   : > { %v5115_v40 = vadd.f32 %v3899_v4, %v1179_v44  ;;  %v1177_v39 = vadd.f32 %v1126_v61, %v859_v43 }
 0x118   : > { %v3874_v30 = vpop.f32.mrf.mxu0  ;;  %v3904_v45 = vpop.f32.mrf.mxu1 }
 0x119   : > { %v5117_v55 = vadd.f32 %v1360_v18, %v1177_v39  ;;  %v1180_v23 = vadd.f32 %v3874_v30, %v870_v32 }
 0x11a   : > { %v1129_v53 = vpop.f32.mrf.mxu0  ;;  %v1379_v21 = vpop.f32.mrf.mxu1 }
 0x11b   : > { %v5119_v6 = vadd.f32 %v3900_v36, %v1180_v23  ;;  %v1178_v51 = vadd.f32 %v1129_v53, %v862_v16 }
 0x11c   : > { %v3877_v15 = vpop.f32.mrf.mxu0  ;;  %v3907_v37 = vpop.f32.mrf.mxu1 }
 0x11d   : > { %v5121_v11 = vadd.f32 %v1363_v2, %v1178_v51  ;;  %v1183_v58 = vadd.f32 %v3877_v15, %v883_v50 }
 0x11e   : > { %v1142_v49 = vpop.f32.mrf.mxu0  ;;  %v1392_v14 = vpop.f32.mrf.mxu1 }
 0x11f   : > { %v5123_v20 = vadd.f32 %v3903_v29, %v1183_v58  ;;  %v1181_v43 = vadd.f32 %v1142_v49, %v875_v17 }
 0x120   : > { %v3878_v42 = vpop.f32.mrf.mxu0  ;;  %v3908_v57 = vpop.f32.mrf.mxu1 }
 0x121   : > { %v5125_v48 = vadd.f32 %v1376_v35, %v1181_v43  ;;  %v1184_v32 = vadd.f32 %v3878_v42, %v886_v27 }
 0x122   : > { %v1145_v62 = vpop.f32.mrf.mxu0  ;;  %v1395_v5 = vpop.f32.mrf.mxu1 }
 0x123   : > { %v5127_v3 = vadd.f32 %v3904_v45, %v1184_v32  ;;  %v1182_v16 = vadd.f32 %v1145_v62, %v878_v34 }
 0x124   : > { %v3881_v26 = vpop.f32.mrf.mxu0  ;;  %v5129_v63 = vpop.f32.mrf.mxu1 }
 0x125   : > { %v5131_v47 = vadd.f32 %v1379_v21, %v1182_v16  ;;  %v1187_v50 = vadd.f32 %v3881_v26, %v899_v1 }
 0x126   : > { %v1158_v7 = vpop.f32.mrf.mxu0  ;;  %v5133_v52 = vpop.f32.mrf.mxu1 }
 0x127   : > { %v5135_v17 = vadd.f32 %v3907_v37, %v1187_v50  ;;  %v1185_v41 = vadd.f32 %v1158_v7, %v891_v31 }
 0x128   : > { %v3882_v24 = vpop.f32.mrf.mxu0  ;;  %v5137_v25 = vpop.f32.mrf.mxu1 }
 0x129   : > { %v5139_v27 = vadd.f32 %v1392_v14, %v1185_v41  ;;  %v1188_v28 = vadd.f32 %v3882_v24, %v902_v10 }
 0x12a   : > { %v1161_v60 = vpop.f32.mrf.mxu0  ;;  %v5141_v34 = vpop.f32.mrf.mxu1 }
 0x12b   : > { %v5143_v4 = vadd.f32 %v3908_v57, %v1188_v28  ;;  %v1186_v9 = vadd.f32 %v1161_v60, %v5105_v8 }
 0x12c   : > { %v3921_v1 = vpop.f32.mrf.mxu0  ;;  %v5146_v46 = vpop.f32.mrf.mxu1 }
 0x12d   : > { %v5148_v18 = vadd.f32 %v1395_v5, %v1186_v9 }
 0x12e   : > { %v1761_v12 = vpop.f32.mrf.mxu0  ;;  %v5150_v31 = vpop.f32.mrf.mxu1 }
 0x130   : > { %v3922_v13 = vpop.f32.mrf.mxu0  ;;  %v5152_v36 = vpop.f32.mrf.mxu1 }
 0x132   : > { %v1764_v0 = vpop.f32.mrf.mxu0  ;;  %v5154_v10 = vpop.f32.mrf.mxu1 }
 0x134   : > { %v3925_v56 = vpop.f32.mrf.mxu0  ;;  %v5156_v38 = vpop.f32.mrf.mxu1 }
 0x136   : > { %v1777_v2 = vpop.f32.mrf.mxu0  ;;  %v5158_v8 = vpop.f32.mrf.mxu1 }
 0x138   : > { %v3926_v59 = vpop.f32.mrf.mxu0  ;;  %v5160_v44 = vpop.f32.mrf.mxu1 }
 0x13a   : > { %v1780_v29 = vpop.f32.mrf.mxu0  ;;  %v5162_v35 = vpop.f32.mrf.mxu1 }
 0x13c   : > { %v3929_v61 = vpop.f32.mrf.mxu0 }
 0x13e   : > { %v1793_v39 = vpop.f32.mrf.mxu0 }
 0x140   : > { %v3930_v30 = vpop.f32.mrf.mxu0  ;;  %v5164_v45 = vpop.f32.mrf.mxu1 }
 0x142   : > { %v1796_v23 = vpop.f32.mrf.mxu0  ;;  %v5166_v53 = vpop.f32.mrf.mxu1 }
 0x144   : > { %v3933_v21 = vpop.f32.mrf.mxu0  ;;  %v5168_v51 = vpop.f32.mrf.mxu1 }
 0x145   : > { %5401 = vst [vmem:[#allocation2_spill] sm:$0xff] %v5168_v51 }
 0x146   : > { %v1809_v15 = vpop.f32.mrf.mxu0  ;;  %v5170_v58 = vpop.f32.mrf.mxu1 }
 0x147   : > { %5402 = vst [vmem:[#allocation3_spill] sm:$0xff] %v5170_v58  ;;  %v1824_v58 = vadd.f32 %v1761_v12, %v5109_v19  ;;  %v1829_v19 = vadd.f32 %v1780_v29, %v5121_v11  ;;  %v1833_v11 = vadd.f32 %v1796_v23, %v5131_v47 }
 0x148   : > { %v3934_v37 = vpop.f32.mrf.mxu0 }
 0x14a   : > { %v1812_v49 = vpop.f32.mrf.mxu0 }
 0x14b   : > { %v5172_v43 = vpop.f32.mrf.mxu1  ;;  %v1837_v47 = vadd.f32 %v1812_v49, %v5148_v18 }
 0x14c   : > { %v3973_v14 = vpop.f32.mrf.mxu0  ;;  %5403 = vst [vmem:[#allocation4_spill] sm:$0xff] %v5172_v43  ;;  %v5414_v23 = vld [vmem:[#allocation2_spill] sm:$0xff] }
 0x14d   : > { %v5174_v57 = vpop.f32.mrf.mxu1 }
 0x14e   : > { %v2284_v42 = vpop.f32.mrf.mxu0  ;;  %5404 = vst [vmem:[#allocation5_spill] sm:$0xff] %v5174_v57 }
 0x14f   : > { %v5176_v62 = vpop.f32.mrf.mxu1 }
 0x150   : > { %v3974_v32 = vpop.f32.mrf.mxu0  ;;  %5405 = vst [vmem:[#allocation6_spill] sm:$0xff] %v5176_v62 }
 0x151   : > { %v5178_v16 = vpop.f32.mrf.mxu1 }
 0x152   : > { %v2287_v5 = vpop.f32.mrf.mxu0  ;;  %5406 = vst [vmem:[#allocation7_spill] sm:$0xff] %v5178_v16  ;;  %v1826_v16 = vadd.f32 %v3921_v1, %v5107_v54  ;;  %v1831_v54 = vadd.f32 %v3926_v59, %v5119_v6  ;;  %v1835_v6 = vadd.f32 %v3930_v30, %v5127_v3  ;;  %v1839_v3 = vadd.f32 %v3934_v37, %v5143_v4 }
 0x154   : > { %v3977_v26 = vpop.f32.mrf.mxu0  ;;  %v2115_v51 = vadd.f32 %v5129_v63, %v1826_v16 }
 0x155   : > { %v5180_v50 = vpop.f32.mrf.mxu1 }
 0x156   : > { %5407 = vst [vmem:[#allocation8_spill] sm:$0xff] %v5180_v50  ;;  %v2300_v7 = vpop.f32.mrf.mxu0 }
 0x157   : > { %v5182_v41 = vpop.f32.mrf.mxu1 }
 0x158   : > { %5408 = vst [vmem:[#allocation9_spill] sm:$0xff] %v5182_v41  ;;  %v3978_v24 = vpop.f32.mrf.mxu0  ;;  %v1825_v41 = vadd.f32 %v1764_v0, %v5113_v33  ;;  %v1834_v33 = vadd.f32 %v3929_v61, %v5123_v20 }
 0x159   : > { %v5184_v28 = vpop.f32.mrf.mxu1 }
 0x15a   : > { %5409 = vst [vmem:[#allocation10_spill] sm:$0xff] %v5184_v28  ;;  %v5186_v60 = vpop.f32.mrf.mxu0  ;;  %v1827_v28 = vadd.f32 %v3922_v13, %v5111_v22  ;;  %v2113_v22 = vadd.f32 %v5133_v52, %v1824_v58  ;;  %v1832_v13 = vadd.f32 %v1793_v39, %v5125_v48  ;;  %v1838_v48 = vadd.f32 %v3933_v21, %v5135_v17 }
 0x15b   : > { %5410 = vst [vmem:[#allocation11_spill] sm:$0xff] %v5186_v60  ;;  %v5188_v9 = vpop.f32.mrf.mxu1  ;;  %v1830_v60 = vadd.f32 %v3925_v56, %v5115_v40  ;;  %v1836_v52 = vadd.f32 %v1809_v15, %v5139_v27  ;;  %v2123_v59 = vadd.f32 %v5156_v38, %v1834_v33  ;;  %v2124_v17 = vadd.f32 %v5160_v44, %v1835_v6  ;;  %v5416_v44 = vld [vmem:[#allocation4_spill] sm:$0xff] }
 0x15c   : > { %5411 = vst [vmem:[#allocation12_spill] sm:$0xff] %v5188_v9  ;;  %v3981_v57 = vpop.f32.mrf.mxu0  ;;  %v2116_v40 = vadd.f32 %v5137_v25, %v1827_v28  ;;  %v2120_v25 = vadd.f32 %v5152_v36, %v1831_v54  ;;  %v2121_v29 = vadd.f32 %v5158_v8, %v1832_v13  ;;  %v2347_v61 = vadd.f32 %v2284_v42, %v2113_v22 }
 0x15d   : > { %v2119_v63 = vadd.f32 %v5146_v46, %v1830_v60  ;;  %v2349_v46 = vadd.f32 %v3973_v14, %v2115_v51  ;;  %v2122_v27 = vadd.f32 %v5162_v35, %v1833_v11  ;;  %v2127_v18 = vadd.f32 %v5164_v45, %v1838_v48  ;;  %v5415_v51 = vld [vmem:[#allocation3_spill] sm:$0xff]  ;;  %v5417_v14 = vld [vmem:[#allocation5_spill] sm:$0xff] }
 0x15e   : > { %v5191_v43 = vpop.f32.mrf.mxu1  ;;  %v2316_v62 = vpop.f32.mrf.mxu0  ;;  %v2350_v36 = vadd.f32 %v3974_v32, %v2116_v40  ;;  %v2125_v39 = vadd.f32 %v5166_v53, %v1836_v52  ;;  %v2128_v21 = vadd.f32 %v5414_v23, %v1839_v3  ;;  %v2126_v15 = vadd.f32 %v5415_v51, %v1837_v47  ;;  %v3125_v23 = vld [vmem:[%s5262_s25 + $0x50] sm:$0xff] }
 0x15f   : > { %5412 = vst [vmem:[#allocation13_spill] sm:$0xff] %v5191_v43  ;;  %v1828_v43 = vadd.f32 %v1777_v2, %v5117_v55  ;;  %v2114_v55 = vadd.f32 %v5141_v34, %v1825_v41  ;;  %v2118_v34 = vadd.f32 %v5154_v10, %v1829_v19  ;;  %v2353_v38 = vadd.f32 %v3977_v26, %v2119_v63  ;;  %v5420_v26 = vld [vmem:[#allocation7_spill] sm:$0xff]  ;;  %v5422_v19 = vld [vmem:[#allocation9_spill] sm:$0xff] }
 0x160   : > { %v5201_v50 = vpop.f32.mrf.mxu1  ;;  %v3982_v9 = vpop.f32.mrf.mxu0  ;;  %v2354_v37 = vadd.f32 %v3978_v24, %v2120_v25  ;;  %v2357_v58 = vadd.f32 %v3981_v57, %v2123_v59  ;;  %v2766_v35 = vadd.f32 %v5416_v44, %v2349_v46  ;;  %v2355_v32 = vadd.f32 %v2316_v62, %v2121_v29  ;;  %v5249_v57 = vld [vmem:[%s5393_s2] ss:$0 sm:$0xff]  ;;  %v5421_v24 = vld [vmem:[#allocation8_spill] sm:$0xff] }
 0x161   : > { %v2117_v20 = vadd.f32 %v5150_v31, %v1828_v43  ;;  %v2348_v10 = vadd.f32 %v2287_v5, %v2114_v55  ;;  %v2764_v43 = vadd.f32 %v5417_v14, %v2347_v61  ;;  %v5419_v5 = vld [vmem:[#allocation6_spill] sm:$0xff]  ;;  %v2358_v41 = vadd.f32 %v3982_v9, %v2124_v17  ;;  %v3117_v29 = vld [vmem:[%s5262_s25 + $0x10] sm:$0xff] }
 0x162   : > { %v5207_v1 = vpop.f32.mrf.mxu1  ;;  %v2319_v12 = vpop.f32.mrf.mxu0  ;;  %v5418_v42 = vld [vmem:[#allocation11_spill] sm:$0xff]  ;;  %v2767_v16 = vadd.f32 %v5419_v5, %v2350_v36  ;;  %v5252_v54 = vadd.f32 %v5421_v24, %v2353_v38  ;;  %v2772_v52 = vadd.f32 %v5201_v50, %v2355_v32 }
 0x163   : > { %v2351_v30 = vadd.f32 %v2300_v7, %v2117_v20  ;;  %v2352_v45 = vadd.f32 %v5418_v42, %v2118_v34  ;;  %v2765_v7 = vadd.f32 %v5420_v26, %v2348_v10  ;;  %v2356_v28 = vadd.f32 %v2319_v12, %v2122_v27  ;;  %v5423_v12 = vld [vmem:[#allocation10_spill] sm:$0xff]  ;;  %v5425_v20 = vld [vmem:[#allocation12_spill] sm:$0xff] }
 0x164   : > { %v5219_v0 = vpop.f32.mrf.mxu1  ;;  %v3985_v56 = vpop.f32.mrf.mxu0  ;;  %v5265_v13 = vadd.f32 %v5423_v12, %v2354_v37  ;;  %v2775_v47 = vadd.f32 %v5207_v1, %v2358_v41  ;;  %v3123_v42 = vld [vmem:[%s5262_s25 + $0x40] sm:$0xff] }
 0x165   : > { %v5255_v22 = vadd.f32 %v5422_v19, %v2351_v30  ;;  %v2361_v62 = vadd.f32 %v3985_v56, %v2127_v18  ;;  %v5271_v56 = vld [vmem:[%s5394_s3] ss:$0 sm:$0xff]  ;;  %v5274_v48 = vadd.f32 %v5425_v20, %v2352_v45  ;;  %v3126_v19 = vld [vmem:[%s5262_s25 + $0x58] sm:$0xff] }
 0x166   : > { %v2332_v2 = vpop.f32.mrf.mxu0  ;;  %v4011_v31 = vpop.f32.mrf.mxu1  ;;  %v5424_v40 = vld [vmem:[#allocation13_spill] sm:$0xff] }
 0x167   : > { %v2774_v55 = vadd.f32 %v5424_v40, %v2357_v58  ;;  %v2359_v6 = vadd.f32 %v2332_v2, %v2125_v39  ;;  %v2773_v2 = vadd.f32 %v5219_v0, %v2356_v28  ;;  %v2778_v17 = vadd.f32 %v4011_v31, %v2361_v62  ;;  %v3115_v0 = vld [vmem:[%s5262_s25] sm:$0xff] }
 0x168   : > { %v3986_v4 = vpop.f32.mrf.mxu0  ;;  %v2749_v8 = vpop.f32.mrf.mxu1 }
 0x169   : > { %v2362_v11 = vadd.f32 %v3986_v4, %v2128_v21  ;;  %v2776_v4 = vadd.f32 %v2749_v8, %v2359_v6 }
 0x16a   : > { %v2335_v49 = vpop.f32.mrf.mxu0  ;;  %v4012_v53 = vpop.f32.mrf.mxu1 }
 0x16b   : > { %v2360_v59 = vadd.f32 %v2335_v49, %v2126_v15  ;;  %v5283_v18 = vadd.f32 %v4012_v53, %v2362_v11  ;;  %v3118_v49 = vld [vmem:[%s5262_s25 + $0x18] sm:$0xff] }
 0x16c   : > { %v4025_v60 = vpop.f32.mrf.mxu0  ;;  %v2752_v33 = vpop.f32.mrf.mxu1 }
 0x16d   : > { %v3055_v9 = vadd.f32 %v4025_v60, %v2766_v35  ;;  %v5290_v37 = vadd.f32 %v2752_v33, %v2360_v59  ;;  %v3121_v59 = vld [vmem:[%s5262_s25 + $0x30] sm:$0xff] }
 0x16e   : > { %v2990_v63 = vpop.f32.mrf.mxu0  ;;  %v4033_v34 = vpop.f32.mrf.mxu1 }
 0x16f   : > { %v3078_v25 = vmul.f32 %v5249_v57, %v3055_v9  ;;  %v3053_v3 = vadd.f32 %v2990_v63, %v2764_v43  ;;  %v3063_v46 = vadd.f32 %v4033_v34, %v2774_v55 }
 0x170   : > { %v4026_v61 = vpop.f32.mrf.mxu0  ;;  %v3022_v50 = vpop.f32.mrf.mxu1 }
 0x171   : > { %v3101_v27 = vadd.f32 %v5271_v56, %v3078_v25  ;;  %v3076_v36 = vmul.f32 %v5249_v57, %v3053_v3  ;;  %v3056_v10 = vadd.f32 %v4026_v61, %v2767_v16  ;;  %v3086_v1 = vmul.f32 %v5249_v57, %v3063_v46 }
 0x172   : > { %v3061_v39 = vadd.f32 %v3022_v50, %v2772_v52  ;;  %v2993_v38 = vpop.f32.mrf.mxu0  ;;  %v4034_v51 = vpop.f32.mrf.mxu1  ;;  %v3124_v52 = vld [vmem:[%s5262_s25 + $0x48] sm:$0xff] }
 0x173   : > { %v3133_v30 = vadd.f32 %v3117_v29, %v3101_v27  ;;  %v3099_v31 = vadd.f32 %v5271_v56, %v3076_v36  ;;  %v3079_v21 = vmul.f32 %v5249_v57, %v3056_v10  ;;  %v3054_v15 = vadd.f32 %v2993_v38, %v2765_v7  ;;  %v3116_v7 = vld [vmem:[%s5262_s25 + $0x8] sm:$0xff] }
 0x174   : > { %v3109_v8 = vadd.f32 %v5271_v56, %v3086_v1  ;;  %v3084_v58 = vmul.f32 %v5249_v57, %v3061_v39  ;;  %v3064_v44 = vadd.f32 %v4034_v51, %v2775_v47  ;;  %v4029_v35 = vpop.f32.mrf.mxu0  ;;  %v3025_v53 = vpop.f32.mrf.mxu1 }
 0x175   : > { %v3149_v14 = vmax.f32 %v3133_v30, 0.0  ;;  %v3131_v43 = vadd.f32 %v3115_v0, %v3099_v31  ;;  %v3102_v45 = vadd.f32 %v5271_v56, %v3079_v21  ;;  %v3077_v32 = vmul.f32 %v5249_v57, %v3054_v15  ;;  %v3129_v0 = vld [vmem:[%s5262_s25 + $0x70] sm:$0xff]  ;;  %v3127_v15 = vld [vmem:[%s5262_s25 + $0x60] sm:$0xff] }
 0x176   : > { %v3141_v5 = vadd.f32 %v3125_v23, %v3109_v8  ;;  %v3107_v16 = vadd.f32 %v5271_v56, %v3084_v58  ;;  %v3087_v26 = vmul.f32 %v5249_v57, %v3064_v44  ;;  %v3062_v41 = vadd.f32 %v3025_v53, %v2773_v2  ;;  %v3006_v28 = vpop.f32.mrf.mxu0  ;;  %v4037_v9 = vpop.f32.mrf.mxu1 }
 0x177   : > { %3166 = vst.msk [vmem:[%s5297_s30 + $0x10] sm:$0xff] %vm3163_vm8, %v3149_v14  ;;  %v3147_v60 = vmax.f32 %v3131_v43, 0.0  ;;  %v3134_v24 = vadd.f32 %v3118_v49, %v3102_v45  ;;  %v3100_v62 = vadd.f32 %v5271_v56, %v3077_v32  ;;  %v3059_v33 = vadd.f32 %v4029_v35, %v5252_v54  ;;  %v3122_v14 = vld [vmem:[%s5262_s25 + $0x38] sm:$0xff] }
 0x178   : > { %v3157_v12 = vmax.f32 %v3141_v5, 0.0  ;;  %v3139_v40 = vadd.f32 %v3123_v42, %v3107_v16  ;;  %v3110_v55 = vadd.f32 %v5271_v56, %v3087_v26  ;;  %v3085_v6 = vmul.f32 %v5249_v57, %v3062_v41  ;;  %v4030_v11 = vpop.f32.mrf.mxu0  ;;  %v3038_v54 = vpop.f32.mrf.mxu1  ;;  %v3130_v45 = vld [vmem:[%s5262_s25 + $0x78] sm:$0xff]  ;;  %v3120_v26 = vld [vmem:[%s5262_s25 + $0x28] sm:$0xff] }
 0x179   : > { %3164 = vst.msk [vmem:[%s5297_s30] sm:$0xff] %vm3163_vm8, %v3147_v60  ;;  %v3150_v63 = vmax.f32 %v3134_v24, 0.0  ;;  %v3132_v20 = vadd.f32 %v3116_v7, %v3100_v62  ;;  %v3082_v25 = vmul.f32 %v5249_v57, %v3059_v33  ;;  %v3067_v34 = vadd.f32 %v4037_v9, %v2778_v17 }
 0x17a   : > { %3174 = vst.msk [vmem:[%s5297_s30 + $0x50] sm:$0xff] %vm3163_vm8, %v3157_v12  ;;  %v3155_v3 = vmax.f32 %v3139_v40, 0.0  ;;  %v3142_v47 = vadd.f32 %v3126_v19, %v3110_v55  ;;  %v3108_v2 = vadd.f32 %v5271_v56, %v3085_v6  ;;  %v3057_v29 = vadd.f32 %v3006_v28, %v5255_v22  ;;  %v4038_v36 = vpop.f32.mrf.mxu1  ;;  %v3009_v50 = vpop.f32.mrf.mxu0  ;;  %v3128_v19 = vld [vmem:[%s5262_s25 + $0x68] sm:$0xff] }
 0x17b   : > { %3167 = vst.msk [vmem:[%s5297_s30 + $0x18] sm:$0xff] %vm3163_vm8, %v3150_v63  ;;  %v3148_v46 = vmax.f32 %v3132_v20, 0.0  ;;  %v3105_v61 = vadd.f32 %v5271_v56, %v3082_v25  ;;  %v3090_v17 = vmul.f32 %v5249_v57, %v3067_v34  ;;  %v3065_v27 = vadd.f32 %v3038_v54, %v2776_v4  ;;  %v3119_v4 = vld [vmem:[%s5262_s25 + $0x20] sm:$0xff] }
 0x17c   : > { %3172 = vst.msk [vmem:[%s5297_s30 + $0x40] sm:$0xff] %vm3163_vm8, %v3155_v3  ;;  %v3158_v10 = vmax.f32 %v3142_v47, 0.0  ;;  %v3140_v1 = vadd.f32 %v3124_v52, %v3108_v2  ;;  %v3080_v22 = vmul.f32 %v5249_v57, %v3057_v29  ;;  %v3060_v39 = vadd.f32 %v4030_v11, %v5265_v13  ;;  %v3041_v21 = vpop.f32.mrf.mxu1 }
 0x17d   : > { %3165 = vst.msk [vmem:[%s5297_s30 + $0x8] sm:$0xff] %vm3163_vm8, %v3148_v46  ;;  %v3137_v38 = vadd.f32 %v3121_v59, %v3105_v61  ;;  %v3113_v30 = vadd.f32 %v5271_v56, %v3090_v17  ;;  %v3088_v23 = vmul.f32 %v5249_v57, %v3065_v27  ;;  %v3068_v31 = vadd.f32 %v4038_v36, %v5283_v18 }
 0x17e   : > { %3175 = vst.msk [vmem:[%s5297_s30 + $0x58] sm:$0xff] %vm3163_vm8, %v3158_v10  ;;  %v3156_v51 = vmax.f32 %v3140_v1, 0.0  ;;  %v3103_v13 = vadd.f32 %v5271_v56, %v3080_v22  ;;  %v3083_v8 = vmul.f32 %v5249_v57, %v3060_v39  ;;  %v3058_v58 = vadd.f32 %v3009_v50, %v5274_v48 }
 0x17f   : > { %v3153_v49 = vmax.f32 %v3137_v38, 0.0  ;;  %v3145_v44 = vadd.f32 %v3129_v0, %v3113_v30  ;;  %v3111_v35 = vadd.f32 %v5271_v56, %v3088_v23  ;;  %v3091_v18 = vmul.f32 %v5249_v57, %v3068_v31 }
 0x180   : > { %3173 = vst.msk [vmem:[%s5297_s30 + $0x48] sm:$0xff] %vm3163_vm8, %v3156_v51  ;;  %v3135_v43 = vadd.f32 %v3119_v4, %v3103_v13  ;;  %v3106_v42 = vadd.f32 %v5271_v56, %v3083_v8  ;;  %v3081_v32 = vmul.f32 %v5249_v57, %v3058_v58  ;;  %v3066_v48 = vadd.f32 %v3041_v21, %v5290_v37 }
 0x181   : > { %3170 = vst.msk [vmem:[%s5297_s30 + $0x30] sm:$0xff] %vm3163_vm8, %v3153_v49  ;;  %v3161_v53 = vmax.f32 %v3145_v44, 0.0  ;;  %v3143_v5 = vadd.f32 %v3127_v15, %v3111_v35  ;;  %v3114_v16 = vadd.f32 %v5271_v56, %v3091_v18 }
 0x182   : > { %v3151_v7 = vmax.f32 %v3135_v43, 0.0  ;;  %v3138_v41 = vadd.f32 %v3122_v14, %v3106_v42  ;;  %v3104_v28 = vadd.f32 %v5271_v56, %v3081_v32  ;;  %v3089_v60 = vmul.f32 %v5249_v57, %v3066_v48 }
 0x183   : > { %3178 = vst.msk [vmem:[%s5297_s30 + $0x70] sm:$0xff] %vm3163_vm8, %v3161_v53  ;;  %v3159_v37 = vmax.f32 %v3143_v5, 0.0  ;;  %v3146_v24 = vadd.f32 %v3130_v45, %v3114_v16 }
 0x184   : > { %3168 = vst.msk [vmem:[%s5297_s30 + $0x20] sm:$0xff] %vm3163_vm8, %v3151_v7  ;;  %v3154_v62 = vmax.f32 %v3138_v41, 0.0  ;;  %v3136_v33 = vadd.f32 %v3120_v26, %v3104_v28  ;;  %v3112_v9 = vadd.f32 %v5271_v56, %v3089_v60 }
 0x185   : > { %3176 = vst.msk [vmem:[%s5297_s30 + $0x60] sm:$0xff] %vm3163_vm8, %v3159_v37  ;;  %v3162_v12 = vmax.f32 %v3146_v24, 0.0 }
 0x186   : > { %3171 = vst.msk [vmem:[%s5297_s30 + $0x38] sm:$0xff] %vm3163_vm8, %v3154_v62  ;;  %v3152_v40 = vmax.f32 %v3136_v33, 0.0  ;;  %v3144_v55 = vadd.f32 %v3128_v19, %v3112_v9 }
 0x187   : > { %3179 = vst.msk [vmem:[%s5297_s30 + $0x78] sm:$0xff] %vm3163_vm8, %v3162_v12 }
 0x188   : > { %3169 = vst.msk [vmem:[%s5297_s30 + $0x28] sm:$0xff] %vm3163_vm8, %v3152_v40  ;;  %v3160_v57 = vmax.f32 %v3144_v55, 0.0 }
 0x18a   : > { %3177 = vst.msk [vmem:[%s5297_s30 + $0x68] sm:$0xff] %vm3163_vm8, %v3160_v57 }
 0x18b PF: > { %s15_s22 = sadd.s32 1, %s4208_s22   ;;  %s5426_s18 = smov %s4200_s20 }
 0x18c   : > { %p12_p8 = scmp.ge.s32.totalorder %s15_s22, 6   ;;  %s5427_s19 = smov %s4204_s21 }
 0x18d   : > { %s5428_s20 = smov %s5431_s23  ;;  %s5429_s21 = smov %s5435_s24 }
 0x18e   :  { %14 = sbr.rel (!%p12_p8) target bundleno = 3 (0x3), region = 83 }

</bundles_post_ra>
